<compile_context>
chip_gen: v5e
topology: v5e:2x2
jax: 0.10.0
libtpu: 0.0.40
codegen_flags: <defaults>
</compile_context>

<pallas_src>
import functools

import jax
import jax.numpy as jnp
from jax import lax
from jax.experimental import pallas as pl
from jax.experimental.pallas import tpu as pltpu

BN_EPS = 1e-5
LANE = 128


def _conv_stats_kernel(xee_ref, xeo_ref, xoe_ref, xoo_ref, w_ref, y_ref, st_ref,
                       *, b, ho, wo, cin):
    """B folded N*D slices: 3x3 / stride-2 conv as 9 accumulated MXU matmuls
    (one per tap, no im2col concat / staging) + per-tile partial BN statistics
    computed from the f32 accumulator before the bf16 downcast."""
    planes = ((xee_ref[...], xeo_ref[...]), (xoe_ref[...], xoo_ref[...]))
    w = w_ref[...]
    rows = b * ho * wo
    cp = y_ref.shape[-1]

    acc = jnp.zeros((rows, cp), jnp.float32)
    k = 0
    for kh in range(3):
        a, sh = kh % 2, kh // 2
        for kw in range(3):
            pb, sw = kw % 2, kw // 2
            # window[n, i, j, c] == x_padded[n, 2*i + kh, 2*j + kw, c]
            win = planes[a][pb][:, sh:sh + ho, sw:sw + wo, :].reshape(rows, cin)
            acc = acc + jnp.dot(win, w[k * cin:(k + 1) * cin, :],
                                preferred_element_type=jnp.float32)
            k += 1

    # Numerically-stable per-tile partials (sum, sum of squared deviations around
    # the tile mean), taken from the f32 accumulator so BN stats carry no bf16
    # quantization error; combined globally on the host (Chan-style).
    tsum = jnp.sum(acc, axis=0, keepdims=True)                 # (1, Cp)
    dev = acc - tsum * (1.0 / rows)
    tssd = jnp.sum(dev * dev, axis=0, keepdims=True)           # (1, Cp)
    st_ref[...] = jnp.concatenate([tsum, tssd], axis=0)        # (2, Cp)

    # bf16 intermediate: halves the write + re-read HBM traffic of the conv output.
    y_ref[...] = acc.astype(y_ref.dtype)


def _pick_fold(nd, rows_per_slice, target_rows=2048):
    """Slices folded per grid step: ~0.5-2K output rows per MXU call, >=2 grid
    steps when possible (2-TC sharding on v7x), bf16-sublane-friendly blocks."""
    divs = [b for b in range(1, nd + 1) if nd % b == 0]
    valid = [b for b in divs if (b * rows_per_slice) % 16 == 0 or nd // b == 1]
    pref = [b for b in valid if nd // b >= 2 and b * rows_per_slice <= target_rows]
    if pref:
        return max(pref)
    small = [b for b in valid if b * rows_per_slice <= target_rows]
    if small:
        return max(small)
    return min(valid)


def downsample_forward(x, weight, gamma, beta):
    """x: (N, C, D, H, W) f32; weight: (Cout, C, 1, 3, 3); gamma/beta: (Cout,)."""
    N, C, D, H, W = x.shape
    Cout = weight.shape[0]
    Ho, Wo = (H + 1) // 2, (W + 1) // 2          # PyTorch k=3, s=2, p=1 output size
    ND = N * D                                   # temporal kernel is 1 -> fold D into batch
    Cp = ((Cout + LANE - 1) // LANE) * LANE      # lane-dense output channels
    Hh, Wh = Ho + 1, Wo + 1

    # ---- host glue: channels-last, bf16, pad, stride-2 parity split ----
    x2 = jnp.transpose(x, (0, 2, 3, 4, 1)).reshape(ND, H, W, C).astype(jnp.bfloat16)
    Hp, Wp = 2 * Hh, 2 * Wh                      # conv pad=1 (+extra zeros if odd H/W)
    xp = jnp.pad(x2, ((0, 0), (1, Hp - H - 1), (1, Wp - W - 1), (0, 0)))
    xee = xp[:, 0::2, 0::2, :]                   # (ND, Hh, Wh, C): P[a][b][i,j] = xp[2i+a, 2j+b]
    xeo = xp[:, 0::2, 1::2, :]
    xoe = xp[:, 1::2, 0::2, :]
    xoo = xp[:, 1::2, 1::2, :]

    # Weight (Cout, C, 1, 3, 3) -> (kh, kw, c, cout) -> (9C, Cp), bf16 for the MXU.
    w2 = jnp.transpose(weight[:, :, 0, :, :], (2, 3, 1, 0)).reshape(9 * C, Cout)
    w2 = jnp.pad(w2, ((0, 0), (0, Cp - Cout))).astype(jnp.bfloat16)

    # ---- M-tiling: fold B slices per grid step ----
    B = _pick_fold(ND, Ho * Wo)
    T = ND // B
    rows = B * Ho * Wo
    M = ND * Ho * Wo

    # Per-step VMEM (double-buffered inputs/outputs + weight); raise the scoped
    # limit only if the derived budget needs it (v5e default 16 MiB, v6e/v7x 32 MiB).
    step_bytes = 2 * (4 * B * Hh * Wh * C * 2 + rows * Cp * 2 + 2 * Cp * 4) + 2 * 9 * C * Cp * 2
    vmem_limit = None
    if step_bytes > 14 * 1024 * 1024:
        vmem_limit = min(step_bytes + (8 << 20), 100 << 20)

    # ---- pass 1: conv (accumulated matmuls) + per-tile partial BN stats ----
    kernel1 = functools.partial(_conv_stats_kernel, b=B, ho=Ho, wo=Wo, cin=C)
    y_conv, partial_stats = pl.pallas_call(
        kernel1,
        out_shape=(jax.ShapeDtypeStruct((M, Cp), jnp.bfloat16),
                   jax.ShapeDtypeStruct((T, 2, Cp), jnp.float32)),
        grid_spec=pltpu.PrefetchScalarGridSpec(
            num_scalar_prefetch=0,
            grid=(T,),
            in_specs=[
                pl.BlockSpec((B, Hh, Wh, C), lambda t: (t, 0, 0, 0)),
                pl.BlockSpec((B, Hh, Wh, C), lambda t: (t, 0, 0, 0)),
                pl.BlockSpec((B, Hh, Wh, C), lambda t: (t, 0, 0, 0)),
                pl.BlockSpec((B, Hh, Wh, C), lambda t: (t, 0, 0, 0)),
                pl.BlockSpec((9 * C, Cp), lambda t: (0, 0)),
            ],
            out_specs=(
                pl.BlockSpec((rows, Cp), lambda t: (t, 0)),
                pl.BlockSpec((None, 2, Cp), lambda t: (t, 0, 0)),
            ),
        ),
        compiler_params=pltpu.CompilerParams(
            dimension_semantics=("parallel",),
            vmem_limit_bytes=vmem_limit),
    )(xee, xeo, xoe, xoo, w2)

    # ---- host: Chan-combine partial stats (exact global batch mean/var), fold BN ----
    rows_f = jnp.float32(rows)
    tsum = partial_stats[:, 0, :]                                # (T, Cp)
    tssd = partial_stats[:, 1, :]
    mean = jnp.sum(tsum, axis=0) / M                             # (Cp,)
    tmean = tsum / rows_f
    var = (jnp.sum(tssd, axis=0)
           + rows_f * jnp.sum(jnp.square(tmean - mean[None, :]), axis=0)) / M   # biased
    gamma_p = jnp.pad(gamma.astype(jnp.float32), (0, Cp - Cout))  # pad gamma with 0 (keeps pads at 0)
    beta_p = jnp.pad(beta.astype(jnp.float32), (0, Cp - Cout))
    scale = gamma_p * lax.rsqrt(var + BN_EPS)
    shift = beta_p - mean * scale

    # ---- epilogue: BN + ReLU + un-pad + NCDHW layout, fused by XLA into one pass ----
    out = jnp.maximum(y_conv.astype(jnp.float32) * scale[None, :] + shift[None, :], 0.0)
    out = out[:, :Cout].reshape(N, D, Ho, Wo, Cout)
    return jnp.transpose(out, (0, 4, 1, 2, 3))                   # (N, Cout, D, Ho, Wo)


def downsample_reference(x, weight, gamma, beta):
    """Pure-JAX reference matching PyTorch Downsample forward (training-mode BN)."""
    N, C, D, H, W = x.shape
    Cout = weight.shape[0]
    x2 = jnp.transpose(x, (0, 2, 1, 3, 4)).reshape(N * D, C, H, W)
    y = lax.conv_general_dilated(
        x2, weight[:, :, 0],
        window_strides=(2, 2), padding=((1, 1), (1, 1)),
        dimension_numbers=("NCHW", "OIHW", "NCHW"),
    )  # (N*D, Cout, Ho, Wo)
    mean = jnp.mean(y, axis=(0, 2, 3), keepdims=True)
    var = jnp.mean((y - mean) ** 2, axis=(0, 2, 3), keepdims=True)
    yh = (y - mean) / jnp.sqrt(var + BN_EPS)
    yh = yh * gamma.reshape(1, Cout, 1, 1) + beta.reshape(1, Cout, 1, 1)
    yh = jnp.maximum(yh, 0.0)
    Ho, Wo = y.shape[2], y.shape[3]
    return jnp.transpose(yh.reshape(N, D, Cout, Ho, Wo), (0, 2, 1, 3, 4))


if __name__ == "__main__":
    # Small shapes: batch=2, dim=4 (-> dim_out=8), D=4, H=W=16.
    N, dim, D, H, W = 2, 4, 4, 16, 16
    dim_out = 2 * dim  # keep_dim=False

    key = jax.random.PRNGKey(0)
    kx, kw, kg, kb = jax.random.split(key, 4)
    x = jax.random.normal(kx, (N, dim, D, H, W), dtype=jnp.float32)
    # Conv3d weight shape (out_channels, in_channels, kD=1, kH=3, kW=3), bias=False.
    weight = 0.1 * jax.random.normal(kw, (dim_out, dim, 1, 3, 3), dtype=jnp.float32)
    gamma = 1.0 + 0.1 * jax.random.normal(kg, (dim_out,), dtype=jnp.float32)
    beta = 0.1 * jax.random.normal(kb, (dim_out,), dtype=jnp.float32)

    out = downsample_forward(x, weight, gamma, beta)
    out = jax.block_until_ready(out)

    ref = downsample_reference(x, weight, gamma, beta)
    assert out.shape == (N, dim_out, D, H // 2, W // 2), out.shape
    # bf16 inputs / weights / intermediate vs f32 reference -> ~1% relative error.
    assert jnp.allclose(out, ref, atol=2e-2, rtol=2e-2), float(jnp.max(jnp.abs(out - ref)))

    print("KERNEL_OK")
</pallas_src>

<mosaic_0001>
module attributes {stable_mosaic.version = 11 : i64} {
  func.func @_conv_stats_kernel(%arg0: i32, %arg1: memref<4x9x9x4xbf16, #tpu.memory_space<vmem>>, %arg2: memref<4x9x9x4xbf16, #tpu.memory_space<vmem>>, %arg3: memref<4x9x9x4xbf16, #tpu.memory_space<vmem>>, %arg4: memref<4x9x9x4xbf16, #tpu.memory_space<vmem>>, %arg5: memref<36x128xbf16, #tpu.memory_space<vmem>>, %arg6: memref<256x128xbf16, #tpu.memory_space<vmem>>, %arg7: memref<1x2x128xf32, #tpu.memory_space<vmem>>) attributes {dimension_semantics = [#tpu.dimension_semantics<parallel>], iteration_bounds = array<i64: 2>, scalar_prefetch = 0 : i64, scratch_operands = 0 : i64, tpu.core_type = #tpu.core_type<tc>, window_params = [{transform_indices = @transform_0, window_bounds = array<i64: 4, 9, 9, 4>}, {transform_indices = @transform_1, window_bounds = array<i64: 4, 9, 9, 4>}, {transform_indices = @transform_2, window_bounds = array<i64: 4, 9, 9, 4>}, {transform_indices = @transform_3, window_bounds = array<i64: 4, 9, 9, 4>}, {pipeline_mode = #tpu.pipeline_mode<synchronous>, transform_indices = @transform_4, window_bounds = array<i64: 36, 128>}, {transform_indices = @transform_5, window_bounds = array<i64: 256, 128>}, {transform_indices = @transform_6, window_bounds = array<i64: 1, 2, 128>}]} {
    %c0 = arith.constant 0 : index
    %c0_0 = arith.constant 0 : index
    %c0_1 = arith.constant 0 : index
    %c0_2 = arith.constant 0 : index
    %0 = vector.load %arg1[%c0, %c0_0, %c0_1, %c0_2] : memref<4x9x9x4xbf16, #tpu.memory_space<vmem>>, vector<4x9x9x4xbf16>
    %c0_3 = arith.constant 0 : index
    %c0_4 = arith.constant 0 : index
    %c0_5 = arith.constant 0 : index
    %c0_6 = arith.constant 0 : index
    %1 = vector.load %arg2[%c0_3, %c0_4, %c0_5, %c0_6] : memref<4x9x9x4xbf16, #tpu.memory_space<vmem>>, vector<4x9x9x4xbf16>
    %c0_7 = arith.constant 0 : index
    %c0_8 = arith.constant 0 : index
    %c0_9 = arith.constant 0 : index
    %c0_10 = arith.constant 0 : index
    %2 = vector.load %arg3[%c0_7, %c0_8, %c0_9, %c0_10] : memref<4x9x9x4xbf16, #tpu.memory_space<vmem>>, vector<4x9x9x4xbf16>
    %c0_11 = arith.constant 0 : index
    %c0_12 = arith.constant 0 : index
    %c0_13 = arith.constant 0 : index
    %c0_14 = arith.constant 0 : index
    %3 = vector.load %arg4[%c0_11, %c0_12, %c0_13, %c0_14] : memref<4x9x9x4xbf16, #tpu.memory_space<vmem>>, vector<4x9x9x4xbf16>
    %c0_15 = arith.constant 0 : index
    %c0_16 = arith.constant 0 : index
    %4 = vector.load %arg5[%c0_15, %c0_16] : memref<36x128xbf16, #tpu.memory_space<vmem>>, vector<36x128xbf16>
    %cst = arith.constant 0.000000e+00 : f32
    %5 = vector.broadcast %cst : f32 to vector<256x128xf32>
    %6 = vector.extract_strided_slice %0 {offsets = [0, 0, 0, 0], sizes = [4, 8, 8, 4], strides = [1, 1, 1, 1]} : vector<4x9x9x4xbf16> to vector<4x8x8x4xbf16>
    %7 = vector.shape_cast %6 : vector<4x8x8x4xbf16> to vector<256x4xbf16>
    %8 = vector.extract_strided_slice %4 {offsets = [0, 0], sizes = [4, 128], strides = [1, 1]} : vector<36x128xbf16> to vector<4x128xbf16>
    %cst_17 = arith.constant dense<0.000000e+00> : vector<256x128xf32>
    %9 = tpu.matmul %7, %8, %cst_17 {dimension_numbers = #tpu.dot_dimension_numbers<[1], [0], [0], [1], [0, 0, 1, 1], [], []>} : vector<256x4xbf16>, vector<4x128xbf16>, vector<256x128xf32> -> vector<256x128xf32>
    %10 = arith.addf %5, %9 : vector<256x128xf32>
    %11 = vector.extract_strided_slice %1 {offsets = [0, 0, 0, 0], sizes = [4, 8, 8, 4], strides = [1, 1, 1, 1]} : vector<4x9x9x4xbf16> to vector<4x8x8x4xbf16>
    %12 = vector.shape_cast %11 : vector<4x8x8x4xbf16> to vector<256x4xbf16>
    %13 = vector.extract_strided_slice %4 {offsets = [4, 0], sizes = [4, 128], strides = [1, 1]} : vector<36x128xbf16> to vector<4x128xbf16>
    %cst_18 = arith.constant dense<0.000000e+00> : vector<256x128xf32>
    %14 = tpu.matmul %12, %13, %cst_18 {dimension_numbers = #tpu.dot_dimension_numbers<[1], [0], [0], [1], [0, 0, 1, 1], [], []>} : vector<256x4xbf16>, vector<4x128xbf16>, vector<256x128xf32> -> vector<256x128xf32>
    %15 = arith.addf %10, %14 : vector<256x128xf32>
    %16 = vector.extract_strided_slice %0 {offsets = [0, 0, 1, 0], sizes = [4, 8, 8, 4], strides = [1, 1, 1, 1]} : vector<4x9x9x4xbf16> to vector<4x8x8x4xbf16>
    %17 = vector.shape_cast %16 : vector<4x8x8x4xbf16> to vector<256x4xbf16>
    %18 = vector.extract_strided_slice %4 {offsets = [8, 0], sizes = [4, 128], strides = [1, 1]} : vector<36x128xbf16> to vector<4x128xbf16>
    %cst_19 = arith.constant dense<0.000000e+00> : vector<256x128xf32>
    %19 = tpu.matmul %17, %18, %cst_19 {dimension_numbers = #tpu.dot_dimension_numbers<[1], [0], [0], [1], [0, 0, 1, 1], [], []>} : vector<256x4xbf16>, vector<4x128xbf16>, vector<256x128xf32> -> vector<256x128xf32>
    %20 = arith.addf %15, %19 : vector<256x128xf32>
    %21 = vector.extract_strided_slice %2 {offsets = [0, 0, 0, 0], sizes = [4, 8, 8, 4], strides = [1, 1, 1, 1]} : vector<4x9x9x4xbf16> to vector<4x8x8x4xbf16>
    %22 = vector.shape_cast %21 : vector<4x8x8x4xbf16> to vector<256x4xbf16>
    %23 = vector.extract_strided_slice %4 {offsets = [12, 0], sizes = [4, 128], strides = [1, 1]} : vector<36x128xbf16> to vector<4x128xbf16>
    %cst_20 = arith.constant dense<0.000000e+00> : vector<256x128xf32>
    %24 = tpu.matmul %22, %23, %cst_20 {dimension_numbers = #tpu.dot_dimension_numbers<[1], [0], [0], [1], [0, 0, 1, 1], [], []>} : vector<256x4xbf16>, vector<4x128xbf16>, vector<256x128xf32> -> vector<256x128xf32>
    %25 = arith.addf %20, %24 : vector<256x128xf32>
    %26 = vector.extract_strided_slice %3 {offsets = [0, 0, 0, 0], sizes = [4, 8, 8, 4], strides = [1, 1, 1, 1]} : vector<4x9x9x4xbf16> to vector<4x8x8x4xbf16>
    %27 = vector.shape_cast %26 : vector<4x8x8x4xbf16> to vector<256x4xbf16>
    %28 = vector.extract_strided_slice %4 {offsets = [16, 0], sizes = [4, 128], strides = [1, 1]} : vector<36x128xbf16> to vector<4x128xbf16>
    %cst_21 = arith.constant dense<0.000000e+00> : vector<256x128xf32>
    %29 = tpu.matmul %27, %28, %cst_21 {dimension_numbers = #tpu.dot_dimension_numbers<[1], [0], [0], [1], [0, 0, 1, 1], [], []>} : vector<256x4xbf16>, vector<4x128xbf16>, vector<256x128xf32> -> vector<256x128xf32>
    %30 = arith.addf %25, %29 : vector<256x128xf32>
    %31 = vector.extract_strided_slice %2 {offsets = [0, 0, 1, 0], sizes = [4, 8, 8, 4], strides = [1, 1, 1, 1]} : vector<4x9x9x4xbf16> to vector<4x8x8x4xbf16>
    %32 = vector.shape_cast %31 : vector<4x8x8x4xbf16> to vector<256x4xbf16>
    %33 = vector.extract_strided_slice %4 {offsets = [20, 0], sizes = [4, 128], strides = [1, 1]} : vector<36x128xbf16> to vector<4x128xbf16>
    %cst_22 = arith.constant dense<0.000000e+00> : vector<256x128xf32>
    %34 = tpu.matmul %32, %33, %cst_22 {dimension_numbers = #tpu.dot_dimension_numbers<[1], [0], [0], [1], [0, 0, 1, 1], [], []>} : vector<256x4xbf16>, vector<4x128xbf16>, vector<256x128xf32> -> vector<256x128xf32>
    %35 = arith.addf %30, %34 : vector<256x128xf32>
    %36 = vector.extract_strided_slice %0 {offsets = [0, 1, 0, 0], sizes = [4, 8, 8, 4], strides = [1, 1, 1, 1]} : vector<4x9x9x4xbf16> to vector<4x8x8x4xbf16>
    %37 = vector.shape_cast %36 : vector<4x8x8x4xbf16> to vector<256x4xbf16>
    %38 = vector.extract_strided_slice %4 {offsets = [24, 0], sizes = [4, 128], strides = [1, 1]} : vector<36x128xbf16> to vector<4x128xbf16>
    %cst_23 = arith.constant dense<0.000000e+00> : vector<256x128xf32>
    %39 = tpu.matmul %37, %38, %cst_23 {dimension_numbers = #tpu.dot_dimension_numbers<[1], [0], [0], [1], [0, 0, 1, 1], [], []>} : vector<256x4xbf16>, vector<4x128xbf16>, vector<256x128xf32> -> vector<256x128xf32>
    %40 = arith.addf %35, %39 : vector<256x128xf32>
    %41 = vector.extract_strided_slice %1 {offsets = [0, 1, 0, 0], sizes = [4, 8, 8, 4], strides = [1, 1, 1, 1]} : vector<4x9x9x4xbf16> to vector<4x8x8x4xbf16>
    %42 = vector.shape_cast %41 : vector<4x8x8x4xbf16> to vector<256x4xbf16>
    %43 = vector.extract_strided_slice %4 {offsets = [28, 0], sizes = [4, 128], strides = [1, 1]} : vector<36x128xbf16> to vector<4x128xbf16>
    %cst_24 = arith.constant dense<0.000000e+00> : vector<256x128xf32>
    %44 = tpu.matmul %42, %43, %cst_24 {dimension_numbers = #tpu.dot_dimension_numbers<[1], [0], [0], [1], [0, 0, 1, 1], [], []>} : vector<256x4xbf16>, vector<4x128xbf16>, vector<256x128xf32> -> vector<256x128xf32>
    %45 = arith.addf %40, %44 : vector<256x128xf32>
    %46 = vector.extract_strided_slice %0 {offsets = [0, 1, 1, 0], sizes = [4, 8, 8, 4], strides = [1, 1, 1, 1]} : vector<4x9x9x4xbf16> to vector<4x8x8x4xbf16>
    %47 = vector.shape_cast %46 : vector<4x8x8x4xbf16> to vector<256x4xbf16>
    %48 = vector.extract_strided_slice %4 {offsets = [32, 0], sizes = [4, 128], strides = [1, 1]} : vector<36x128xbf16> to vector<4x128xbf16>
    %cst_25 = arith.constant dense<0.000000e+00> : vector<256x128xf32>
    %49 = tpu.matmul %47, %48, %cst_25 {dimension_numbers = #tpu.dot_dimension_numbers<[1], [0], [0], [1], [0, 0, 1, 1], [], []>} : vector<256x4xbf16>, vector<4x128xbf16>, vector<256x128xf32> -> vector<256x128xf32>
    %50 = arith.addf %45, %49 : vector<256x128xf32>
    %cst_26 = arith.constant dense<0.000000e+00> : vector<128xf32>
    %51 = vector.multi_reduction <add>, %50, %cst_26 [0] : vector<256x128xf32> to vector<128xf32>
    %52 = vector.shape_cast %51 : vector<128xf32> to vector<1x128xf32>
    %cst_27 = arith.constant 3.906250e-03 : f32
    %53 = vector.broadcast %cst_27 : f32 to vector<1x128xf32>
    %54 = arith.mulf %52, %53 : vector<1x128xf32>
    %55 = vector.broadcast %54 : vector<1x128xf32> to vector<256x128xf32>
    %56 = arith.subf %50, %55 : vector<256x128xf32>
    %57 = arith.mulf %56, %56 : vector<256x128xf32>
    %cst_28 = arith.constant dense<0.000000e+00> : vector<128xf32>
    %58 = vector.multi_reduction <add>, %57, %cst_28 [0] : vector<256x128xf32> to vector<128xf32>
    %59 = vector.shape_cast %58 : vector<128xf32> to vector<1x128xf32>
    %60 = tpu.concatenate %52, %59 in 0 : vector<1x128xf32>, vector<1x128xf32> -> vector<2x128xf32>
    %c0_29 = arith.constant 0 : index
    %c0_30 = arith.constant 0 : index
    %c0_31 = arith.constant 0 : index
    %61 = vector.load %arg7[%c0_29, %c0_30, %c0_31] : memref<1x2x128xf32, #tpu.memory_space<vmem>>, vector<1x2x128xf32>
    %62 = vector.shape_cast %61 : vector<1x2x128xf32> to vector<2x128xf32>
    %63 = vector.shape_cast %60 : vector<2x128xf32> to vector<1x2x128xf32>
    tpu.vector_store %arg7[%c0_29, %c0_30, %c0_31], %63 {strides = array<i32>} : memref<1x2x128xf32, #tpu.memory_space<vmem>>, vector<1x2x128xf32>,
    %64 = arith.truncf %50 : vector<256x128xf32> to vector<256x128xbf16>
    %c0_32 = arith.constant 0 : index
    %c0_33 = arith.constant 0 : index
    %65 = vector.load %arg6[%c0_32, %c0_33] : memref<256x128xbf16, #tpu.memory_space<vmem>>, vector<256x128xbf16>
    tpu.vector_store %arg6[%c0_32, %c0_33], %64 {strides = array<i32>} : memref<256x128xbf16, #tpu.memory_space<vmem>>, vector<256x128xbf16>,
    return
  }
  func.func @transform_0(%arg0: i32) -> (i32, i32, i32, i32) {
    %c0_i32 = arith.constant 0 : i32
    %c0_i32_0 = arith.constant 0 : i32
    %c0_i32_1 = arith.constant 0 : i32
    %c0_i32_2 = arith.constant 0 : i32
    return %arg0, %c0_i32, %c0_i32_0, %c0_i32_1 : i32, i32, i32, i32
  }
  func.func @transform_1(%arg0: i32) -> (i32, i32, i32, i32) {
    %c0_i32 = arith.constant 0 : i32
    %c0_i32_0 = arith.constant 0 : i32
    %c0_i32_1 = arith.constant 0 : i32
    %c0_i32_2 = arith.constant 0 : i32
    return %arg0, %c0_i32, %c0_i32_0, %c0_i32_1 : i32, i32, i32, i32
  }
  func.func @transform_2(%arg0: i32) -> (i32, i32, i32, i32) {
    %c0_i32 = arith.constant 0 : i32
    %c0_i32_0 = arith.constant 0 : i32
    %c0_i32_1 = arith.constant 0 : i32
    %c0_i32_2 = arith.constant 0 : i32
    return %arg0, %c0_i32, %c0_i32_0, %c0_i32_1 : i32, i32, i32, i32
  }
  func.func @transform_3(%arg0: i32) -> (i32, i32, i32, i32) {
    %c0_i32 = arith.constant 0 : i32
    %c0_i32_0 = arith.constant 0 : i32
    %c0_i32_1 = arith.constant 0 : i32
    %c0_i32_2 = arith.constant 0 : i32
    return %arg0, %c0_i32, %c0_i32_0, %c0_i32_1 : i32, i32, i32, i32
  }
  func.func @transform_4(%arg0: i32) -> (i32, i32) {
    %c0_i32 = arith.constant 0 : i32
    %c0_i32_0 = arith.constant 0 : i32
    %c0_i32_1 = arith.constant 0 : i32
    return %c0_i32, %c0_i32_0 : i32, i32
  }
  func.func @transform_5(%arg0: i32) -> (i32, i32) {
    %c0_i32 = arith.constant 0 : i32
    %c0_i32_0 = arith.constant 0 : i32
    return %arg0, %c0_i32 : i32, i32
  }
  func.func @transform_6(%arg0: i32) -> (i32, i32, i32) {
    %c0_i32 = arith.constant 0 : i32
    %c0_i32_0 = arith.constant 0 : i32
    %c0_i32_1 = arith.constant 0 : i32
    return %arg0, %c0_i32, %c0_i32_0 : i32, i32, i32
  }
}

</mosaic_0001>

<bundles_post_ra>
// kernel: tpu_custom_call.1
= control target key start
LH: loop header
LB: loop body
LE: loop exit
PB: predicated region body
PF: predicated region fallthrough
CT: control target
= control target key end

     0   :  { %12 = vsyncpa [#allocation3], 0  ;;  %s6143_s0 = inlined_call_operand.vmem [shape: bf16[8,9,9,4], index: 0, kind: input, shape index: {}]   ;;  %s6144_s1 = inlined_call_operand.vmem [shape: bf16[8,9,9,4], index: 1, kind: input, shape index: {}]   ;;  %s6145_s2 = inlined_call_operand.vmem [shape: bf16[8,9,9,4], index: 2, kind: input, shape index: {}]   ;;  %s6146_s3 = inlined_call_operand.vmem [shape: bf16[8,9,9,4], index: 3, kind: input, shape index: {}]   ;;  %s6147_s4 = inlined_call_operand.vmem [shape: bf16[36,128], index: 4, kind: input, shape index: {}]   ;;  %s6148_s5 = inlined_call_operand.hbm [shape: bf16[512,128], index: 5, kind: output, shape index: {0}]   ;;  %s6149_s6 = inlined_call_operand.hbm [shape: f32[2,2,128], index: 6, kind: output, shape index: {1}]  }
   0x1   :  { %14 = vsyncpa [#allocation3 + $0x1], 0 }
   0x2   :  { %15 = vsyncpa [#allocation5], 0 }
   0x3   :  { %17 = vsyncpa [#allocation5 + $0x1], 0  ;;  %s4469_s21 = smov 0   ;;  %s4471_s22 = smov 0  }
   0x4   :  { %s4473_s23 = smov 0   ;;  %s4475_s24 = smov 0  }
   0x5 LB: > { %s4490_s25 = sadd.s32 4294967295, %s4430_s24   ;;  %s3865_s26 = sadd.s32 4294967294, %s4430_s24   ;;  %s4430_s24 = sphi %s4475_s24, %s6496_s24   ;;  %s4426_s23 = sphi %s4473_s23, %s6495_s23   ;;  %s4422_s22 = sphi %s4471_s22, %s6494_s22   ;;  %s4418_s21 = sphi %s4469_s21, %s6493_s21  }
   0x6   : > { %s4494_s27 = sadd.s32 1, %s4430_s24   ;;  %s155_s28 = sadd.s32 1, %s4426_s23 }
   0x7   : > { %s152_s29 = ssub.s32 %s4430_s24, %s4494_s27  ;;  %p165_p0 = scmp.ne.s32.totalorder %s4426_s23, %s4422_s22 }
   0x8   : > { %p153_p1 = scmp.eq.s32.totalorder %s152_s29, 0  ;;  %p166_p2 = scmp.eq.s32.totalorder %s4490_s25, 1 }
   0x9   : > { %p171_p3 = scmp.ne.s32.totalorder %s4422_s22, %s4418_s21  ;;  %p172_p4 = scmp.eq.s32.totalorder %s3865_s26, 1 }
   0xa   : > { %s4505_s30 = scalar_select %p153_p1, %s4426_s23, %s155_s28  }
   0xb   : > { %p4507_p5 = por %p166_p2, %p165_p0  ;;  %p4511_p6 = por %p172_p4, %p171_p3 }
   0xc   : > { %p3868_p7 = scmp.ge.s32.totalorder %s4430_s24, 1  ;;  %p259_p8 = scmp.lt.s32.totalorder %s4430_s24, 3 }
   0xe   : > { %p260_p9 = pnand %p3868_p7, %p259_p8 }
  0x10   : > { %263 = sbr.rel (%p260_p9) target bundleno = 839 (0x347), region = 40 }
  0x15   : > { %v547_v0 = vld [vmem:[%s6147_s4] sm:$0xf]  ;;  %s3871_s11 = sshll.u32 %s4490_s25, 2  ;;  %v548_v2 = vld [vmem:[%s6147_s4 + $0x4] sm:$0xf]  ;;  %vm685_vm0 = vcmask 1041408  }
  0x16   : > { %v633_v1 = vunpack.c.l.b16 %v547_v0  ;;  %p314_p10 = scmp.lt.s32.totalorder %s3871_s11, 7  ;;  %v1750_v3 = vunpack.c.l.b16 %v548_v2  ;;  %v4527_v6 = vld [vmem:[%s6147_s4 + $0x8] sm:$0xf]  ;;  %vm636_vm1 = vcmask 31744   ;;  %v1546_v10 = vsel %vm685_vm0, %v548_v2, 0 }
  0x17   : > { %v907_v11 = vsel %vm685_vm0, %v547_v0, 0  ;;  %v2054_v12 = vsel %vm685_vm0, %v4527_v6, 0  ;;  %v2674_v58 = vunpack.c.l.b16 %v4527_v6  ;;  %vm998_vm2 = vsmask.f32 3328 }
  0x18   : > { %v634_v4 = vpack.c.b16 %v633_v1, %v633_v1  ;;  %s6498_s11 = smov (!%p314_p10, %s3871_s11), 7  ;;  %v1751_v5 = vpack.c.b16 %v1750_v3, %v1750_v3  ;;  %vm999_vm3 = vsmask.f32 7440 }
  0x19   : > { %s4529_s16 = smul.u32 72, %s6498_s11  ;;  %vm4739_vm4 = vmor %vm998_vm2, %vm999_vm3 }
  0x1a   : > { %v635_v7 = vrot.slane %v634_v4, 2  ;;  %v1752_v8 = vrot.slane %v1751_v5, 2 }
  0x1b   : > { %s4536_s19 = scalar_lea.vmem %s6144_s1, %s4529_s16  ;;  %s4623_s28 = scalar_lea.vmem %s6143_s0, %s4529_s16 }
  0x1c   : > { %v687_v9 = vsel %vm685_vm0, %v635_v7, 0  ;;  %v424_v13 = vld [vmem:[%s4536_s19 + $0x48] sm:$0xf]  ;;  %v4544_v14 = vld [vmem:[%s4536_s19 + $0x50] sm:$0xf]  ;;  %v1802_v27 = vsel %vm685_vm0, %v1752_v8, 0  ;;  %v2675_v7 = vpack.c.b16 %v2674_v58, %v2674_v58  ;;  %s4789_s14 = scalar_lea.vmem %s6145_s2, %s4529_s16  ;;  %s4796_s18 = scalar_lea.vmem %s6146_s3, %s4529_s16 }
  0x1d   : > { %4286 = vmatpush.bf16.msra.mxu1 %v687_v9  ;;  %4287 = vmatpush.bf16.msra.mxu2 %v687_v9  ;;  %6258 = vst [vmem:[#allocation8_spill] sm:$0xff] %v4544_v14  ;;  %v433_v15 = vld [vmem:[%s4536_s19 + $0x90] sm:$0xf]  ;;  %v592_v16 = vunpack.c.l.b16 %v424_v13  ;;  %v6170_v17 = vunpack.c.l.b16 %v4544_v14  ;;  %v4549_v18 = vld [vmem:[%s4536_s19 + $0x98] sm:$0xf]  ;;  %s5691_s16 = sand.u32 1, %s4422_s22  }
  0x1e   : > { %4288 = vmatpush.bf16.msra.mxu3 %v687_v9  ;;  %696 = vmatpush.bf16.msra.mxu0 %v687_v9  ;;  %6259 = vst [vmem:[#allocation9_spill] sm:$0xff] %v4549_v18  ;;  %v600_v19 = vunpack.c.l.b16 %v433_v15  ;;  %v442_v20 = vld [vmem:[%s4536_s19 + $0xd8] sm:$0xf]  ;;  %v4553_v21 = vld [vmem:[%s4536_s19 + $0xe0] sm:$0xf]  ;;  %v6163_v22 = vunpack.c.l.b16 %v4549_v18  ;;  %s3869_s20 = sshll.u32 %s5691_s16, 7 }
  0x1f   : > { %6260 = vst [vmem:[#allocation10_spill] sm:$0xff] %v4553_v21  ;;  %v608_v23 = vunpack.c.l.b16 %v442_v20  ;;  %v6154_v24 = vunpack.c.l.b16 %v4553_v21  ;;  %v415_v25 = vld [vmem:[%s4536_s19] sm:$0xf]  ;;  %v416_v26 = vld [vmem:[%s4536_s19 + $0x8] sm:$0xf]  ;;  %v620_v28 = vpack.c.b16 %v6170_v17, %v592_v16  ;;  %v2676_v16 = vrot.slane %v2675_v7, 2 }
  0x20   : > { %v584_v29 = vunpack.c.l.b16 %v415_v25  ;;  %v585_v30 = vunpack.c.l.b16 %v416_v26  ;;  %v624_v31 = vpack.c.b16 %v6163_v22, %v600_v19  ;;  %v417_v34 = vld [vmem:[%s4536_s19 + $0x10] sm:$0xf]  ;;  %v4574_v37 = vld [vmem:[%s4536_s19 + $0x58] sm:$0xf]  ;;  %v4577_v38 = vld [vmem:[%s4536_s19 + $0x60] sm:$0xf] }
  0x21   : > { %1555 = vmatpush.bf16.msrb.mxu2 %v1546_v10  ;;  %916 = vmatpush.bf16.msrb.mxu1 %v907_v11  ;;  %v628_v32 = vpack.c.b16 %v6154_v24, %v608_v23  ;;  %v586_v35 = vunpack.c.l.b16 %v417_v34  ;;  %6261 = vst [vmem:[#allocation11_spill] sm:$0xff] %v4574_v37  ;;  %v4580_v39 = vld [vmem:[%s4536_s19 + $0xa0] sm:$0xf]  ;;  %v4583_v40 = vld [vmem:[%s4536_s19 + $0xa8] sm:$0xf]  ;;  %v6169_v44 = vunpack.c.l.b16 %v4574_v37  ;;  %v6168_v45 = vunpack.c.l.b16 %v4577_v38  ;;  %s5717_s26 = scalar_lea.vmem [#allocation2], %s3869_s20 }
  0x22   : > { %1811 = vmatpush.bf16.msrb.mxu3 %v1802_v27  ;;  %2063 = vmatpush.bf16.msrb.mxu0 %v2054_v12  ;;  %v616_v33 = vpack.c.b16 %v585_v30, %v584_v29  ;;  %6262 = vst [vmem:[#allocation12_spill] sm:$0xff] %v4577_v38  ;;  %v4586_v41 = vld [vmem:[%s4536_s19 + $0xe8] sm:$0xf]  ;;  %v4589_v42 = vld [vmem:[%s4536_s19 + $0xf0] sm:$0xf]  ;;  %v6162_v46 = vunpack.c.l.b16 %v4580_v39  ;;  %v6157_v47 = vunpack.c.l.b16 %v4583_v40  ;;  %s3717_s10 = sshll.u32 %s5717_s26, 4  ;;  %s3718_s10 = int_to_ptr.vmem [resolvable:$true] %s3717_s10 }
  0x23   : > { %3883 = vmatmul.msk.bf16.vlgmr.msra.gmra.mxu1 %vm636_vm1, %v620_v28  ;;  %3887 = vmatmul.msk.bf16.vlgmr.msra.gmra.mxu2 %vm636_vm1, %v624_v31  ;;  %v4571_v36 = vpack.c.b16 %v586_v35, %v585_v30  ;;  %6263 = vst [vmem:[#allocation13_spill] sm:$0xff] %v4580_v39  ;;  %v4592_v43 = vld [vmem:[%s4536_s19 + $0x18] sm:$0xf]  ;;  %v6153_v48 = vunpack.c.l.b16 %v4586_v41  ;;  %v6152_v49 = vunpack.c.l.b16 %v4589_v42  ;;  %v621_v51 = vpack.c.b16 %v6168_v45, %v6169_v44  ;;  %v4626_v55 = vld [vmem:[%s4536_s19 + $0x68] sm:$0xf]  ;;  %s3700_s12 = scalar_lea.sflag [#allocation3], %s5691_s16 }
  0x24   : > { %3891 = vmatmul.msk.bf16.vlgmr.msra.gmra.mxu3 %vm636_vm1, %v628_v32  ;;  %3879 = vmatmul.msk.bf16.vlgmr.msra.gmra.mxu0 %vm636_vm1, %v616_v33  ;;  %6264 = vst [vmem:[#allocation14_spill] sm:$0xff] %v4583_v40  ;;  %v6175_v50 = vunpack.c.l.b16 %v4592_v43  ;;  %v625_v52 = vpack.c.b16 %v6157_v47, %v6162_v46  ;;  %v4629_v56 = vld [vmem:[%s4536_s19 + $0x70] sm:$0xf]  ;;  %v4636_v59 = vld [vmem:[%s4536_s19 + $0xb8] sm:$0xf]  ;;  %v6167_v0 = vunpack.c.l.b16 %v4626_v55  ;;  %v2726_v32 = vsel %vm685_vm0, %v2676_v16, 0 }
  0x25   : > { %6265 = vst [vmem:[#allocation15_spill] sm:$0xff] %v4586_v41  ;;  %v629_v53 = vpack.c.b16 %v6152_v49, %v6153_v48  ;;  %v4632_v57 = vld [vmem:[%s4536_s19 + $0xb0] sm:$0xf]  ;;  %v4639_v60 = vld [vmem:[%s4536_s19 + $0xf8] sm:$0xf]  ;;  %v6166_v1 = vunpack.c.l.b16 %v4629_v56  ;;  %v6155_v4 = vunpack.c.l.b16 %v4636_v59  ;;  %2735 = vmatpush.bf16.msra.mxu1 %v2726_v32 }
  0x26   : > { %6266 = vst [vmem:[#allocation16_spill] sm:$0xff] %v4589_v42  ;;  %v617_v54 = vpack.c.b16 %v6175_v50, %v586_v35  ;;  %v4642_v61 = vld [vmem:[%s4536_s19 + $0x100] sm:$0xf]  ;;  %v4648_v63 = vld [vmem:[%s4536_s19 + $0x28] sm:$0xf]  ;;  %v6156_v3 = vunpack.c.l.b16 %v4632_v57  ;;  %v6151_v5 = vunpack.c.l.b16 %v4639_v60 }
  0x27   : > { %6267 = vst [vmem:[#allocation17_spill] sm:$0xff] %v4626_v55  ;;  %v4645_v62 = vld [vmem:[%s4536_s19 + $0x20] sm:$0xf]  ;;  %v4653_v2 = vld [vmem:[%s4623_s28 + $0x8] sm:$0xf]  ;;  %v6150_v6 = vunpack.c.l.b16 %v4642_v61  ;;  %v6173_v9 = vunpack.c.l.b16 %v4648_v63  ;;  %v622_v12 = vpack.c.b16 %v6166_v1, %v6167_v0 }
  0x28   : > { %6268 = vst [vmem:[#allocation18_spill] sm:$0xff] %v4629_v56  ;;  %v6174_v8 = vunpack.c.l.b16 %v4645_v62  ;;  %v1016_v10 = vshrl.u32 %v4653_v2, 16  ;;  %v1019_v11 = vshll.u32 %v4653_v2, 16  ;;  %v626_v13 = vpack.c.b16 %v6155_v4, %v6156_v3  ;;  %v4681_v25 = vld [vmem:[%s4536_s19 + $0x78] sm:$0xf] }
  0x29   : > { %6269 = vst [vmem:[#allocation19_spill] sm:$0xff] %v4632_v57  ;;  %v630_v15 = vpack.c.b16 %v6150_v6, %v6151_v5  ;;  %v4686_v26 = vld [vmem:[%s4623_s28] sm:$0xf]  ;;  %v346_v27 = vld [vmem:[%s4623_s28 + $0xc] sm:$0x1] }
  0x2a   : > { %6270 = vst [vmem:[#allocation20_spill] sm:$0xff] %v4636_v59  ;;  %v618_v19 = vpack.c.b16 %v6173_v9, %v6174_v8  ;;  %v1018_v20 = vrot.slane %v1016_v10, 4  ;;  %v1021_v23 = vrot.slane %v1019_v11, 5  ;;  %v550_v28 = vld [vmem:[%s6147_s4 + $0xc] sm:$0xf]  ;;  %v1025_v10 = vshll.u32 %v346_v27, 16 }
  0x2b   : > { %6271 = vst [vmem:[#allocation21_spill] sm:$0xff] %v4639_v60  ;;  %v4694_v29 = vld [vmem:[%s4536_s19 + $0x80] sm:$0xf]  ;;  %v2922_v30 = vsel %vm685_vm0, %v550_v28, 0  ;;  %v3070_v31 = vunpack.c.l.b16 %v550_v28  ;;  %v551_v33 = vld [vmem:[%s6147_s4 + $0x10] sm:$0x3] }
  0x2c   : > { %6272 = vst [vmem:[#allocation22_spill] sm:$0xff] %v4642_v61  ;;  %v4702_v34 = vld [vmem:[%s4623_s28 + $0x10] sm:$0xf]  ;;  %v4705_v35 = vld [vmem:[%s4536_s19 + $0xc0] sm:$0xf]  ;;  %2931 = vmatpush.bf16.msra.mxu2 %v2922_v30  ;;  %v6164_v30 = vunpack.c.l.b16 %v4694_v29  ;;  %v1027_v6 = vrot.slane %v1025_v10, 5 }
  0x2d   : > { %6273 = vst [vmem:[#allocation23_spill] sm:$0xff] %v4648_v63  ;;  %v4715_v58 = vld [vmem:[%s4536_s19 + $0x110] sm:$0xf]  ;;  %v3071_v11 = vpack.c.b16 %v3070_v31, %v3070_v31  ;;  %v4724_v16 = vld [vmem:[%s4536_s19 + $0x38] sm:$0xf]  ;;  %v6161_v31 = vunpack.c.l.b16 %v4705_v35 }
  0x2e   : > { %6274 = vst [vmem:[#allocation24_spill] sm:$0xff] %v4681_v25  ;;  %v4718_v7 = vld [vmem:[%s4536_s19 + $0x30] sm:$0xf]  ;;  %v4179_v59 = vld [vmem:[%s4796_s18 + $0x5c] sm:$0xf0] }
  0x2f   : > { %6275 = vst [vmem:[#allocation25_spill] sm:$0xff] %v4694_v29  ;;  %v4033_v55 = vld [vmem:[%s4796_s18 + $0x68] sm:$0xf]  ;;  %v4180_v38 = vld [vmem:[%s4796_s18 + $0x6c] sm:$0xf0] }
  0x30   : > { %6276 = vst [vmem:[#allocation26_spill] sm:$0xff] %v4705_v35  ;;  %v4163_v35 = vld [vmem:[%s4789_s14 + $0x5c] sm:$0xf0] }
  0x31   : > { %6279 = vst [vmem:[#allocation29_spill] sm:$0xff] %v4715_v58 }
  0x32   : > { %6280 = vst [vmem:[#allocation30_spill] sm:$0xff] %v4718_v7 }
  0x33   : > { %3884 = vmatmul.msk.bf16.gmra.mxu1 %vm636_vm1, %v621_v51  ;;  %3888 = vmatmul.msk.bf16.gmra.mxu2 %vm636_vm1, %v625_v52  ;;  %v4708_v51 = vld [vmem:[%s4536_s19 + $0xc8] sm:$0xf]  ;;  %v1022_v52 = vor.u32 %v1021_v23, %v1018_v20  ;;  %6281 = vst [vmem:[#allocation31_spill] sm:$0xff] %v4724_v16  ;;  %v1005_v20 = vshll.u32 %v4686_v26, 16  ;;  %v3072_v23 = vrot.slane %v3071_v11, 2  ;;  %v6158_v11 = vunpack.c.l.b16 %v4715_v58 }
  0x34   : > { %3892 = vmatmul.msk.bf16.gmra.mxu3 %vm636_vm1, %v629_v53  ;;  %3880 = vmatmul.msk.bf16.gmra.mxu0 %vm636_vm1, %v617_v54  ;;  %6277 = vst [vmem:[#allocation27_spill] sm:$0xff] %v4708_v51  ;;  %v3370_v53 = vsel %vm685_vm0, %v551_v33, 0  ;;  %v4712_v54 = vld [vmem:[%s4536_s19 + $0x108] sm:$0xf]  ;;  %v6160_v32 = vunpack.c.l.b16 %v4708_v51  ;;  %v3949_v51 = vld [vmem:[%s4789_s14 + $0x58] sm:$0xf] }
  0x35   : > { %6278 = vst [vmem:[#allocation28_spill] sm:$0xff] %v4712_v54  ;;  %3379 = vmatpush.bf16.msra.mxu0 %v3370_v53  ;;  %v1023_v33 = vrot.slane %v1022_v52, 4  ;;  %v348_v53 = vld [vmem:[%s4623_s28 + $0x14] sm:$0x1]  ;;  %v3122_v5 = vsel %vm685_vm0, %v3072_v23, 0  ;;  %v6159_v24 = vunpack.c.l.b16 %v4712_v54  ;;  %v1007_v10 = vrot.slane %v1005_v20, 5 }
  0x36   : > { %v1039_v48 = vshll.u32 %v348_v53, 16  ;;  %3131 = vmatpush.bf16.msra.mxu3 %v3122_v5  ;;  %v627_v5 = vpack.c.b16 %v6160_v32, %v6161_v31  ;;  %v3950_v39 = vor.u32 %v4163_v35, %v3949_v51 }
  0x37   : > { %v1028_v3 = vsel %vm4739_vm4, %v1023_v33, %v1027_v6  ;;  %v811_v6 = vunpack.c.l.b16 %v4653_v2  ;;  %v812_v33 = vunpack.c.l.b16 %v4702_v34 }
  0x43   : > { %3885 = vmatmul.msk.bf16.gmra.mxu1 %vm636_vm1, %v622_v12  ;;  %3889 = vmatmul.msk.bf16.gmra.mxu2 %vm636_vm1, %v626_v13  ;;  %v1030_v12 = vshrl.u32 %v4702_v34, 16  ;;  %v1033_v13 = vshll.u32 %v4702_v34, 16 }
  0x44   : > { %3893 = vmatmul.msk.bf16.gmra.mxu3 %vm636_vm1, %v630_v15  ;;  %3881 = vmatmul.msk.bf16.gmra.mxu0 %vm636_vm1, %v618_v19  ;;  %v6165_v15 = vunpack.c.l.b16 %v4681_v25  ;;  %v1002_v19 = vshrl.u32 %v4686_v26, 16 }
  0x45   : > { %v1032_v28 = vrot.slane %v1030_v12, 4  ;;  %v1035_v27 = vrot.slane %v1033_v13, 5  ;;  %v6172_v12 = vunpack.c.l.b16 %v4718_v7  ;;  %v6171_v13 = vunpack.c.l.b16 %v4724_v16 }
  0x46   : > { %v1004_v52 = vrot.slane %v1002_v19, 4  ;;  %v623_v53 = vpack.c.b16 %v6164_v30, %v6165_v15 }
  0x47   : > { %v1036_v49 = vor.u32 %v1035_v27, %v1032_v28  ;;  %v1041_v28 = vrot.slane %v1039_v48, 5  ;;  %v344_v27 = vld [vmem:[%s4623_s28 + $0x4] sm:$0x1]  ;;  %v631_v48 = vpack.c.b16 %v6158_v11, %v6159_v24  ;;  %v4771_v11 = vpack.c.b16 %v812_v33, %v811_v6  ;;  %v4174_v24 = vld [vmem:[%s4796_s18 + $0x4] sm:$0xf0] }
  0x48   : > { %v1008_v19 = vor.u32 %v1007_v10, %v1004_v52  ;;  %v1011_v20 = vshll.u32 %v344_v27, 16  ;;  %v4779_v52 = vld [vmem:[%s4623_s28 + $0x18] sm:$0xf] }
  0x49   : > { %v1037_v23 = vrot.slane %v1036_v49, 4  ;;  %v619_v49 = vpack.c.b16 %v6171_v13, %v6172_v12  ;;  %v1047_v10 = vshll.u32 %v4779_v52, 16 }
  0x4a   : > { %v1009_v34 = vrot.slane %v1008_v19, 4  ;;  %v3929_v19 = vld [vmem:[%s4789_s14] sm:$0xf] }
  0x4b   : > { %v1042_v47 = vsel %vm4739_vm4, %v1037_v23, %v1041_v28  ;;  %v4766_v23 = vunpack.c.l.b16 %v1028_v3  ;;  %v1013_v3 = vrot.slane %v1011_v20, 5  ;;  %v4158_v20 = vld [vmem:[%s4789_s14 + $0x4] sm:$0xf0] }
  0x4c   : > { %v4768_v28 = vunpack.c.l.b16 %v1042_v47  ;;  %v1044_v47 = vshrl.u32 %v4779_v52, 16  ;;  %v3930_v31 = vor.u32 %v4158_v20, %v3929_v19  ;;  %v4175_v19 = vld [vmem:[%s4796_s18 + $0x14] sm:$0xf0] }
  0x4d   : > { %v1014_v27 = vsel %vm4739_vm4, %v1009_v34, %v1013_v3  ;;  %v350_v34 = vld [vmem:[%s4623_s28 + $0x1c] sm:$0x1]  ;;  %v4009_v3 = vld [vmem:[%s4796_s18] sm:$0xf] }
  0x4e   : > { %v1053_v22 = vshll.u32 %v350_v34, 16  ;;  %v4010_v30 = vor.u32 %v4174_v24, %v4009_v3 }
  0x53   : > { %3886 = vmatmul.msk.bf16.gmra.mxu1 %vm636_vm1, %v623_v53  ;;  %3890 = vmatmul.msk.bf16.gmra.mxu2 %vm636_vm1, %v627_v5  ;;  %v810_v53 = vunpack.c.l.b16 %v4686_v26  ;;  %v1449_v5 = vunpack.c.l.b16 %v1014_v27  ;;  %v4812_v27 = vld [vmem:[%s4623_s28 + $0x28] sm:$0xf] }
  0x54   : > { %3894 = vmatmul.msk.bf16.gmra.mxu3 %vm636_vm1, %v631_v48  ;;  %3882 = vmatmul.msk.bf16.gmra.mxu0 %vm636_vm1, %v619_v49  ;;  %v1046_v48 = vrot.slane %v1044_v47, 4  ;;  %v1049_v49 = vrot.slane %v1047_v10, 5  ;;  %v1055_v10 = vrot.slane %v1053_v22, 5  ;;  %v6176_v22 = vunpack.c.l.b16 %v4779_v52 }
  0x55   : > { %v842_v32 = vpack.c.b16 %v811_v6, %v810_v53  ;;  %v1481_v26 = vpack.c.b16 %v4766_v23, %v1449_v5  ;;  %v4809_v6 = vld [vmem:[%s4623_s28 + $0x20] sm:$0xf]  ;;  %v3933_v5 = vld [vmem:[%s4789_s14 + $0x10] sm:$0xf] }
  0x56   : > { %v1050_v46 = vor.u32 %v1049_v49, %v1046_v48  ;;  %v1061_v53 = vshll.u32 %v4809_v6, 16  ;;  %v4159_v48 = vld [vmem:[%s4789_s14 + $0x14] sm:$0xf0]  ;;  %v4013_v49 = vld [vmem:[%s4796_s18 + $0x10] sm:$0xf]  ;;  %v843_v15 = vpack.c.b16 %v6176_v22, %v812_v33 }
  0x57   : > { %v4014_v0 = vor.u32 %v4175_v19, %v4013_v49 }
  0x58   : > { %v1051_v47 = vrot.slane %v1050_v46, 4  ;;  %v1075_v46 = vshll.u32 %v4812_v27, 16  ;;  %v1063_v34 = vrot.slane %v1061_v53, 5  ;;  %v4840_v53 = vld [vmem:[%s4623_s28 + $0x38] sm:$0xf] }
  0x59   : > { %6285 = vst [vmem:[#allocation33_spill] sm:$0xff] %v4840_v53  ;;  %v1103_v49 = vshll.u32 %v4840_v53, 16 }
  0x5a   : > { %v1056_v24 = vsel %vm4739_vm4, %v1051_v47, %v1055_v10  ;;  %v352_v47 = vld [vmem:[%s4623_s28 + $0x24] sm:$0x1]  ;;  %v354_v10 = vld [vmem:[%s4623_s28 + $0x2c] sm:$0x1] }
  0x5b   : > { %v1067_v44 = vshll.u32 %v352_v47, 16  ;;  %v1081_v13 = vshll.u32 %v354_v10, 16  ;;  %v356_v47 = vld [vmem:[%s4623_s28 + $0x34] sm:$0x1]  ;;  %v358_v10 = vld [vmem:[%s4623_s28 + $0x3c] sm:$0x1] }
  0x63   : > { %3895 = vmatmul.msk.bf16.vlgmr.msrb.gmra.mxu1 %vm636_vm1, %v842_v32  ;;  %3911 = vmatmul.msk.bf16.vlgmr.msrb.gmra.mxu2 %vm636_vm1, %v1481_v26  ;;  %v1058_v32 = vshrl.u32 %v4809_v6, 16  ;;  %v1077_v26 = vrot.slane %v1075_v46, 5 }
  0x64   : > { %3991 = vmatmul.msk.bf16.vlgmr.msrb.gmra.mxu3 %vm636_vm1, %v3930_v31  ;;  %4071 = vmatmul.msk.bf16.vlgmr.msrb.gmra.mxu0 %vm636_vm1, %v4010_v30  ;;  %v1072_v31 = vshrl.u32 %v4812_v27, 16  ;;  %v4821_v30 = vunpack.c.l.b16 %v1056_v24  ;;  %v3934_v24 = vor.u32 %v4159_v48, %v3933_v5  ;;  %v1083_v5 = vrot.slane %v1081_v13, 5 }
  0x65   : > { %v1060_v20 = vrot.slane %v1058_v32, 4  ;;  %v4837_v32 = vld [vmem:[%s4623_s28 + $0x30] sm:$0xf] }
  0x66   : > { %v1074_v3 = vrot.slane %v1072_v31, 4  ;;  %v1482_v1 = vpack.c.b16 %v4821_v30, %v4768_v28  ;;  %6284 = vst [vmem:[#allocation32_spill] sm:$0xff] %v4837_v32  ;;  %v1069_v31 = vrot.slane %v1067_v44, 5  ;;  %v1086_v48 = vshrl.u32 %v4837_v32, 16 }
  0x67   : > { %v1064_v45 = vor.u32 %v1063_v34, %v1060_v20  ;;  %v6178_v44 = vunpack.c.l.b16 %v4809_v6  ;;  %v1105_v34 = vrot.slane %v1103_v49, 5  ;;  %v1109_v49 = vshll.u32 %v358_v10, 16 }
  0x68   : > { %v1078_v17 = vor.u32 %v1077_v26, %v1074_v3  ;;  %v1088_v13 = vrot.slane %v1086_v48, 4 }
  0x69   : > { %v1065_v33 = vrot.slane %v1064_v45, 4  ;;  %v6177_v45 = vunpack.c.l.b16 %v4812_v27  ;;  %v1111_v22 = vrot.slane %v1109_v49, 5  ;;  %v364_v49 = vld [vmem:[%s4623_s28 + $0x54] sm:$0x1] }
  0x6a   : > { %v1079_v46 = vrot.slane %v1078_v17, 4 }
  0x6c   : > { %v1084_v17 = vsel %vm4739_vm4, %v1079_v46, %v1083_v5  ;;  %v4017_v46 = vld [vmem:[%s4796_s18 + $0x20] sm:$0xf]  ;;  %v4176_v5 = vld [vmem:[%s4796_s18 + $0x24] sm:$0xf0] }
  0x6d   : > { %v4855_v26 = vunpack.c.l.b16 %v1084_v17  ;;  %v4018_v12 = vor.u32 %v4176_v5, %v4017_v46  ;;  %v4161_v5 = vld [vmem:[%s4789_s14 + $0x34] sm:$0xf0] }
  0x6f   : > { %6286 = vst [vmem:[#allocation34_spill] sm:$0xff] %v4855_v26 }
  0x73   : > { %3896 = vmatmul.msk.bf16.gmra.mxu1 %vm636_vm1, %v843_v15  ;;  %3912 = vmatmul.msk.bf16.gmra.mxu2 %vm636_vm1, %v1482_v1  ;;  %v1089_v15 = vshll.u32 %v4837_v32, 16  ;;  %v1100_v1 = vshrl.u32 %v4840_v53, 16 }
  0x74   : > { %3992 = vmatmul.msk.bf16.gmra.mxu3 %vm636_vm1, %v3934_v24  ;;  %4072 = vmatmul.msk.bf16.gmra.mxu0 %vm636_vm1, %v4014_v0  ;;  %v1070_v0 = vsel %vm4739_vm4, %v1065_v33, %v1069_v31  ;;  %v3937_v24 = vld [vmem:[%s4789_s14 + $0x20] sm:$0xf]  ;;  %v4160_v33 = vld [vmem:[%s4789_s14 + $0x24] sm:$0xf0]  ;;  %v844_v31 = vpack.c.b16 %v6177_v45, %v6178_v44 }
  0x75   : > { %v1091_v19 = vrot.slane %v1089_v15, 5  ;;  %v1102_v20 = vrot.slane %v1100_v1, 4  ;;  %v4853_v3 = vunpack.c.l.b16 %v1070_v0  ;;  %v1095_v15 = vshll.u32 %v356_v47, 16 }
  0x76   : > { %v3938_v17 = vor.u32 %v4160_v33, %v3937_v24 }
  0x77   : > { %v1092_v48 = vor.u32 %v1091_v19, %v1088_v13  ;;  %v1106_v1 = vor.u32 %v1105_v34, %v1102_v20  ;;  %v1483_v0 = vpack.c.b16 %v4855_v26, %v4853_v3  ;;  %v1097_v8 = vrot.slane %v1095_v15, 5  ;;  %v361_v13 = vld [vmem:[%s4623_s28 + $0x48] sm:$0xf]  ;;  %v4875_v19 = vld [vmem:[%s4623_s28 + $0x50] sm:$0xf] }
  0x78   : > { %6287 = vst [vmem:[#allocation35_spill] sm:$0xff] %v4875_v19  ;;  %v1114_v47 = vshrl.u32 %v361_v13, 16  ;;  %v1117_v10 = vshll.u32 %v361_v13, 16  ;;  %v1128_v24 = vshrl.u32 %v4875_v19, 16  ;;  %v1131_v33 = vshll.u32 %v4875_v19, 16 }
  0x79   : > { %v1093_v9 = vrot.slane %v1092_v48, 4  ;;  %v1107_v50 = vrot.slane %v1106_v1, 4  ;;  %v362_v1 = vld [vmem:[%s4623_s28 + $0x4c] sm:$0x1] }
  0x7a   : > { %v1130_v48 = vrot.slane %v1128_v24, 4  ;;  %v1133_v15 = vrot.slane %v1131_v33, 5  ;;  %v1137_v24 = vshll.u32 %v364_v49, 16  ;;  %v6187_v49 = vunpack.c.l.b16 %v4875_v19 }
  0x7b   : > { %v1098_v20 = vsel %vm4739_vm4, %v1093_v9, %v1097_v8  ;;  %v1112_v34 = vsel %vm4739_vm4, %v1107_v50, %v1111_v22  ;;  %v3941_v9 = vld [vmem:[%s4789_s14 + $0x30] sm:$0xf]  ;;  %v1116_v50 = vrot.slane %v1114_v47, 4  ;;  %v1119_v22 = vrot.slane %v1117_v10, 5 }
  0x7c   : > { %v4885_v46 = vunpack.c.l.b16 %v1098_v20  ;;  %v4887_v8 = vunpack.c.l.b16 %v1112_v34  ;;  %v3942_v34 = vor.u32 %v4161_v5, %v3941_v9  ;;  %v1123_v47 = vshll.u32 %v362_v1, 16  ;;  %v4906_v9 = vld [vmem:[%s4623_s28 + $0x58] sm:$0xf]  ;;  %v4909_v5 = vld [vmem:[%s4623_s28 + $0x60] sm:$0xf] }
  0x7d   : > { %v1120_v44 = vor.u32 %v1119_v22, %v1116_v50  ;;  %v1134_v10 = vor.u32 %v1133_v15, %v1130_v48  ;;  %6290 = vst [vmem:[#allocation38_spill] sm:$0xff] %v4906_v9  ;;  %v1145_v22 = vshll.u32 %v4906_v9, 16  ;;  %v1156_v48 = vshrl.u32 %v4909_v5, 16 }
  0x7e   : > { %6288 = vst [vmem:[#allocation36_spill] sm:$0xff] %v4885_v46  ;;  %v1484_v20 = vpack.c.b16 %v4887_v8, %v4885_v46  ;;  %v1125_v58 = vrot.slane %v1123_v47, 5  ;;  %v1159_v15 = vshll.u32 %v4909_v5, 16  ;;  %v818_v1 = vunpack.c.l.b16 %v361_v13 }
  0x7f   : > { %6289 = vst [vmem:[#allocation37_spill] sm:$0xff] %v4887_v8  ;;  %v1121_v2 = vrot.slane %v1120_v44, 4  ;;  %v1142_v44 = vshrl.u32 %v4906_v9, 16  ;;  %v1158_v47 = vrot.slane %v1156_v48, 4  ;;  %v4939_v48 = vld [vmem:[%s4623_s28 + $0x68] sm:$0xf] }
  0x80   : > { %6291 = vst [vmem:[#allocation39_spill] sm:$0xff] %v4909_v5  ;;  %v846_v13 = vpack.c.b16 %v6187_v49, %v818_v1 }
  0x81   : > { %6293 = vst [vmem:[#allocation41_spill] sm:$0xff] %v4939_v48 }
  0x83   : > { %3897 = vmatmul.msk.bf16.gmra.mxu1 %vm636_vm1, %v844_v31  ;;  %3913 = vmatmul.msk.bf16.gmra.mxu2 %vm636_vm1, %v1483_v0  ;;  %v6180_v31 = vunpack.c.l.b16 %v4840_v53  ;;  %v4021_v0 = vld [vmem:[%s4796_s18 + $0x30] sm:$0xf] }
  0x84   : > { %3993 = vmatmul.msk.bf16.gmra.mxu3 %vm636_vm1, %v3938_v17  ;;  %4073 = vmatmul.msk.bf16.gmra.mxu0 %vm636_vm1, %v4018_v12  ;;  %v6181_v12 = vunpack.c.l.b16 %v4837_v32  ;;  %v4177_v17 = vld [vmem:[%s4796_s18 + $0x34] sm:$0xf0] }
  0x85   : > { %v4022_v33 = vor.u32 %v4177_v17, %v4021_v0 }
  0x86   : > { %v845_v45 = vpack.c.b16 %v6180_v31, %v6181_v12  ;;  %v1135_v31 = vrot.slane %v1134_v10, 4  ;;  %v1139_v12 = vrot.slane %v1137_v24, 5  ;;  %v1161_v10 = vrot.slane %v1159_v15, 5  ;;  %v366_v24 = vld [vmem:[%s4623_s28 + $0x5c] sm:$0x1] }
  0x87   : > { %v1151_v42 = vshll.u32 %v366_v24, 16  ;;  %v4942_v15 = vld [vmem:[%s4623_s28 + $0x70] sm:$0xf]  ;;  %v6197_v24 = vunpack.c.l.b16 %v4906_v9 }
  0x88   : > { %v1140_v50 = vsel %vm4739_vm4, %v1135_v31, %v1139_v12  ;;  %v4178_v12 = vld [vmem:[%s4796_s18 + $0x4c] sm:$0xf0]  ;;  %v1144_v31 = vrot.slane %v1142_v44, 4  ;;  %v1162_v41 = vor.u32 %v1161_v10, %v1158_v47  ;;  %6294 = vst [vmem:[#allocation42_spill] sm:$0xff] %v4942_v15  ;;  %v1184_v47 = vshrl.u32 %v4942_v15, 16 }
  0x89   : > { %v4920_v17 = vunpack.c.l.b16 %v1140_v50  ;;  %v1187_v10 = vshll.u32 %v4942_v15, 16 }
  0x8b   : > { %6292 = vst [vmem:[#allocation40_spill] sm:$0xff] %v4920_v17 }
  0x93   : > { %3898 = vmatmul.msk.bf16.gmra.mxu1 %vm636_vm1, %v845_v45  ;;  %3914 = vmatmul.msk.bf16.gmra.mxu2 %vm636_vm1, %v1484_v20  ;;  %v1126_v45 = vsel %vm4739_vm4, %v1121_v2, %v1125_v58  ;;  %v3945_v58 = vld [vmem:[%s4789_s14 + $0x48] sm:$0xf]  ;;  %v4162_v2 = vld [vmem:[%s4789_s14 + $0x4c] sm:$0xf0] }
  0x94   : > { %3994 = vmatmul.msk.bf16.gmra.mxu3 %vm636_vm1, %v3942_v34  ;;  %4074 = vmatmul.msk.bf16.gmra.mxu0 %vm636_vm1, %v4022_v33  ;;  %v1457_v0 = vunpack.c.l.b16 %v1126_v45  ;;  %v4025_v20 = vld [vmem:[%s4796_s18 + $0x48] sm:$0xf]  ;;  %v1147_v34 = vrot.slane %v1145_v22, 5  ;;  %v368_v33 = vld [vmem:[%s4623_s28 + $0x64] sm:$0x1]  ;;  %v3946_v50 = vor.u32 %v4162_v2, %v3945_v58  ;;  %v1163_v58 = vrot.slane %v1162_v41, 4 }
  0x95   : > { %v4026_v61 = vor.u32 %v4178_v12, %v4025_v20  ;;  %v1165_v44 = vshll.u32 %v368_v33, 16  ;;  %v6196_v33 = vunpack.c.l.b16 %v4909_v5 }
  0x96   : > { %v1485_v45 = vpack.c.b16 %v4920_v17, %v1457_v0  ;;  %v1148_v60 = vor.u32 %v1147_v34, %v1144_v31  ;;  %v1153_v0 = vrot.slane %v1151_v42, 5  ;;  %v1170_v31 = vshrl.u32 %v4939_v48, 16 }
  0x97   : > { %v1167_v2 = vrot.slane %v1165_v44, 5  ;;  %v1173_v34 = vshll.u32 %v4939_v48, 16  ;;  %v1189_v44 = vrot.slane %v1187_v10, 5  ;;  %v4034_v17 = vor.u32 %v4180_v38, %v4033_v55 }
  0x98   : > { %v1149_v1 = vrot.slane %v1148_v60, 4 }
  0x99   : > { %v1168_v42 = vsel %vm4739_vm4, %v1163_v58, %v1167_v2  ;;  %v847_v58 = vpack.c.b16 %v6196_v33, %v6197_v24  ;;  %v4029_v2 = vld [vmem:[%s4796_s18 + $0x58] sm:$0xf] }
  0x9a   : > { %v1154_v41 = vsel %vm4739_vm4, %v1149_v1, %v1153_v0  ;;  %v4965_v21 = vunpack.c.l.b16 %v1168_v42  ;;  %v370_v1 = vld [vmem:[%s4623_s28 + $0x6c] sm:$0x1]  ;;  %v372_v0 = vld [vmem:[%s4623_s28 + $0x74] sm:$0x1]  ;;  %v4030_v18 = vor.u32 %v4179_v59, %v4029_v2 }
  0x9b   : > { %v4963_v49 = vunpack.c.l.b16 %v1154_v41  ;;  %v1193_v41 = vshll.u32 %v372_v0, 16 }
  0x9c   : > { %6297 = vst [vmem:[#allocation45_spill] sm:$0xff] %v4965_v21 }
  0x9d   : > { %6296 = vst [vmem:[#allocation44_spill] sm:$0xff] %v4963_v49  ;;  %v1486_v40 = vpack.c.b16 %v4965_v21, %v4963_v49  ;;  %v376_v21 = vld [vmem:[%s4623_s28 + $0x84] sm:$0x1] }
  0x9e   : > { %v1221_v49 = vshll.u32 %v376_v21, 16 }
  0xa0   : > { %v4930_v54 = vpop.f32.mrf.mxu1 }
  0xa1   : > { %v4933_v22 = vpop.f32.mrf.mxu0 }
  0xa3   : > { %3899 = vmatmul.msk.bf16.gmra.mxu1 %vm636_vm1, %v846_v13  ;;  %3915 = vmatmul.msk.bf16.gmra.mxu2 %vm636_vm1, %v1485_v45  ;;  %v1172_v13 = vrot.slane %v1170_v31, 4  ;;  %v1175_v45 = vrot.slane %v1173_v34, 5 }
  0xa4   : > { %3995 = vmatmul.msk.bf16.gmra.mxu3 %vm636_vm1, %v3946_v50  ;;  %4075 = vmatmul.msk.bf16.gmra.mxu0 %vm636_vm1, %v4026_v61  ;;  %v1186_v50 = vrot.slane %v1184_v47, 4  ;;  %v1179_v47 = vshll.u32 %v370_v1, 16 }
  0xa5   : > { %v1176_v34 = vor.u32 %v1175_v45, %v1172_v13  ;;  %v1195_v13 = vrot.slane %v1193_v41, 5  ;;  %v4992_v45 = vld [vmem:[%s4623_s28 + $0x78] sm:$0xf] }
  0xa6   : > { %v4945_v20 = vpop.f32.mrf.mxu2  ;;  %v1190_v10 = vor.u32 %v1189_v44, %v1186_v50  ;;  %v1181_v29 = vrot.slane %v1179_v47, 5  ;;  %6299 = vst [vmem:[#allocation47_spill] sm:$0xff] %v4992_v45  ;;  %v4995_v50 = vld [vmem:[%s4623_s28 + $0x80] sm:$0xf]  ;;  %v4164_v47 = vld [vmem:[%s4789_s14 + $0x6c] sm:$0xf0] }
  0xa7   : > { %v4947_v12 = vpop.f32.mrf.mxu3  ;;  %v1177_v24 = vrot.slane %v1176_v34, 4  ;;  %6300 = vst [vmem:[#allocation48_spill] sm:$0xff] %v4995_v50  ;;  %v1212_v1 = vshrl.u32 %v4995_v50, 16  ;;  %v1215_v0 = vshll.u32 %v4995_v50, 16  ;;  %v3953_v34 = vld [vmem:[%s4789_s14 + $0x68] sm:$0xf] }
  0xa8   : > { %6295 = vst [vmem:[#allocation43_spill] sm:$0xff] %v4947_v12  ;;  %v4953_v60 = vpop.f32.mrf.mxu1  ;;  %v1191_v25 = vrot.slane %v1190_v10, 4 }
  0xa9   : > { %v4959_v61 = vpop.f32.mrf.mxu0  ;;  %v1182_v51 = vsel %vm4739_vm4, %v1177_v24, %v1181_v29  ;;  %v6209_v29 = vunpack.c.l.b16 %v4939_v48  ;;  %v1217_v56 = vrot.slane %v1215_v0, 5  ;;  %v382_v48 = vld [vmem:[%s4623_s28 + $0x9c] sm:$0x1] }
  0xaa   : > { %v5015_v24 = vunpack.c.l.b16 %v1182_v51  ;;  %v1249_v16 = vshll.u32 %v382_v48, 16 }
  0xac   : > { %6302 = vst [vmem:[#allocation50_spill] sm:$0xff] %v5015_v24 }
  0xae   : > { %v4977_v57 = vpop.f32.mrf.mxu2 }
  0xaf   : > { %v4979_v31 = vpop.f32.mrf.mxu3 }
  0xb0   : > { %6298 = vst [vmem:[#allocation46_spill] sm:$0xff] %v4979_v31  ;;  %v4981_v42 = vpop.f32.mrf.mxu1 }
  0xb1   : > { %v4985_v33 = vpop.f32.mrf.mxu0 }
  0xb3   : > { %3900 = vmatmul.msk.bf16.gmra.mxu1 %vm636_vm1, %v847_v58  ;;  %3916 = vmatmul.msk.bf16.gmra.mxu2 %vm636_vm1, %v1486_v40  ;;  %v1196_v40 = vsel %vm4739_vm4, %v1191_v25, %v1195_v13  ;;  %v6208_v25 = vunpack.c.l.b16 %v4942_v15  ;;  %v1214_v13 = vrot.slane %v1212_v1, 4 }
  0xb4   : > { %3996 = vmatmul.msk.bf16.gmra.mxu3 %vm636_vm1, %v3950_v39  ;;  %4076 = vmatmul.msk.bf16.gmra.mxu0 %vm636_vm1, %v4030_v18  ;;  %v1198_v18 = vshrl.u32 %v4992_v45, 16  ;;  %v1201_v39 = vshll.u32 %v4992_v45, 16  ;;  %v5017_v2 = vunpack.c.l.b16 %v1196_v40 }
  0xb5   : > { %v848_v51 = vpack.c.b16 %v6208_v25, %v6209_v29  ;;  %v1218_v12 = vor.u32 %v1217_v56, %v1214_v13  ;;  %v5047_v56 = vld [vmem:[%s4623_s28 + $0x98] sm:$0xf] }
  0xb6   : > { %v4997_v59 = vpop.f32.mrf.mxu2  ;;  %6303 = vst [vmem:[#allocation51_spill] sm:$0xff] %v5017_v2  ;;  %v1200_v10 = vrot.slane %v1198_v18, 4  ;;  %v1203_v41 = vrot.slane %v1201_v39, 5  ;;  %v1487_v40 = vpack.c.b16 %v5017_v2, %v5015_v24  ;;  %v3954_v18 = vor.u32 %v4164_v47, %v3953_v34  ;;  %v5044_v2 = vld [vmem:[%s4623_s28 + $0x90] sm:$0xf] }
  0xb7   : > { %v4999_v35 = vpop.f32.mrf.mxu3  ;;  %v1219_v34 = vrot.slane %v1218_v12, 4  ;;  %v1223_v47 = vrot.slane %v1221_v49, 5  ;;  %6305 = vst [vmem:[#allocation53_spill] sm:$0xff] %v5047_v56  ;;  %v380_v24 = vld [vmem:[%s4623_s28 + $0x94] sm:$0x1] }
  0xb8   : > { %6301 = vst [vmem:[#allocation49_spill] sm:$0xff] %v4999_v35  ;;  %v5005_v44 = vpop.f32.mrf.mxu1  ;;  %v374_v35 = vld [vmem:[%s4623_s28 + $0x7c] sm:$0x1]  ;;  %v1204_v1 = vor.u32 %v1203_v41, %v1200_v10  ;;  %v1240_v10 = vshrl.u32 %v5047_v56, 16  ;;  %v1243_v41 = vshll.u32 %v5047_v56, 16  ;;  %v1235_v19 = vshll.u32 %v380_v24, 16 }
  0xb9   : > { %v5011_v58 = vpop.f32.mrf.mxu0  ;;  %v1207_v0 = vshll.u32 %v374_v35, 16  ;;  %v1224_v49 = vsel %vm4739_vm4, %v1219_v34, %v1223_v47  ;;  %v1229_v35 = vshll.u32 %v5044_v2, 16  ;;  %v4181_v34 = vld [vmem:[%s4796_s18 + $0x7c] sm:$0xf0] }
  0xba   : > { %v1205_v25 = vrot.slane %v1204_v1, 4  ;;  %v4165_v1 = vld [vmem:[%s4789_s14 + $0x7c] sm:$0xf0]  ;;  %v1242_v15 = vrot.slane %v1240_v10, 4 }
  0xbb   : > { %v1209_v29 = vrot.slane %v1207_v0, 5  ;;  %v4037_v0 = vld [vmem:[%s4796_s18 + $0x78] sm:$0xf] }
  0xbc   : > { %v4038_v10 = vor.u32 %v4181_v34, %v4037_v0  ;;  %v1251_v0 = vrot.slane %v1249_v16, 5 }
  0xbd   : > { %v1210_v12 = vsel %vm4739_vm4, %v1205_v25, %v1209_v29  ;;  %v5069_v25 = vunpack.c.l.b16 %v1224_v49 }
  0xbe   : > { %v5025_v5 = vpop.f32.mrf.mxu2  ;;  %v5067_v29 = vunpack.c.l.b16 %v1210_v12  ;;  %v6312_v12 = vunpack.c.l.b16 %v4992_v45  ;;  %v3961_v45 = vld [vmem:[%s4789_s14 + $0x90] sm:$0xf] }
  0xbf   : > { %v5027_v31 = vpop.f32.mrf.mxu3  ;;  %6309 = vst [vmem:[#allocation57_spill] sm:$0xff] %v5069_v25 }
  0xc0   : > { %6304 = vst [vmem:[#allocation52_spill] sm:$0xff] %v5027_v31  ;;  %v5035_v39 = vpop.f32.mrf.mxu1  ;;  %v1245_v31 = vrot.slane %v1243_v41, 5 }
  0xc1   : > { %v5037_v37 = vpop.f32.mrf.mxu0  ;;  %6308 = vst [vmem:[#allocation56_spill] sm:$0xff] %v5067_v29 }
  0xc2   : > { %v1246_v8 = vor.u32 %v1245_v31, %v1242_v15 }
  0xc3   : > { %3901 = vmatmul.msk.bf16.gmra.mxu1 %vm636_vm1, %v848_v51  ;;  %3917 = vmatmul.msk.bf16.gmra.mxu2 %vm636_vm1, %v1487_v40  ;;  %v6220_v40 = vunpack.c.l.b16 %v4995_v50 }
  0xc4   : > { %3997 = vmatmul.msk.bf16.gmra.mxu3 %vm636_vm1, %v3954_v18  ;;  %4077 = vmatmul.msk.bf16.gmra.mxu0 %vm636_vm1, %v4034_v17  ;;  %v1226_v17 = vshrl.u32 %v5044_v2, 16  ;;  %v3957_v18 = vld [vmem:[%s4789_s14 + $0x78] sm:$0xf] }
  0xc5   : > { %v849_v49 = vpack.c.b16 %v6220_v40, %v6312_v12  ;;  %v5095_v12 = vld [vmem:[%s4623_s28 + $0xa0] sm:$0xf] }
  0xc6   : > { %v5049_v21 = vpop.f32.mrf.mxu2  ;;  %v1228_v47 = vrot.slane %v1226_v17, 4  ;;  %v1488_v17 = vpack.c.b16 %v5069_v25, %v5067_v29  ;;  %6313 = vst [vmem:[#allocation60_spill] sm:$0xff] %v5095_v12  ;;  %v1254_v31 = vshrl.u32 %v5095_v12, 16  ;;  %v1257_v24 = vshll.u32 %v5095_v12, 16  ;;  %v384_v29 = vld [vmem:[%s4623_s28 + $0xa4] sm:$0x1] }
  0xc7   : > { %6306 = vst [vmem:[#allocation54_spill] sm:$0xff] %v5049_v21  ;;  %v5051_v38 = vpop.f32.mrf.mxu3 }
  0xc8   : > { %6307 = vst [vmem:[#allocation55_spill] sm:$0xff] %v5051_v38  ;;  %v5053_v55 = vpop.f32.mrf.mxu1  ;;  %v1231_v38 = vrot.slane %v1229_v35, 5  ;;  %v3958_v35 = vor.u32 %v4165_v1, %v3957_v18  ;;  %v1237_v18 = vrot.slane %v1235_v19, 5  ;;  %v1247_v1 = vrot.slane %v1246_v8, 4 }
  0xc9   : > { %v5063_v13 = vpop.f32.mrf.mxu0 }
  0xca   : > { %v1232_v41 = vor.u32 %v1231_v38, %v1228_v47  ;;  %v5099_v38 = vld [vmem:[%s4623_s28 + $0xa8] sm:$0xf]  ;;  %v1252_v8 = vsel %vm4739_vm4, %v1247_v1, %v1251_v0 }
  0xcb   : > { %6314 = vst [vmem:[#allocation61_spill] sm:$0xff] %v5099_v38  ;;  %v1268_v47 = vshrl.u32 %v5099_v38, 16  ;;  %v1271_v16 = vshll.u32 %v5099_v38, 16  ;;  %v5119_v25 = vunpack.c.l.b16 %v1252_v8 }
  0xcc   : > { %v1233_v40 = vrot.slane %v1232_v41, 4  ;;  %v1259_v41 = vrot.slane %v1257_v24, 5  ;;  %v1263_v24 = vshll.u32 %v384_v29, 16 }
  0xcd   : > { %6317 = vst [vmem:[#allocation64_spill] sm:$0xff] %v5119_v25  ;;  %v1270_v50 = vrot.slane %v1268_v47, 4 }
  0xce   : > { %v5077_v14 = vpop.f32.mrf.mxu2  ;;  %v1238_v19 = vsel %vm4739_vm4, %v1233_v40, %v1237_v18  ;;  %v4166_v40 = vld [vmem:[%s4789_s14 + $0x94] sm:$0xf0]  ;;  %v386_v18 = vld [vmem:[%s4623_s28 + $0xac] sm:$0x1] }
  0xcf   : > { %6310 = vst [vmem:[#allocation58_spill] sm:$0xff] %v5077_v14  ;;  %v5079_v51 = vpop.f32.mrf.mxu3  ;;  %v4182_v14 = vld [vmem:[%s4796_s18 + $0x94] sm:$0xf0]  ;;  %v1277_v21 = vshll.u32 %v386_v18, 16 }
  0xd0   : > { %6311 = vst [vmem:[#allocation59_spill] sm:$0xff] %v5079_v51  ;;  %v5085_v9 = vpop.f32.mrf.mxu1  ;;  %v1273_v51 = vrot.slane %v1271_v16, 5  ;;  %v3962_v16 = vor.u32 %v4166_v40, %v3961_v45  ;;  %v5143_v45 = vld [vmem:[%s4623_s28 + $0xb8] sm:$0xf] }
  0xd1   : > { %v5089_v53 = vpop.f32.mrf.mxu0  ;;  %6321 = vst [vmem:[#allocation68_spill] sm:$0xff] %v5143_v45  ;;  %v1299_v40 = vshll.u32 %v5143_v45, 16 }
  0xd2   : > { %v1274_v8 = vor.u32 %v1273_v51, %v1270_v50 }
  0xd3   : > { %3902 = vmatmul.msk.bf16.gmra.mxu1 %vm636_vm1, %v849_v49  ;;  %3918 = vmatmul.msk.bf16.gmra.mxu2 %vm636_vm1, %v1488_v17  ;;  %v826_v17 = vunpack.c.l.b16 %v5044_v2 }
  0xd4   : > { %3998 = vmatmul.msk.bf16.gmra.mxu3 %vm636_vm1, %v3958_v35  ;;  %4078 = vmatmul.msk.bf16.gmra.mxu0 %vm636_vm1, %v4038_v10  ;;  %v6228_v35 = vunpack.c.l.b16 %v5047_v56  ;;  %v1256_v10 = vrot.slane %v1254_v31, 4  ;;  %v1275_v29 = vrot.slane %v1274_v8, 4  ;;  %v1301_v8 = vrot.slane %v1299_v40, 5 }
  0xd6   : > { %v5101_v15 = vpop.f32.mrf.mxu2  ;;  %v850_v2 = vpack.c.b16 %v6228_v35, %v826_v17  ;;  %v1260_v31 = vor.u32 %v1259_v41, %v1256_v10  ;;  %v1279_v17 = vrot.slane %v1277_v21, 5  ;;  %v5139_v10 = vld [vmem:[%s4623_s28 + $0xb0] sm:$0xf] }
  0xd7   : > { %6315 = vst [vmem:[#allocation62_spill] sm:$0xff] %v5101_v15  ;;  %v5103_v48 = vpop.f32.mrf.mxu3  ;;  %v4041_v15 = vld [vmem:[%s4796_s18 + $0x90] sm:$0xf]  ;;  %v1282_v51 = vshrl.u32 %v5139_v10, 16 }
  0xd8   : > { %6316 = vst [vmem:[#allocation63_spill] sm:$0xff] %v5103_v48  ;;  %v5107_v34 = vpop.f32.mrf.mxu1  ;;  %v1465_v48 = vunpack.c.l.b16 %v1238_v19  ;;  %v4042_v26 = vor.u32 %v4182_v14, %v4041_v15  ;;  %v1285_v15 = vshll.u32 %v5139_v10, 16  ;;  %v1280_v21 = vsel %vm4739_vm4, %v1275_v29, %v1279_v17  ;;  %v388_v29 = vld [vmem:[%s4623_s28 + $0xb4] sm:$0x1] }
  0xd9   : > { %v5115_v49 = vpop.f32.mrf.mxu0  ;;  %6320 = vst [vmem:[#allocation67_spill] sm:$0xff] %v5139_v10 }
  0xda   : > { %v1489_v47 = vpack.c.b16 %v5119_v25, %v1465_v48 }
  0xde   : > { %v5127_v1 = vpop.f32.mrf.mxu2 }
  0xdf   : > { %6318 = vst [vmem:[#allocation65_spill] sm:$0xff] %v5127_v1  ;;  %v5129_v0 = vpop.f32.mrf.mxu3  ;;  %v1265_v1 = vrot.slane %v1263_v24, 5  ;;  %v5158_v24 = vunpack.c.l.b16 %v1280_v21 }
  0xe0   : > { %6319 = vst [vmem:[#allocation66_spill] sm:$0xff] %v5129_v0  ;;  %v918_v19 = vpop.f32.mrf.mxu1  ;;  %v1261_v0 = vrot.slane %v1260_v31, 4 }
  0xe1   : > { %v919_v46 = vadd.f32 %v918_v19, %v4933_v22  ;;  %v2065_v7 = vpop.f32.mrf.mxu0  ;;  %6322 = vst [vmem:[#allocation69_spill] sm:$0xff] %v5158_v24  ;;  %v1284_v19 = vrot.slane %v1282_v51, 4 }
  0xe2   : > { %v1266_v14 = vsel %vm4739_vm4, %v1261_v0, %v1265_v1 }
  0xe3   : > { %3903 = vmatmul.msk.bf16.gmra.mxu1 %vm636_vm1, %v850_v2  ;;  %3919 = vmatmul.msk.bf16.gmra.mxu2 %vm636_vm1, %v1489_v47  ;;  %v5156_v31 = vunpack.c.l.b16 %v1266_v14  ;;  %v1287_v47 = vrot.slane %v1285_v15, 5  ;;  %v6324_v2 = vunpack.c.l.b16 %v5095_v12  ;;  %v6325_v14 = vunpack.c.l.b16 %v5099_v38 }
  0xe4   : > { %3999 = vmatmul.msk.bf16.gmra.mxu3 %vm636_vm1, %v3962_v16  ;;  %4079 = vmatmul.msk.bf16.gmra.mxu0 %vm636_vm1, %v4042_v26  ;;  %v1296_v26 = vshrl.u32 %v5143_v45, 16 }
  0xe5   : > { %v851_v21 = vpack.c.b16 %v6325_v14, %v6324_v2  ;;  %v1490_v51 = vpack.c.b16 %v5158_v24, %v5156_v31  ;;  %v1288_v15 = vor.u32 %v1287_v47, %v1284_v19  ;;  %v5182_v47 = vld [vmem:[%s4623_s28 + $0xc0] sm:$0xf] }
  0xe6   : > { %v1557_v50 = vpop.f32.mrf.mxu2  ;;  %v1298_v16 = vrot.slane %v1296_v26, 4  ;;  %v1291_v26 = vshll.u32 %v388_v29, 16  ;;  %6326 = vst [vmem:[#allocation71_spill] sm:$0xff] %v5182_v47 }
  0xe7   : > { %v1813_v22 = vpop.f32.mrf.mxu3  ;;  %v1637_v48 = vadd.f32 %v1557_v50, %v919_v46  ;;  %v4167_v50 = vld [vmem:[%s4789_s14 + $0xa4] sm:$0xf0]  ;;  %v1289_v2 = vrot.slane %v1288_v15, 4  ;;  %v3969_v15 = vld [vmem:[%s4789_s14 + $0xb0] sm:$0xf] }
  0xe8   : > { %v920_v41 = vpop.f32.mrf.mxu1  ;;  %v1293_v14 = vrot.slane %v1291_v26, 5 }
  0xe9   : > { %v921_v18 = vadd.f32 %v920_v41, %v4959_v61  ;;  %v1893_v1 = vadd.f32 %v1813_v22, %v1637_v48  ;;  %v2067_v0 = vpop.f32.mrf.mxu0  ;;  %v3965_v61 = vld [vmem:[%s4789_s14 + $0xa0] sm:$0xf]  ;;  %v390_v22 = vld [vmem:[%s4623_s28 + $0xbc] sm:$0x1]  ;;  %v4183_v41 = vld [vmem:[%s4796_s18 + $0xa4] sm:$0xf0] }
  0xea   : > { %v4045_v48 = vld [vmem:[%s4796_s18 + $0xa0] sm:$0xf]  ;;  %v1305_v25 = vshll.u32 %v390_v22, 16 }
  0xeb   : > { %v5161_v17 = vadd.f32 %v2065_v7, %v1893_v1  ;;  %v3966_v1 = vor.u32 %v4167_v50, %v3965_v61  ;;  %v4046_v63 = vor.u32 %v4183_v41, %v4045_v48  ;;  %v6238_v48 = vunpack.c.l.b16 %v5139_v10 }
  0xec   : > { %v6237_v41 = vunpack.c.l.b16 %v5143_v45 }
  0xed   : > { %6323 = vst [vmem:[#allocation70_spill] sm:$0xff] %v5161_v17  ;;  %v1302_v17 = vor.u32 %v1301_v8, %v1298_v16  ;;  %v1294_v8 = vsel %vm4739_vm4, %v1289_v2, %v1293_v14  ;;  %v392_v14 = vld [vmem:[%s4623_s28 + $0xc4] sm:$0x1] }
  0xee   : > { %v1559_v35 = vpop.f32.mrf.mxu2 }
  0xef   : > { %v1815_v46 = vpop.f32.mrf.mxu3  ;;  %v1638_v40 = vadd.f32 %v1559_v35, %v921_v18  ;;  %v1303_v35 = vrot.slane %v1302_v17, 4  ;;  %v1307_v18 = vrot.slane %v1305_v25, 5 }
  0xf0   : > { %v923_v7 = vpop.f32.mrf.mxu1 }
  0xf1   : > { %v924_v56 = vadd.f32 %v923_v7, %v4985_v33  ;;  %v1894_v32 = vadd.f32 %v1815_v46, %v1638_v40  ;;  %v2070_v12 = vpop.f32.mrf.mxu0  ;;  %v5185_v33 = vld [vmem:[%s4623_s28 + $0xc8] sm:$0xf]  ;;  %v1308_v17 = vsel %vm4739_vm4, %v1303_v35, %v1307_v18  ;;  %v4168_v7 = vld [vmem:[%s4789_s14 + $0xb4] sm:$0xf0]  ;;  %v4049_v35 = vld [vmem:[%s4796_s18 + $0xb0] sm:$0xf] }
  0xf2   : > { %v1327_v50 = vshll.u32 %v5185_v33, 16  ;;  %v4184_v18 = vld [vmem:[%s4796_s18 + $0xb4] sm:$0xf0] }
  0xf3   : > { %3904 = vmatmul.msk.bf16.gmra.mxu1 %vm636_vm1, %v851_v21  ;;  %3920 = vmatmul.msk.bf16.gmra.mxu2 %vm636_vm1, %v1490_v51  ;;  %v5178_v19 = vadd.f32 %v2067_v0, %v1894_v32  ;;  %v1310_v32 = vshrl.u32 %v5182_v47, 16  ;;  %v1324_v0 = vshrl.u32 %v5185_v33, 16  ;;  %v5198_v21 = vunpack.c.l.b16 %v1294_v8 }
  0xf4   : > { %4000 = vmatmul.msk.bf16.gmra.mxu3 %vm636_vm1, %v3966_v1  ;;  %4080 = vmatmul.msk.bf16.gmra.mxu0 %vm636_vm1, %v4046_v63  ;;  %v1313_v63 = vshll.u32 %v5182_v47, 16  ;;  %v5200_v51 = vunpack.c.l.b16 %v1308_v17  ;;  %v1329_v2 = vrot.slane %v1327_v50, 5  ;;  %v852_v8 = vpack.c.b16 %v6237_v41, %v6238_v48 }
  0xf5   : > { %v1326_v1 = vrot.slane %v1324_v0, 4  ;;  %v1319_v0 = vshll.u32 %v392_v14, 16 }
  0xf6   : > { %v1562_v46 = vpop.f32.mrf.mxu2  ;;  %6327 = vst [vmem:[#allocation72_spill] sm:$0xff] %v5200_v51  ;;  %v1315_v26 = vrot.slane %v1313_v63, 5 }
  0xf7   : > { %v1818_v16 = vpop.f32.mrf.mxu3  ;;  %v1639_v29 = vadd.f32 %v1562_v46, %v924_v56  ;;  %v394_v46 = vld [vmem:[%s4623_s28 + $0xcc] sm:$0x1] }
  0xf8   : > { %v925_v61 = vpop.f32.mrf.mxu1  ;;  %v1333_v24 = vshll.u32 %v394_v46, 16 }
  0xf9   : > { %v926_v25 = vadd.f32 %v925_v61, %v5011_v58  ;;  %v1895_v22 = vadd.f32 %v1818_v16, %v1639_v29  ;;  %v2072_v56 = vpop.f32.mrf.mxu0  ;;  %v1312_v58 = vrot.slane %v1310_v32, 4  ;;  %v1491_v61 = vpack.c.b16 %v5200_v51, %v5198_v21 }
  0xfa   : > { %v3970_v32 = vor.u32 %v4168_v7, %v3969_v15  ;;  %v5227_v7 = vld [vmem:[%s4623_s28 + $0xe0] sm:$0xf] }
  0xfb   : > { %v5203_v40 = vadd.f32 %v2070_v12, %v1895_v22  ;;  %v1316_v63 = vor.u32 %v1315_v26, %v1312_v58  ;;  %v4050_v22 = vor.u32 %v4184_v18, %v4049_v35  ;;  %v5224_v26 = vld [vmem:[%s4623_s28 + $0xd8] sm:$0xf]  ;;  %6329 = vst [vmem:[#allocation74_spill] sm:$0xff] %v5227_v7  ;;  %v1352_v46 = vshrl.u32 %v5227_v7, 16 }
  0xfd   : > { %6328 = vst [vmem:[#allocation73_spill] sm:$0xff] %v5203_v40  ;;  %v1330_v40 = vor.u32 %v1329_v2, %v1326_v1 }
  0xfe   : > { %v1564_v16 = vpop.f32.mrf.mxu2 }
  0xff   : > { %v1820_v29 = vpop.f32.mrf.mxu3  ;;  %v1640_v17 = vadd.f32 %v1564_v16, %v926_v25  ;;  %v1317_v25 = vrot.slane %v1316_v63, 4  ;;  %v1321_v16 = vrot.slane %v1319_v0, 5  ;;  %v1331_v58 = vrot.slane %v1330_v40, 4  ;;  %v3973_v63 = vld [vmem:[%s4789_s14 + $0xc0] sm:$0xf] }
 0x100   : > { %v928_v12 = vpop.f32.mrf.mxu1  ;;  %v4169_v0 = vld [vmem:[%s4789_s14 + $0xc4] sm:$0xf0] }
 0x101   : > { %v929_v50 = vadd.f32 %v928_v12, %v5037_v37  ;;  %v1896_v38 = vadd.f32 %v1820_v29, %v1640_v17  ;;  %v2075_v10 = vpop.f32.mrf.mxu0  ;;  %v1335_v37 = vrot.slane %v1333_v24, 5  ;;  %v1322_v18 = vsel %vm4739_vm4, %v1317_v25, %v1321_v16 }
 0x102   : > { %v1355_v29 = vshll.u32 %v5227_v7, 16  ;;  %v6243_v17 = vunpack.c.l.b16 %v5182_v47  ;;  %v6242_v12 = vunpack.c.l.b16 %v5185_v33  ;;  %v1354_v16 = vrot.slane %v1352_v46, 4 }
 0x103   : > { %3905 = vmatmul.msk.bf16.gmra.mxu1 %vm636_vm1, %v852_v8  ;;  %3921 = vmatmul.msk.bf16.gmra.mxu2 %vm636_vm1, %v1491_v61  ;;  %v5220_v15 = vadd.f32 %v2072_v56, %v1896_v38  ;;  %v1338_v38 = vshrl.u32 %v5224_v26, 16  ;;  %v1341_v56 = vshll.u32 %v5224_v26, 16  ;;  %v1336_v24 = vsel %vm4739_vm4, %v1331_v58, %v1335_v37  ;;  %v398_v37 = vld [vmem:[%s4623_s28 + $0xdc] sm:$0x1] }
 0x104   : > { %4001 = vmatmul.msk.bf16.gmra.mxu3 %vm636_vm1, %v3970_v32  ;;  %4081 = vmatmul.msk.bf16.gmra.mxu0 %vm636_vm1, %v4050_v22  ;;  %v5240_v32 = vunpack.c.l.b16 %v1322_v18  ;;  %v1357_v58 = vrot.slane %v1355_v29, 5  ;;  %v853_v18 = vpack.c.b16 %v6242_v12, %v6243_v17 }
 0x105   : > { %v1343_v22 = vrot.slane %v1341_v56, 5  ;;  %v1347_v56 = vshll.u32 %v398_v37, 16 }
 0x106   : > { %v1567_v1 = vpop.f32.mrf.mxu2 }
 0x107   : > { %v1823_v2 = vpop.f32.mrf.mxu3  ;;  %v1641_v14 = vadd.f32 %v1567_v1, %v929_v50  ;;  %v1340_v50 = vrot.slane %v1338_v38, 4  ;;  %v4053_v1 = vld [vmem:[%s4796_s18 + $0xc0] sm:$0xf] }
 0x108   : > { %v930_v35 = vpop.f32.mrf.mxu1 }
 0x109   : > { %v931_v40 = vadd.f32 %v930_v35, %v5063_v13  ;;  %v1897_v8 = vadd.f32 %v1823_v2, %v1641_v14  ;;  %v2077_v61 = vpop.f32.mrf.mxu0  ;;  %v5242_v13 = vunpack.c.l.b16 %v1336_v24  ;;  %v4185_v2 = vld [vmem:[%s4796_s18 + $0xc4] sm:$0xf0]  ;;  %v400_v14 = vld [vmem:[%s4623_s28 + $0xe4] sm:$0x1]  ;;  %v3974_v24 = vor.u32 %v4169_v0, %v3973_v63 }
 0x10a   : > { %v1344_v38 = vor.u32 %v1343_v22, %v1340_v50  ;;  %v4054_v29 = vor.u32 %v4185_v2, %v4053_v1  ;;  %v1349_v63 = vrot.slane %v1347_v56, 5  ;;  %v5269_v22 = vld [vmem:[%s4623_s28 + $0xf0] sm:$0xf] }
 0x10b   : > { %6330 = vst [vmem:[#allocation75_spill] sm:$0xff] %v5242_v13  ;;  %v5246_v25 = vadd.f32 %v2075_v10, %v1897_v8  ;;  %v1492_v10 = vpack.c.b16 %v5242_v13, %v5240_v32  ;;  %v1358_v8 = vor.u32 %v1357_v58, %v1354_v16  ;;  %v1380_v2 = vshrl.u32 %v5269_v22, 16 }
 0x10c   : > { %6332 = vst [vmem:[#allocation77_spill] sm:$0xff] %v5269_v22 }
 0x10d   : > { %6331 = vst [vmem:[#allocation76_spill] sm:$0xff] %v5246_v25  ;;  %v1361_v25 = vshll.u32 %v400_v14, 16  ;;  %v1359_v50 = vrot.slane %v1358_v8, 4  ;;  %v1383_v14 = vshll.u32 %v5269_v22, 16 }
 0x10e   : > { %v1569_v35 = vpop.f32.mrf.mxu2 }
 0x10f   : > { %v1825_v41 = vpop.f32.mrf.mxu3  ;;  %v1642_v48 = vadd.f32 %v1569_v35, %v931_v40  ;;  %v1345_v40 = vrot.slane %v1344_v38, 4 }
 0x110   : > { %v933_v51 = vpop.f32.mrf.mxu1 }
 0x111   : > { %v934_v46 = vadd.f32 %v933_v51, %v5089_v53  ;;  %v1898_v45 = vadd.f32 %v1825_v41, %v1642_v48  ;;  %v2080_v47 = vpop.f32.mrf.mxu0  ;;  %v1363_v53 = vrot.slane %v1361_v25, 5  ;;  %v5266_v51 = vld [vmem:[%s4623_s28 + $0xe8] sm:$0xf]  ;;  %v1350_v37 = vsel %vm4739_vm4, %v1345_v40, %v1349_v63 }
 0x112   : > { %v1473_v38 = vunpack.c.l.b16 %v1350_v37  ;;  %v1382_v63 = vrot.slane %v1380_v2, 4 }
 0x113   : > { %3906 = vmatmul.msk.bf16.gmra.mxu1 %vm636_vm1, %v853_v18  ;;  %3922 = vmatmul.msk.bf16.gmra.mxu2 %vm636_vm1, %v1492_v10  ;;  %v5262_v0 = vadd.f32 %v2077_v61, %v1898_v45  ;;  %v1366_v45 = vshrl.u32 %v5266_v51, 16  ;;  %v1369_v61 = vshll.u32 %v5266_v51, 16  ;;  %v1364_v25 = vsel %vm4739_vm4, %v1359_v50, %v1363_v53  ;;  %v402_v53 = vld [vmem:[%s4623_s28 + $0xec] sm:$0x1] }
 0x114   : > { %4002 = vmatmul.msk.bf16.gmra.mxu3 %vm636_vm1, %v3974_v24  ;;  %4082 = vmatmul.msk.bf16.gmra.mxu0 %vm636_vm1, %v4054_v29  ;;  %v834_v24 = vunpack.c.l.b16 %v5224_v26  ;;  %v6245_v10 = vunpack.c.l.b16 %v5227_v7  ;;  %v5282_v56 = vunpack.c.l.b16 %v1364_v25  ;;  %v1385_v50 = vrot.slane %v1383_v14, 5 }
 0x115   : > { %v1368_v29 = vrot.slane %v1366_v45, 4  ;;  %v1371_v8 = vrot.slane %v1369_v61, 5 }
 0x116   : > { %v1572_v48 = vpop.f32.mrf.mxu2  ;;  %6333 = vst [vmem:[#allocation78_spill] sm:$0xff] %v5282_v56  ;;  %v854_v26 = vpack.c.b16 %v6245_v10, %v834_v24  ;;  %v1493_v13 = vpack.c.b16 %v5282_v56, %v1473_v38  ;;  %v1386_v2 = vor.u32 %v1385_v50, %v1382_v63 }
 0x117   : > { %v1828_v41 = vpop.f32.mrf.mxu3  ;;  %v1643_v16 = vadd.f32 %v1572_v48, %v934_v46  ;;  %v4170_v46 = vld [vmem:[%s4789_s14 + $0xdc] sm:$0xf0]  ;;  %v4057_v48 = vld [vmem:[%s4796_s18 + $0xd8] sm:$0xf]  ;;  %v1372_v45 = vor.u32 %v1371_v8, %v1368_v29 }
 0x118   : > { %v935_v58 = vpop.f32.mrf.mxu1  ;;  %v1387_v38 = vrot.slane %v1386_v2, 4  ;;  %v5302_v29 = vld [vmem:[%s4623_s28 + $0xf8] sm:$0xf]  ;;  %v4171_v2 = vld [vmem:[%s4789_s14 + $0xec] sm:$0xf0] }
 0x119   : > { %v936_v1 = vadd.f32 %v935_v58, %v5115_v49  ;;  %v1899_v35 = vadd.f32 %v1828_v41, %v1643_v16  ;;  %v2082_v18 = vpop.f32.mrf.mxu0  ;;  %v3977_v49 = vld [vmem:[%s4789_s14 + $0xd8] sm:$0xf]  ;;  %v4186_v41 = vld [vmem:[%s4796_s18 + $0xdc] sm:$0xf0]  ;;  %v404_v16 = vld [vmem:[%s4623_s28 + $0xf4] sm:$0x1] }
 0x11a   : > { %v3978_v37 = vor.u32 %v4170_v46, %v3977_v49  ;;  %v4058_v61 = vor.u32 %v4186_v41, %v4057_v48  ;;  %v1389_v14 = vshll.u32 %v404_v16, 16  ;;  %v1373_v24 = vrot.slane %v1372_v45, 4 }
 0x11b   : > { %v5286_v40 = vadd.f32 %v2080_v47, %v1899_v35  ;;  %v1375_v47 = vshll.u32 %v402_v53, 16  ;;  %v1394_v48 = vshrl.u32 %v5302_v29, 16  ;;  %v1397_v41 = vshll.u32 %v5302_v29, 16 }
 0x11c   : > { %v1391_v46 = vrot.slane %v1389_v14, 5 }
 0x11d   : > { %6334 = vst [vmem:[#allocation79_spill] sm:$0xff] %v5286_v40  ;;  %v1396_v14 = vrot.slane %v1394_v48, 4 }
 0x11e   : > { %v1574_v58 = vpop.f32.mrf.mxu2  ;;  %v1392_v16 = vsel %vm4739_vm4, %v1387_v38, %v1391_v46  ;;  %v406_v46 = vld [vmem:[%s4623_s28 + $0xfc] sm:$0x1] }
 0x11f   : > { %v1830_v12 = vpop.f32.mrf.mxu3  ;;  %v1644_v25 = vadd.f32 %v1574_v58, %v936_v1  ;;  %v1377_v1 = vrot.slane %v1375_v47, 5  ;;  %v5320_v47 = vunpack.c.l.b16 %v1392_v16 }
 0x120   : > { %v938_v17 = vpop.f32.mrf.mxu1 }
 0x121   : > { %v1900_v35 = vadd.f32 %v1830_v12, %v1644_v25  ;;  %v2085_v40 = vpop.f32.mrf.mxu0  ;;  %v939_v8 = vadd.f32 %v938_v17, %v4930_v54  ;;  %v5306_v12 = vld [vmem:[%s4623_s28 + $0x100] sm:$0xf]  ;;  %6335 = vst [vmem:[#allocation80_spill] sm:$0xff] %v5320_v47 }
 0x122   : > { %v1408_v54 = vshrl.u32 %v5306_v12, 16  ;;  %v1411_v17 = vshll.u32 %v5306_v12, 16 }
 0x123   : > { %3907 = vmatmul.msk.bf16.gmra.mxu1 %vm636_vm1, %v854_v26  ;;  %3923 = vmatmul.msk.bf16.gmra.mxu2 %vm636_vm1, %v1493_v13  ;;  %v5298_v49 = vadd.f32 %v2082_v18, %v1900_v35  ;;  %v1378_v18 = vsel %vm4739_vm4, %v1373_v24, %v1377_v1  ;;  %v1399_v35 = vrot.slane %v1397_v41, 5 }
 0x124   : > { %4003 = vmatmul.msk.bf16.gmra.mxu3 %vm636_vm1, %v3978_v37  ;;  %4083 = vmatmul.msk.bf16.gmra.mxu0 %vm636_vm1, %v4058_v61  ;;  %v6248_v37 = vunpack.c.l.b16 %v5266_v51  ;;  %v5318_v45 = vunpack.c.l.b16 %v1378_v18  ;;  %v3981_v61 = vld [vmem:[%s4789_s14 + $0xe8] sm:$0xf]  ;;  %v1410_v1 = vrot.slane %v1408_v54, 4  ;;  %v1413_v38 = vrot.slane %v1411_v17, 5 }
 0x125   : > { %v6337_v18 = vunpack.c.l.b16 %v5269_v22  ;;  %v3982_v56 = vor.u32 %v4171_v2, %v3981_v61  ;;  %v1400_v54 = vor.u32 %v1399_v35, %v1396_v14  ;;  %v1403_v17 = vshll.u32 %v406_v46, 16  ;;  %v5344_v46 = vld [vmem:[%s4623_s28 + $0x108] sm:$0xf] }
 0x126   : > { %v1577_v63 = vpop.f32.mrf.mxu2  ;;  %6339 = vst [vmem:[#allocation83_spill] sm:$0xff] %v5344_v46 }
 0x127   : > { %v1833_v50 = vpop.f32.mrf.mxu3  ;;  %v1645_v13 = vadd.f32 %v1577_v63, %v939_v8  ;;  %v4061_v63 = vld [vmem:[%s4796_s18 + $0xe8] sm:$0xf]  ;;  %v855_v16 = vpack.c.b16 %v6337_v18, %v6248_v37  ;;  %v1405_v61 = vrot.slane %v1403_v17, 5  ;;  %v412_v37 = vld [vmem:[%s4623_s28 + $0x114] sm:$0x1] }
 0x128   : > { %v940_v53 = vpop.f32.mrf.mxu1 }
 0x129   : > { %v1901_v58 = vadd.f32 %v1833_v50, %v1645_v13  ;;  %v2087_v26 = vpop.f32.mrf.mxu0  ;;  %v941_v8 = vadd.f32 %v940_v53, %v4953_v60  ;;  %v4187_v50 = vld [vmem:[%s4796_s18 + $0xec] sm:$0xf0]  ;;  %v408_v13 = vld [vmem:[%s4623_s28 + $0x104] sm:$0x1]  ;;  %v1414_v53 = vor.u32 %v1413_v38, %v1410_v1 }
 0x12a   : > { %v4062_v60 = vor.u32 %v4187_v50, %v4061_v63  ;;  %v1425_v50 = vshll.u32 %v5344_v46, 16 }
 0x12b   : > { %v5324_v24 = vadd.f32 %v2085_v40, %v1901_v58  ;;  %v1494_v40 = vpack.c.b16 %v5320_v47, %v5318_v45  ;;  %v1417_v58 = vshll.u32 %v408_v13, 16  ;;  %v1415_v14 = vrot.slane %v1414_v53, 4  ;;  %v4172_v53 = vld [vmem:[%s4789_s14 + $0xfc] sm:$0xf0] }
 0x12d   : > { %6336 = vst [vmem:[#allocation81_spill] sm:$0xff] %v5324_v24  ;;  %v1419_v35 = vrot.slane %v1417_v58, 5 }
 0x12e   : > { %v1579_v10 = vpop.f32.mrf.mxu2 }
 0x12f   : > { %v1835_v25 = vpop.f32.mrf.mxu3  ;;  %v1646_v48 = vadd.f32 %v1579_v10, %v941_v8  ;;  %v1401_v10 = vrot.slane %v1400_v54, 4  ;;  %v1420_v13 = vsel %vm4739_vm4, %v1415_v14, %v1419_v35 }
 0x130   : > { %v943_v41 = vpop.f32.mrf.mxu1  ;;  %v5362_v17 = vunpack.c.l.b16 %v1420_v13  ;;  %v6344_v13 = vunpack.c.l.b16 %v5306_v12 }
 0x131   : > { %v1902_v24 = vadd.f32 %v1835_v25, %v1646_v48  ;;  %v2090_v7 = vpop.f32.mrf.mxu0  ;;  %v944_v1 = vadd.f32 %v943_v41, %v4981_v42  ;;  %v5348_v25 = vld [vmem:[%s4623_s28 + $0x110] sm:$0xf] }
 0x132   : > { %6340 = vst [vmem:[#allocation84_spill] sm:$0xff] %v5348_v25  ;;  %v1436_v42 = vshrl.u32 %v5348_v25, 16  ;;  %v1439_v18 = vshll.u32 %v5348_v25, 16 }
 0x133   : > { %3908 = vmatmul.msk.bf16.gmra.mxu1 %vm636_vm1, %v855_v16  ;;  %3924 = vmatmul.msk.bf16.gmra.mxu2 %vm636_vm1, %v1494_v40  ;;  %v5340_v2 = vadd.f32 %v2087_v26, %v1902_v24  ;;  %v1406_v26 = vsel %vm4739_vm4, %v1401_v10, %v1405_v61  ;;  %v1422_v24 = vshrl.u32 %v5344_v46, 16  ;;  %6341 = vst [vmem:[#allocation85_spill] sm:$0xff] %v5362_v17  ;;  %v1427_v10 = vrot.slane %v1425_v50, 5 }
 0x134   : > { %4004 = vmatmul.msk.bf16.gmra.mxu3 %vm636_vm1, %v3982_v56  ;;  %4084 = vmatmul.msk.bf16.gmra.mxu0 %vm636_vm1, %v4062_v60  ;;  %v5360_v54 = vunpack.c.l.b16 %v1406_v26  ;;  %v3985_v60 = vld [vmem:[%s4789_s14 + $0xf8] sm:$0xf]  ;;  %v1438_v14 = vrot.slane %v1436_v42, 4  ;;  %v1441_v35 = vrot.slane %v1439_v18, 5  ;;  %v6343_v26 = vunpack.c.l.b16 %v5302_v29 }
 0x135   : > { %6338 = vst [vmem:[#allocation82_spill] sm:$0xff] %v5340_v2  ;;  %v1424_v58 = vrot.slane %v1422_v24, 4  ;;  %v3986_v22 = vor.u32 %v4172_v53, %v3985_v60  ;;  %v451_v53 = vld [vmem:[%s4789_s14] sm:$0xf] }
 0x136   : > { %v1582_v38 = vpop.f32.mrf.mxu2  ;;  %v856_v47 = vpack.c.b16 %v6344_v13, %v6343_v26  ;;  %v1495_v50 = vpack.c.b16 %v5362_v17, %v5360_v54 }
 0x137   : > { %v1838_v8 = vpop.f32.mrf.mxu3  ;;  %v1647_v63 = vadd.f32 %v1582_v38, %v944_v1  ;;  %v410_v1 = vld [vmem:[%s4623_s28 + $0x10c] sm:$0x1]  ;;  %v1428_v42 = vor.u32 %v1427_v10, %v1424_v58 }
 0x138   : > { %v945_v56 = vpop.f32.mrf.mxu1  ;;  %v1431_v18 = vshll.u32 %v410_v1, 16  ;;  %v453_v1 = vld [vmem:[%s4789_s14 + $0x8] sm:$0xf] }
 0x139   : > { %v1903_v16 = vadd.f32 %v1838_v8, %v1647_v63  ;;  %v2092_v48 = vpop.f32.mrf.mxu0  ;;  %v946_v38 = vadd.f32 %v945_v56, %v5005_v44  ;;  %v4065_v8 = vld [vmem:[%s4796_s18 + $0xf8] sm:$0xf]  ;;  %v4188_v63 = vld [vmem:[%s4796_s18 + $0xfc] sm:$0xf0]  ;;  %v1442_v56 = vor.u32 %v1441_v35, %v1438_v14  ;;  %v1429_v60 = vrot.slane %v1428_v42, 4 }
 0x13a   : > { %v4066_v44 = vor.u32 %v4188_v63, %v4065_v8  ;;  %v2181_v35 = vshll.u32 %v451_v53, 16  ;;  %v2195_v63 = vshll.u32 %v453_v1, 16  ;;  %v3989_v42 = vld [vmem:[%s4789_s14 + $0x108] sm:$0xf] }
 0x13b   : > { %v5366_v61 = vadd.f32 %v2090_v7, %v1903_v16  ;;  %v1445_v16 = vshll.u32 %v412_v37, 16  ;;  %v1443_v58 = vrot.slane %v1442_v56, 4 }
 0x13d   : > { %6342 = vst [vmem:[#allocation86_spill] sm:$0xff] %v5366_v61  ;;  %v1447_v10 = vrot.slane %v1445_v16, 5  ;;  %v4173_v16 = vld [vmem:[%s4789_s14 + $0x10c] sm:$0xf0] }
 0x13e   : > { %v1584_v41 = vpop.f32.mrf.mxu2 }
 0x13f   : > { %v1840_v40 = vpop.f32.mrf.mxu3  ;;  %v1648_v24 = vadd.f32 %v1584_v41, %v946_v38  ;;  %v1433_v41 = vrot.slane %v1431_v18, 5  ;;  %v1448_v26 = vsel %vm4739_vm4, %v1443_v58, %v1447_v10  ;;  %v454_v10 = vld [vmem:[%s4789_s14 + $0xc] sm:$0x1] }
 0x140   : > { %v948_v7 = vpop.f32.mrf.mxu1  ;;  %v5397_v56 = vunpack.c.l.b16 %v1448_v26 }
 0x141   : > { %v1904_v61 = vadd.f32 %v1840_v40, %v1648_v24  ;;  %v2095_v2 = vpop.f32.mrf.mxu0  ;;  %v949_v37 = vadd.f32 %v948_v7, %v5035_v39  ;;  %v6255_v24 = vunpack.c.l.b16 %v5344_v46  ;;  %v6254_v7 = vunpack.c.l.b16 %v5348_v25 }
 0x143   : > { %3909 = vmatmul.msk.bf16.gmra.mxu1 %vm636_vm1, %v856_v47  ;;  %3925 = vmatmul.msk.bf16.gmra.mxu2 %vm636_vm1, %v1495_v50  ;;  %v5383_v38 = vadd.f32 %v2092_v48, %v1904_v61  ;;  %v2178_v47 = vshrl.u32 %v451_v53, 16  ;;  %v1434_v48 = vsel %vm4739_vm4, %v1429_v60, %v1433_v41  ;;  %v2192_v61 = vshrl.u32 %v453_v1, 16  ;;  %v452_v60 = vld [vmem:[%s4789_s14 + $0x4] sm:$0x1] }
 0x144   : > { %4005 = vmatmul.msk.bf16.gmra.mxu3 %vm636_vm1, %v3986_v22  ;;  %4085 = vmatmul.msk.bf16.gmra.mxu0 %vm636_vm1, %v4066_v44  ;;  %v5394_v50 = vunpack.c.l.b16 %v1434_v48  ;;  %v2183_v44 = vrot.slane %v2181_v35, 5  ;;  %v2197_v53 = vrot.slane %v2195_v63, 5  ;;  %v3990_v35 = vor.u32 %v4173_v16, %v3989_v42 }
 0x145   : > { %v2180_v18 = vrot.slane %v2178_v47, 4  ;;  %v2194_v41 = vrot.slane %v2192_v61, 4  ;;  %v857_v47 = vpack.c.b16 %v6254_v7, %v6255_v24  ;;  %v2187_v26 = vshll.u32 %v452_v60, 16  ;;  %v457_v60 = vld [vmem:[%s4789_s14 + $0x18] sm:$0xf]  ;;  %v6401_v24 = vld [vmem:[#allocation24_spill] sm:$0xff] }
 0x146   : > { %v1587_v40 = vpop.f32.mrf.mxu2  ;;  %v378_v7 = vld [vmem:[%s4623_s28 + $0x8c] sm:$0x1] }
 0x147   : > { %v1843_v14 = vpop.f32.mrf.mxu3  ;;  %v1649_v8 = vadd.f32 %v1587_v40, %v949_v37  ;;  %v4069_v37 = vld [vmem:[%s4796_s18 + $0x108] sm:$0xf]  ;;  %v4189_v40 = vld [vmem:[%s4796_s18 + $0x10c] sm:$0xf0]  ;;  %v2184_v48 = vor.u32 %v2183_v44, %v2180_v18  ;;  %v2189_v25 = vrot.slane %v2187_v26, 5  ;;  %s4356_s18 = scalar_lea.hbm %s6148_s5, 256 }
 0x148   : > { %v950_v22 = vpop.f32.mrf.mxu1  ;;  %v455_v44 = vld [vmem:[%s4789_s14 + $0x10] sm:$0xf] }
 0x149   : > { %v1905_v13 = vadd.f32 %v1843_v14, %v1649_v8  ;;  %v2097_v39 = vpop.f32.mrf.mxu0  ;;  %v951_v1 = vadd.f32 %v950_v22, %v5053_v55  ;;  %v2198_v55 = vor.u32 %v2197_v53, %v2194_v41  ;;  %v2201_v22 = vshll.u32 %v454_v10, 16 }
 0x14a   : > { %v2185_v46 = vrot.slane %v2184_v48, 4 }
 0x14b   : > { %v5401_v58 = vadd.f32 %v2095_v2, %v1905_v13  ;;  %v1496_v2 = vpack.c.b16 %v5397_v56, %v5394_v50  ;;  %v4070_v13 = vor.u32 %v4189_v40, %v4069_v37  ;;  %v2199_v42 = vrot.slane %v2198_v55, 4 }
 0x14c   : > { %v2203_v18 = vrot.slane %v2201_v22, 5  ;;  %v2206_v37 = vshrl.u32 %v455_v44, 16  ;;  %v2209_v40 = vshll.u32 %v455_v44, 16 }
 0x14d   : > { %6345 = vst [vmem:[#allocation87_spill] sm:$0xff] %v5401_v58 }
 0x14e   : > { %v1589_v14 = vpop.f32.mrf.mxu2 }
 0x14f   : > { %v1845_v8 = vpop.f32.mrf.mxu3  ;;  %v1650_v61 = vadd.f32 %v1589_v14, %v951_v1  ;;  %v2190_v1 = vsel %vm4739_vm4, %v2185_v46, %v2189_v25  ;;  %v458_v25 = vld [vmem:[%s4789_s14 + $0x1c] sm:$0x1] }
 0x150   : > { %v953_v63 = vpop.f32.mrf.mxu1  ;;  %v2625_v26 = vunpack.c.l.b16 %v2190_v1 }
 0x151   : > { %v1906_v58 = vadd.f32 %v1845_v8, %v1650_v61  ;;  %v2100_v17 = vpop.f32.mrf.mxu0  ;;  %v954_v41 = vadd.f32 %v953_v63, %v5085_v9  ;;  %v2208_v61 = vrot.slane %v2206_v37, 4  ;;  %v2211_v63 = vrot.slane %v2209_v40, 5 }
 0x152   : > { %v2229_v37 = vshll.u32 %v458_v25, 16 }
 0x153   : > { %3910 = vmatmul.msk.bf16.gmra.mxu1 %vm636_vm1, %v857_v47  ;;  %3926 = vmatmul.msk.bf16.gmra.mxu2 %vm636_vm1, %v1496_v2  ;;  %v5417_v16 = vadd.f32 %v2097_v39, %v1906_v58  ;;  %v2204_v39 = vsel %vm4739_vm4, %v2199_v42, %v2203_v18  ;;  %v2220_v58 = vshrl.u32 %v457_v60, 16  ;;  %v2223_v47 = vshll.u32 %v457_v60, 16  ;;  %v456_v2 = vld [vmem:[%s4789_s14 + $0x14] sm:$0x1] }
 0x154   : > { %4006 = vmatmul.msk.bf16.gmra.mxu3 %vm636_vm1, %v3990_v35  ;;  %4086 = vmatmul.msk.bf16.gmra.mxu0 %vm636_vm1, %v4070_v13  ;;  %v2626_v9 = vunpack.c.l.b16 %v2204_v39  ;;  %v2212_v42 = vor.u32 %v2211_v63, %v2208_v61  ;;  %v2215_v18 = vshll.u32 %v456_v2, 16 }
 0x155   : > { %v2222_v55 = vrot.slane %v2220_v58, 4  ;;  %v2225_v22 = vrot.slane %v2223_v47, 5  ;;  %v459_v58 = vld [vmem:[%s4789_s14 + $0x20] sm:$0xf] }
 0x156   : > { %v1592_v53 = vpop.f32.mrf.mxu2  ;;  %v2217_v39 = vrot.slane %v2215_v18, 5  ;;  %v2237_v2 = vshll.u32 %v459_v58, 16 }
 0x157   : > { %v1848_v10 = vpop.f32.mrf.mxu3  ;;  %v1651_v14 = vadd.f32 %v1592_v53, %v954_v41  ;;  %v2657_v53 = vpack.c.b16 %v2626_v9, %v2625_v26  ;;  %v2226_v1 = vor.u32 %v2225_v22, %v2222_v55  ;;  %v461_v26 = vld [vmem:[%s4789_s14 + $0x28] sm:$0xf] }
 0x158   : > { %v955_v8 = vpop.f32.mrf.mxu1 }
 0x159   : > { %v1907_v35 = vadd.f32 %v1848_v10, %v1651_v14  ;;  %v2102_v48 = vpop.f32.mrf.mxu0  ;;  %v956_v13 = vadd.f32 %v955_v8, %v5107_v34  ;;  %v2227_v34 = vrot.slane %v2226_v1, 4  ;;  %v2231_v8 = vrot.slane %v2229_v37, 5  ;;  %v462_v1 = vld [vmem:[%s4789_s14 + $0x2c] sm:$0x1] }
 0x15b   : > { %v5427_v46 = vadd.f32 %v2100_v17, %v1907_v35  ;;  %v2213_v17 = vrot.slane %v2212_v42, 4  ;;  %v6346_v35 = vpack.c.b16 %v4768_v28, %v4766_v23  ;;  %v2232_v22 = vsel %vm4739_vm4, %v2227_v34, %v2231_v8  ;;  %v460_v42 = vld [vmem:[%s4789_s14 + $0x24] sm:$0x1] }
 0x15c   : > { %v2248_v23 = vshrl.u32 %v461_v26, 16  ;;  %v2251_v28 = vshll.u32 %v461_v26, 16  ;;  %v6347_v34 = vunpack.c.l.b16 %v4779_v52  ;;  %v6348_v8 = vunpack.c.l.b16 %v4809_v6 }
 0x15d   : > { %v2243_v26 = vshll.u32 %v460_v42, 16 }
 0x15e   : > { %v1594_v44 = vpop.f32.mrf.mxu2  ;;  %v2250_v18 = vrot.slane %v2248_v23, 4 }
 0x15f   : > { %v1850_v41 = vpop.f32.mrf.mxu3  ;;  %v1652_v60 = vadd.f32 %v1594_v44, %v956_v13 }
 0x160   : > { %v958_v10 = vpop.f32.mrf.mxu1 }
 0x161   : > { %v1908_v40 = vadd.f32 %v1850_v41, %v1652_v60  ;;  %v2105_v14 = vpop.f32.mrf.mxu0  ;;  %v959_v9 = vadd.f32 %v958_v10, %v4945_v20  ;;  %v2628_v20 = vunpack.c.l.b16 %v2232_v22  ;;  %v2253_v60 = vrot.slane %v2251_v28, 5  ;;  %v463_v22 = vld [vmem:[%s4789_s14 + $0x30] sm:$0xf]  ;;  %v465_v28 = vld [vmem:[%s4789_s14 + $0x38] sm:$0xf] }
 0x163   : > { %4087 = vmatmul.msk.bf16.vlgmr.msra.gmra.mxu1 %vm636_vm1, %v2657_v53  ;;  %4103 = vmatmul.msk.bf16.vlgmr.msra.gmra.mxu2 %vm636_vm1, %v4771_v11  ;;  %v5437_v47 = vadd.f32 %v2102_v48, %v1908_v40  ;;  %v2218_v11 = vsel %vm4739_vm4, %v2213_v17, %v2217_v39  ;;  %v2239_v53 = vrot.slane %v2237_v2, 5  ;;  %v3306_v2 = vpack.c.b16 %v4853_v3, %v4821_v30 }
 0x164   : > { %4119 = vmatmul.msk.bf16.vlgmr.msra.gmra.mxu3 %vm636_vm1, %v4571_v36  ;;  %4135 = vmatmul.msk.bf16.vlgmr.msra.gmra.mxu0 %vm636_vm1, %v6346_v35  ;;  %v2234_v36 = vshrl.u32 %v459_v58, 16  ;;  %v2627_v44 = vunpack.c.l.b16 %v2218_v11  ;;  %v2858_v58 = vpack.c.b16 %v6348_v8, %v6347_v34 }
 0x166   : > { %v1597_v61 = vpop.f32.mrf.mxu2  ;;  %v2236_v41 = vrot.slane %v2234_v36, 4  ;;  %v2658_v39 = vpack.c.b16 %v2628_v20, %v2627_v44  ;;  %v2257_v36 = vshll.u32 %v462_v1, 16  ;;  %v2262_v20 = vshrl.u32 %v463_v22, 16 }
 0x167   : > { %v1853_v63 = vpop.f32.mrf.mxu3  ;;  %v1653_v55 = vadd.f32 %v1597_v61, %v959_v9  ;;  %v2279_v1 = vshll.u32 %v465_v28, 16 }
 0x168   : > { %v960_v48 = vpop.f32.mrf.mxu1  ;;  %v2240_v35 = vor.u32 %v2239_v53, %v2236_v41  ;;  %v2265_v41 = vshll.u32 %v463_v22, 16  ;;  %v5476_v53 = vld [vmem:[%s4623_s28 + $0x40] sm:$0xf]  ;;  %v2264_v8 = vrot.slane %v2262_v20, 4  ;;  %v6356_v20 = vld [vmem:[#allocation30_spill] sm:$0xff] }
 0x169   : > { %v1909_v25 = vadd.f32 %v1853_v63, %v1653_v55  ;;  %v2107_v13 = vpop.f32.mrf.mxu0  ;;  %v961_v37 = vadd.f32 %v960_v48, %v4977_v57  ;;  %v6349_v63 = vunpack.c.l.b16 %v4592_v43  ;;  %v2254_v57 = vor.u32 %v2253_v60, %v2250_v18 }
 0x16a   : > { %v2241_v6 = vrot.slane %v2240_v35, 4  ;;  %v2245_v48 = vrot.slane %v2243_v26, 5  ;;  %v2276_v60 = vshrl.u32 %v465_v28, 16  ;;  %v464_v35 = vld [vmem:[%s4789_s14 + $0x34] sm:$0x1] }
 0x16b   : > { %v5450_v10 = vadd.f32 %v2105_v14, %v1909_v25  ;;  %v6350_v14 = vunpack.c.l.b16 %v4645_v62  ;;  %v2255_v43 = vrot.slane %v2254_v57, 4  ;;  %v2259_v62 = vrot.slane %v2257_v36, 5 }
 0x16c   : > { %v2246_v44 = vsel %vm4739_vm4, %v2241_v6, %v2245_v48  ;;  %v2278_v26 = vrot.slane %v2276_v60, 4  ;;  %v6351_v6 = vunpack.c.l.b16 %v4812_v27  ;;  %v6352_v48 = vld [vmem:[#allocation32_spill] sm:$0xff]  ;;  %v2271_v28 = vshll.u32 %v464_v35, 16 }
 0x16d   : > { %v3054_v11 = vpack.c.b16 %v6350_v14, %v6349_v63  ;;  %v466_v63 = vld [vmem:[%s4789_s14 + $0x3c] sm:$0x1]  ;;  %v6359_v60 = vld [vmem:[#allocation36_spill] sm:$0xff] }
 0x16e   : > { %v1599_v40 = vpop.f32.mrf.mxu2  ;;  %v467_v35 = vld [vmem:[%s4789_s14 + $0x48] sm:$0xf] }
 0x16f   : > { %v1855_v17 = vpop.f32.mrf.mxu3  ;;  %v1654_v9 = vadd.f32 %v1599_v40, %v961_v37  ;;  %v3246_v40 = vshrl.u32 %v5476_v53, 16 }
 0x170   : > { %v963_v61 = vpop.f32.mrf.mxu1 }
 0x171   : > { %v1910_v52 = vadd.f32 %v1855_v17, %v1654_v9  ;;  %v2110_v55 = vpop.f32.mrf.mxu0  ;;  %v964_v30 = vadd.f32 %v963_v61, %v4997_v59  ;;  %v3249_v17 = vshll.u32 %v5476_v53, 16  ;;  %v2281_v9 = vrot.slane %v2279_v1, 5 }
 0x173   : > { %4088 = vmatmul.msk.bf16.gmra.mxu1 %vm636_vm1, %v2658_v39  ;;  %4104 = vmatmul.msk.bf16.gmra.mxu2 %vm636_vm1, %v2858_v58  ;;  %v5468_v23 = vadd.f32 %v2107_v13, %v1910_v52  ;;  %v2260_v13 = vsel %vm4739_vm4, %v2255_v43, %v2259_v62  ;;  %v2629_v39 = vunpack.c.l.b16 %v2246_v44  ;;  %v2267_v58 = vrot.slane %v2265_v41, 5 }
 0x174   : > { %4120 = vmatmul.msk.bf16.gmra.mxu3 %vm636_vm1, %v3054_v11  ;;  %4136 = vmatmul.msk.bf16.gmra.mxu0 %vm636_vm1, %v3306_v2  ;;  %v2630_v34 = vunpack.c.l.b16 %v2260_v13  ;;  %v3248_v11 = vrot.slane %v3246_v40, 4  ;;  %v3251_v57 = vrot.slane %v3249_v17, 5  ;;  %v6353_v43 = vunpack.c.l.b16 %v6352_v48  ;;  %v6358_v13 = vld [vmem:[#allocation34_spill] sm:$0xff] }
 0x175   : > { %v2268_v22 = vor.u32 %v2267_v58, %v2264_v8  ;;  %v6357_v41 = vunpack.c.l.b16 %v6356_v20  ;;  %v3307_v27 = vpack.c.b16 %v6359_v60, %v6358_v13  ;;  %v2293_v48 = vshll.u32 %v467_v35, 16  ;;  %v468_v13 = vld [vmem:[%s4789_s14 + $0x4c] sm:$0x1] }
 0x176   : > { %v1602_v3 = vpop.f32.mrf.mxu2  ;;  %v2659_v52 = vpack.c.b16 %v2630_v34, %v2629_v39  ;;  %v2859_v62 = vpack.c.b16 %v6353_v43, %v6351_v6  ;;  %v3252_v40 = vor.u32 %v3251_v57, %v3248_v11  ;;  %v2273_v34 = vrot.slane %v2271_v28, 5 }
 0x177   : > { %v1858_v25 = vpop.f32.mrf.mxu3  ;;  %v1655_v42 = vadd.f32 %v1602_v3, %v964_v30  ;;  %v360_v30 = vld [vmem:[%s4623_s28 + $0x44] sm:$0x1]  ;;  %v2269_v39 = vrot.slane %v2268_v22, 4  ;;  %v2290_v6 = vshrl.u32 %v467_v35, 16 }
 0x178   : > { %v965_v18 = vpop.f32.mrf.mxu1  ;;  %v3255_v17 = vshll.u32 %v360_v30, 16  ;;  %v3253_v11 = vrot.slane %v3252_v40, 4  ;;  %v423_v30 = vld [vmem:[%s4536_s19 + $0x40] sm:$0xf] }
 0x179   : > { %v1911_v37 = vadd.f32 %v1858_v25, %v1655_v42  ;;  %v2112_v59 = vpop.f32.mrf.mxu0  ;;  %v966_v14 = vadd.f32 %v965_v18, %v5025_v5  ;;  %v2282_v42 = vor.u32 %v2281_v9, %v2278_v26  ;;  %v2285_v18 = vshll.u32 %v466_v63, 16  ;;  %v469_v9 = vld [vmem:[%s4789_s14 + $0x50] sm:$0xf]  ;;  %v6360_v63 = vld [vmem:[#allocation54_spill] sm:$0xff] }
 0x17a   : > { %v3257_v57 = vrot.slane %v3255_v17, 5  ;;  %v2304_v22 = vshrl.u32 %v469_v9, 16  ;;  %v2307_v28 = vshll.u32 %v469_v9, 16  ;;  %v470_v17 = vld [vmem:[%s4789_s14 + $0x54] sm:$0x1]  ;;  %v6362_v9 = vld [vmem:[#allocation33_spill] sm:$0xff] }
 0x17b   : > { %v5483_v61 = vadd.f32 %v2110_v55, %v1911_v37  ;;  %v6354_v55 = vld [vmem:[#allocation23_spill] sm:$0xff]  ;;  %v2283_v8 = vrot.slane %v2282_v42, 4  ;;  %v2287_v58 = vrot.slane %v2285_v18, 5  ;;  %v2295_v42 = vrot.slane %v2293_v48, 5 }
 0x17c   : > { %v6355_v44 = vunpack.c.l.b16 %v6354_v55  ;;  %v3049_v18 = vunpack.c.l.b16 %v423_v30  ;;  %v2306_v60 = vrot.slane %v2304_v22, 4  ;;  %v2313_v48 = vshll.u32 %v470_v17, 16 }
 0x17e   : > { %v1604_v36 = vpop.f32.mrf.mxu2  ;;  %v3055_v5 = vpack.c.b16 %v6357_v41, %v6355_v44  ;;  %v3258_v44 = vsel %vm4739_vm4, %v3253_v11, %v3257_v57  ;;  %v2853_v41 = vunpack.c.l.b16 %v5476_v53  ;;  %v2299_v53 = vshll.u32 %v468_v13, 16 }
 0x17f   : > { %v1860_v2 = vpop.f32.mrf.mxu3  ;;  %v1656_v3 = vadd.f32 %v1604_v36, %v966_v14  ;;  %v3301_v40 = vunpack.c.l.b16 %v3258_v44  ;;  %v471_v44 = vld [vmem:[%s4789_s14 + $0x58] sm:$0xf] }
 0x180   : > { %v968_v25 = vpop.f32.mrf.mxu1  ;;  %v2301_v30 = vrot.slane %v2299_v53, 5  ;;  %v472_v53 = vld [vmem:[%s4789_s14 + $0x5c] sm:$0x1] }
 0x181   : > { %v1912_v1 = vadd.f32 %v1860_v2, %v1656_v3  ;;  %v2115_v37 = vpop.f32.mrf.mxu0  ;;  %v969_v14 = vadd.f32 %v968_v25, %v6360_v63  ;;  %v6363_v63 = vunpack.c.l.b16 %v6362_v9 }
 0x183   : > { %4089 = vmatmul.msk.bf16.gmra.mxu1 %vm636_vm1, %v2659_v52  ;;  %4105 = vmatmul.msk.bf16.gmra.mxu2 %vm636_vm1, %v2859_v62  ;;  %v5502_v26 = vadd.f32 %v2112_v59, %v1912_v1  ;;  %v2274_v52 = vsel %vm4739_vm4, %v2269_v39, %v2273_v34  ;;  %v2288_v59 = vsel %vm4739_vm4, %v2283_v8, %v2287_v58  ;;  %v6361_v39 = vld [vmem:[#allocation58_spill] sm:$0xff] }
 0x184   : > { %4121 = vmatmul.msk.bf16.gmra.mxu3 %vm636_vm1, %v3055_v5  ;;  %4137 = vmatmul.msk.bf16.gmra.mxu0 %vm636_vm1, %v3307_v27  ;;  %v2631_v55 = vunpack.c.l.b16 %v2274_v52  ;;  %v2632_v20 = vunpack.c.l.b16 %v2288_v59  ;;  %v2292_v5 = vrot.slane %v2290_v6, 4  ;;  %v2309_v27 = vrot.slane %v2307_v28, 5 }
 0x186   : > { %v1607_v36 = vpop.f32.mrf.mxu2  ;;  %v2660_v35 = vpack.c.b16 %v2632_v20, %v2631_v55  ;;  %v2296_v11 = vor.u32 %v2295_v42, %v2292_v5  ;;  %v2315_v55 = vrot.slane %v2313_v48, 5  ;;  %v6367_v5 = vld [vmem:[#allocation62_spill] sm:$0xff] }
 0x187   : > { %v1863_v2 = vpop.f32.mrf.mxu3  ;;  %v1657_v43 = vadd.f32 %v1607_v36, %v969_v14  ;;  %v2860_v14 = vpack.c.b16 %v2853_v41, %v6363_v63  ;;  %v473_v41 = vld [vmem:[%s4789_s14 + $0x60] sm:$0xf] }
 0x188   : > { %v970_v62 = vpop.f32.mrf.mxu1  ;;  %v2297_v28 = vrot.slane %v2296_v11, 4 }
 0x189   : > { %v1913_v3 = vadd.f32 %v1863_v2, %v1657_v43  ;;  %v2117_v25 = vpop.f32.mrf.mxu0  ;;  %v971_v34 = vadd.f32 %v970_v62, %v6361_v39  ;;  %v6364_v2 = vld [vmem:[#allocation31_spill] sm:$0xff]  ;;  %v6366_v43 = vld [vmem:[#allocation37_spill] sm:$0xff] }
 0x18a   : > { %v6365_v52 = vunpack.c.l.b16 %v6364_v2  ;;  %v3308_v59 = vpack.c.b16 %v3301_v40, %v6366_v43  ;;  %v2321_v40 = vshll.u32 %v471_v44, 16 }
 0x18b   : > { %v5516_v1 = vadd.f32 %v2115_v37, %v1913_v3  ;;  %v2310_v37 = vor.u32 %v2309_v27, %v2306_v60  ;;  %v2302_v60 = vsel %vm4739_vm4, %v2297_v28, %v2301_v30  ;;  %v2318_v27 = vshrl.u32 %v471_v44, 16  ;;  %v6371_v30 = vld [vmem:[#allocation38_spill] sm:$0xff] }
 0x18c   : > { %v3056_v6 = vpack.c.b16 %v3049_v18, %v6365_v52  ;;  %v2633_v9 = vunpack.c.l.b16 %v2302_v60  ;;  %v2323_v11 = vrot.slane %v2321_v40, 5  ;;  %v474_v52 = vld [vmem:[%s4789_s14 + $0x64] sm:$0x1] }
 0x18d   : > { %v2311_v3 = vrot.slane %v2310_v37, 4 }
 0x18e   : > { %v1609_v8 = vpop.f32.mrf.mxu2 }
 0x18f   : > { %v1865_v58 = vpop.f32.mrf.mxu3  ;;  %v1658_v57 = vadd.f32 %v1609_v8, %v971_v34  ;;  %v2332_v34 = vshrl.u32 %v473_v41, 16  ;;  %v2335_v8 = vshll.u32 %v473_v41, 16  ;;  %v2327_v41 = vshll.u32 %v472_v53, 16  ;;  %v475_v53 = vld [vmem:[%s4789_s14 + $0x68] sm:$0xf] }
 0x190   : > { %v973_v36 = vpop.f32.mrf.mxu1 }
 0x191   : > { %v1914_v62 = vadd.f32 %v1865_v58, %v1658_v57  ;;  %v2120_v22 = vpop.f32.mrf.mxu0  ;;  %v974_v42 = vadd.f32 %v973_v36, %v6367_v5  ;;  %v2334_v57 = vrot.slane %v2332_v34, 4  ;;  %v2337_v36 = vrot.slane %v2335_v8, 5 }
 0x193   : > { %4090 = vmatmul.msk.bf16.gmra.mxu1 %vm636_vm1, %v2660_v35  ;;  %4106 = vmatmul.msk.bf16.gmra.mxu2 %vm636_vm1, %v2860_v14  ;;  %v5529_v20 = vadd.f32 %v2117_v25, %v1914_v62  ;;  %v2316_v25 = vsel %vm4739_vm4, %v2311_v3, %v2315_v55  ;;  %v2320_v14 = vrot.slane %v2318_v27, 4  ;;  %v6369_v62 = vld [vmem:[#allocation35_spill] sm:$0xff]  ;;  %v6372_v3 = vunpack.c.l.b16 %v6371_v30 }
 0x194   : > { %4122 = vmatmul.msk.bf16.gmra.mxu3 %vm636_vm1, %v3056_v6  ;;  %4138 = vmatmul.msk.bf16.gmra.mxu0 %vm636_vm1, %v3308_v59  ;;  %v2634_v63 = vunpack.c.l.b16 %v2316_v25  ;;  %v6368_v6 = vld [vmem:[#allocation65_spill] sm:$0xff]  ;;  %v6370_v28 = vunpack.c.l.b16 %v6369_v62  ;;  %v2338_v40 = vor.u32 %v2337_v36, %v2334_v57  ;;  %v6378_v25 = vld [vmem:[#allocation44_spill] sm:$0xff]  ;;  %v6379_v36 = vld [vmem:[#allocation43_spill] sm:$0xff]  ;;  %v2349_v62 = vshll.u32 %v475_v53, 16 }
 0x195   : > { %v2324_v44 = vor.u32 %v2323_v11, %v2320_v14  ;;  %v477_v57 = vld [vmem:[%s4789_s14 + $0x70] sm:$0xf] }
 0x196   : > { %v1612_v18 = vpop.f32.mrf.mxu2  ;;  %v2661_v59 = vpack.c.b16 %v2634_v63, %v2633_v9  ;;  %v2861_v55 = vpack.c.b16 %v6372_v3, %v6370_v28  ;;  %v2329_v63 = vrot.slane %v2327_v41, 5  ;;  %v2339_v14 = vrot.slane %v2338_v40, 4 }
 0x197   : > { %v1868_v13 = vpop.f32.mrf.mxu3  ;;  %v1659_v17 = vadd.f32 %v1612_v18, %v974_v42  ;;  %v6373_v18 = vld [vmem:[#allocation8_spill] sm:$0xff]  ;;  %v2325_v9 = vrot.slane %v2324_v44, 4  ;;  %v2360_v3 = vshrl.u32 %v477_v57, 16 }
 0x198   : > { %v975_v39 = vpop.f32.mrf.mxu1 }
 0x199   : > { %v1915_v58 = vadd.f32 %v1868_v13, %v1659_v17  ;;  %v2122_v35 = vpop.f32.mrf.mxu0  ;;  %v976_v37 = vadd.f32 %v975_v39, %v6368_v6  ;;  %v6374_v13 = vunpack.c.l.b16 %v6373_v18  ;;  %v2341_v17 = vshll.u32 %v474_v52, 16  ;;  %v6377_v39 = vld [vmem:[#allocation40_spill] sm:$0xff] }
 0x19a   : > { %v3309_v34 = vpack.c.b16 %v6378_v25, %v6377_v39  ;;  %v6380_v39 = vld [vmem:[#allocation46_spill] sm:$0xff] }
 0x19b   : > { %v5539_v2 = vadd.f32 %v2120_v22, %v1915_v58  ;;  %v6375_v22 = vld [vmem:[#allocation11_spill] sm:$0xff]  ;;  %v2343_v11 = vrot.slane %v2341_v17, 5  ;;  %v478_v17 = vld [vmem:[%s4789_s14 + $0x74] sm:$0x1] }
 0x19c   : > { %v6376_v60 = vunpack.c.l.b16 %v6375_v22  ;;  %v476_v22 = vld [vmem:[%s4789_s14 + $0x6c] sm:$0x1] }
 0x19e   : > { %v1614_v48 = vpop.f32.mrf.mxu2  ;;  %v3057_v27 = vpack.c.b16 %v6376_v60, %v6374_v13  ;;  %v2351_v13 = vrot.slane %v2349_v62, 5  ;;  %v2362_v60 = vrot.slane %v2360_v3, 4  ;;  %v6389_v3 = vld [vmem:[#allocation45_spill] sm:$0xff] }
 0x19f   : > { %v1870_v43 = vpop.f32.mrf.mxu3  ;;  %v1660_v5 = vadd.f32 %v1614_v48, %v976_v37 }
 0x1a0   : > { %v978_v42 = vpop.f32.mrf.mxu1 }
 0x1a1   : > { %v1916_v8 = vadd.f32 %v1870_v43, %v1660_v5  ;;  %v2125_v58 = vpop.f32.mrf.mxu0  ;;  %v979_v52 = vadd.f32 %v978_v42, %v6379_v36  ;;  %v2330_v43 = vsel %vm4739_vm4, %v2325_v9, %v2329_v63  ;;  %v6381_v63 = vld [vmem:[#allocation39_spill] sm:$0xff] }
 0x1a2   : > { %v2635_v5 = vunpack.c.l.b16 %v2330_v43  ;;  %v6385_v43 = vld [vmem:[#allocation12_spill] sm:$0xff] }
 0x1a3   : > { %4091 = vmatmul.msk.bf16.gmra.mxu1 %vm636_vm1, %v2661_v59  ;;  %4107 = vmatmul.msk.bf16.gmra.mxu2 %vm636_vm1, %v2861_v55  ;;  %v5557_v6 = vadd.f32 %v2122_v35, %v1916_v8  ;;  %v2346_v59 = vshrl.u32 %v475_v53, 16  ;;  %v2344_v35 = vsel %vm4739_vm4, %v2339_v14, %v2343_v11  ;;  %v2363_v55 = vshll.u32 %v477_v57, 16  ;;  %v6383_v11 = vld [vmem:[#allocation41_spill] sm:$0xff] }
 0x1a4   : > { %4123 = vmatmul.msk.bf16.gmra.mxu3 %vm636_vm1, %v3057_v27  ;;  %4139 = vmatmul.msk.bf16.gmra.mxu0 %vm636_vm1, %v3309_v34  ;;  %v2636_v42 = vunpack.c.l.b16 %v2344_v35  ;;  %v6382_v14 = vunpack.c.l.b16 %v6381_v63  ;;  %v6384_v53 = vunpack.c.l.b16 %v6383_v11  ;;  %v2369_v35 = vshll.u32 %v478_v17, 16 }
 0x1a5   : > { %v2348_v18 = vrot.slane %v2346_v59, 4  ;;  %v2365_v27 = vrot.slane %v2363_v55, 5  ;;  %v6386_v59 = vunpack.c.l.b16 %v6385_v43  ;;  %v6390_v55 = vld [vmem:[#allocation50_spill] sm:$0xff] }
 0x1a6   : > { %v1617_v37 = vpop.f32.mrf.mxu2  ;;  %v2662_v9 = vpack.c.b16 %v2636_v42, %v2635_v5  ;;  %v2862_v57 = vpack.c.b16 %v6384_v53, %v6382_v14  ;;  %v5593_v53 = vld [vmem:[%s4623_s28 + $0x88] sm:$0xf] }
 0x1a7   : > { %v1873_v48 = vpop.f32.mrf.mxu3  ;;  %v1661_v28 = vadd.f32 %v1617_v37, %v979_v52  ;;  %v2352_v36 = vor.u32 %v2351_v13, %v2348_v18  ;;  %v2355_v52 = vshll.u32 %v476_v22, 16 }
 0x1a8   : > { %v980_v30 = vpop.f32.mrf.mxu1 }
 0x1a9   : > { %v1917_v44 = vadd.f32 %v1873_v48, %v1661_v28  ;;  %v2127_v41 = vpop.f32.mrf.mxu0  ;;  %v981_v25 = vadd.f32 %v980_v30, %v6380_v39  ;;  %v2366_v30 = vor.u32 %v2365_v27, %v2362_v60  ;;  %v2353_v18 = vrot.slane %v2352_v36, 4  ;;  %v481_v60 = vld [vmem:[%s4789_s14 + $0x80] sm:$0xf]  ;;  %v6392_v27 = vld [vmem:[#allocation49_spill] sm:$0xff] }
 0x1aa   : > { %v2357_v13 = vrot.slane %v2355_v52, 5  ;;  %v2371_v39 = vrot.slane %v2369_v35, 5  ;;  %v2388_v52 = vshrl.u32 %v481_v60, 16 }
 0x1ab   : > { %v5567_v40 = vadd.f32 %v2125_v58, %v1917_v44  ;;  %v6387_v58 = vld [vmem:[#allocation17_spill] sm:$0xff]  ;;  %v3310_v44 = vpack.c.b16 %v6390_v55, %v6389_v3  ;;  %v2367_v22 = vrot.slane %v2366_v30, 4  ;;  %v480_v3 = vld [vmem:[%s4789_s14 + $0x7c] sm:$0x1] }
 0x1ac   : > { %v6388_v62 = vunpack.c.l.b16 %v6387_v58  ;;  %v3263_v58 = vshll.u32 %v5593_v53, 16  ;;  %v2390_v55 = vrot.slane %v2388_v52, 4 }
 0x1ae   : > { %v1619_v34 = vpop.f32.mrf.mxu2  ;;  %v3058_v28 = vpack.c.b16 %v6388_v62, %v6386_v59  ;;  %v3260_v59 = vshrl.u32 %v5593_v53, 16 }
 0x1af   : > { %v1875_v8 = vpop.f32.mrf.mxu3  ;;  %v1662_v37 = vadd.f32 %v1619_v34, %v981_v25  ;;  %v479_v25 = vld [vmem:[%s4789_s14 + $0x78] sm:$0xf] }
 0x1b0   : > { %v983_v48 = vpop.f32.mrf.mxu1  ;;  %v2374_v14 = vshrl.u32 %v479_v25, 16  ;;  %v2377_v11 = vshll.u32 %v479_v25, 16  ;;  %v3265_v25 = vrot.slane %v3263_v58, 5 }
 0x1b1   : > { %v1918_v5 = vadd.f32 %v1875_v8, %v1662_v37  ;;  %v2130_v42 = vpop.f32.mrf.mxu0  ;;  %v984_v17 = vadd.f32 %v983_v48, %v6392_v27  ;;  %v2391_v37 = vshll.u32 %v481_v60, 16 }
 0x1b2   : > { %v2376_v30 = vrot.slane %v2374_v14, 4  ;;  %v2379_v35 = vrot.slane %v2377_v11, 5  ;;  %v2383_v11 = vshll.u32 %v480_v3, 16 }
 0x1b3   : > { %4092 = vmatmul.msk.bf16.gmra.mxu1 %vm636_vm1, %v2662_v9  ;;  %4108 = vmatmul.msk.bf16.gmra.mxu2 %vm636_vm1, %v2862_v57  ;;  %v5585_v34 = vadd.f32 %v2127_v41, %v1918_v5  ;;  %v2358_v9 = vsel %vm4739_vm4, %v2353_v18, %v2357_v13  ;;  %v2372_v41 = vsel %vm4739_vm4, %v2367_v22, %v2371_v39  ;;  %v482_v18 = vld [vmem:[%s4789_s14 + $0x84] sm:$0x1]  ;;  %v3262_v39 = vrot.slane %v3260_v59, 4 }
 0x1b4   : > { %4124 = vmatmul.msk.bf16.gmra.mxu3 %vm636_vm1, %v3058_v28  ;;  %4140 = vmatmul.msk.bf16.gmra.mxu0 %vm636_vm1, %v3310_v44  ;;  %v2637_v62 = vunpack.c.l.b16 %v2358_v9  ;;  %v2638_v28 = vunpack.c.l.b16 %v2372_v41  ;;  %v2393_v44 = vrot.slane %v2391_v37, 5  ;;  %v6394_v13 = vld [vmem:[#allocation52_spill] sm:$0xff]  ;;  %v6397_v9 = vld [vmem:[#allocation47_spill] sm:$0xff]  ;;  %v2380_v41 = vor.u32 %v2379_v35, %v2376_v30 }
 0x1b5   : > { %6391 = vst [vmem:[#allocation32_spill] sm:$0xff] %v5585_v34  ;;  %v2397_v58 = vshll.u32 %v482_v18, 16  ;;  %v3269_v30 = vshll.u32 %v378_v7, 16  ;;  %v2385_v3 = vrot.slane %v2383_v11, 5  ;;  %v485_v18 = vld [vmem:[%s4789_s14 + $0x98] sm:$0xf] }
 0x1b6   : > { %v1622_v8 = vpop.f32.mrf.mxu2  ;;  %v2394_v59 = vor.u32 %v2393_v44, %v2390_v55  ;;  %v2381_v35 = vrot.slane %v2380_v41, 4  ;;  %v483_v55 = vld [vmem:[%s4789_s14 + $0x90] sm:$0xf] }
 0x1b7   : > { %v1878_v63 = vpop.f32.mrf.mxu3  ;;  %v1663_v57 = vadd.f32 %v1622_v8, %v984_v17  ;;  %v2663_v17 = vpack.c.b16 %v2638_v28, %v2637_v62  ;;  %v6395_v8 = vld [vmem:[#allocation42_spill] sm:$0xff]  ;;  %v6404_v62 = vld [vmem:[#allocation56_spill] sm:$0xff] }
 0x1b8   : > { %v985_v36 = vpop.f32.mrf.mxu1 }
 0x1b9   : > { %v1919_v43 = vadd.f32 %v1878_v63, %v1663_v57  ;;  %v2132_v48 = vpop.f32.mrf.mxu0  ;;  %v986_v22 = vadd.f32 %v985_v36, %v6394_v13  ;;  %v6396_v63 = vunpack.c.l.b16 %v6395_v8  ;;  %v6398_v57 = vunpack.c.l.b16 %v6397_v9  ;;  %v6403_v13 = vld [vmem:[#allocation51_spill] sm:$0xff] }
 0x1ba   : > { %v3311_v28 = vpack.c.b16 %v6404_v62, %v6403_v13  ;;  %v2854_v62 = vunpack.c.l.b16 %v5593_v53 }
 0x1bb   : > { %v5600_v5 = vadd.f32 %v2130_v42, %v1919_v43  ;;  %v2863_v14 = vpack.c.b16 %v6398_v57, %v6396_v63  ;;  %v6399_v42 = vld [vmem:[#allocation18_spill] sm:$0xff]  ;;  %v3266_v63 = vor.u32 %v3265_v25, %v3262_v39  ;;  %v3271_v25 = vrot.slane %v3269_v30, 5 }
 0x1bc   : > { %v6400_v43 = vunpack.c.l.b16 %v6399_v42  ;;  %v2402_v57 = vshrl.u32 %v483_v55, 16  ;;  %v2419_v42 = vshll.u32 %v485_v18, 16  ;;  %v484_v30 = vld [vmem:[%s4789_s14 + $0x94] sm:$0x1] }
 0x1bd   : > { %6393 = vst [vmem:[#allocation23_spill] sm:$0xff] %v5600_v5  ;;  %v6402_v5 = vunpack.c.l.b16 %v6401_v24  ;;  %v2395_v24 = vrot.slane %v2394_v59, 4  ;;  %v3267_v7 = vrot.slane %v3266_v63, 4  ;;  %v2411_v53 = vshll.u32 %v484_v30, 16 }
 0x1be   : > { %v1624_v60 = vpop.f32.mrf.mxu2 }
 0x1bf   : > { %v1880_v27 = vpop.f32.mrf.mxu3  ;;  %v1664_v52 = vadd.f32 %v1624_v60, %v986_v22  ;;  %v3059_v36 = vpack.c.b16 %v6402_v5, %v6400_v43  ;;  %v2399_v5 = vrot.slane %v2397_v58, 5  ;;  %v6406_v22 = vld [vmem:[#allocation55_spill] sm:$0xff]  ;;  %v432_v43 = vld [vmem:[%s4536_s19 + $0x88] sm:$0xf]  ;;  %v3272_v58 = vsel %vm4739_vm4, %v3267_v7, %v3271_v25 }
 0x1c0   : > { %v988_v37 = vpop.f32.mrf.mxu1  ;;  %v3050_v63 = vunpack.c.l.b16 %v432_v43 }
 0x1c1   : > { %v1920_v8 = vadd.f32 %v1880_v27, %v1664_v52  ;;  %v2135_v9 = vpop.f32.mrf.mxu0  ;;  %v989_v39 = vadd.f32 %v988_v37, %v6406_v22  ;;  %v2416_v52 = vshrl.u32 %v485_v18, 16  ;;  %v6408_v18 = vld [vmem:[#allocation59_spill] sm:$0xff] }
 0x1c3   : > { %4093 = vmatmul.msk.bf16.gmra.mxu1 %vm636_vm1, %v2663_v17  ;;  %4109 = vmatmul.msk.bf16.gmra.mxu2 %vm636_vm1, %v2863_v14  ;;  %v5619_v44 = vadd.f32 %v2132_v48, %v1920_v8  ;;  %v2386_v17 = vsel %vm4739_vm4, %v2381_v35, %v2385_v3  ;;  %v2405_v14 = vshll.u32 %v483_v55, 16  ;;  %v2400_v48 = vsel %vm4739_vm4, %v2395_v24, %v2399_v5  ;;  %v486_v55 = vld [vmem:[%s4789_s14 + $0x9c] sm:$0x1] }
 0x1c4   : > { %4125 = vmatmul.msk.bf16.gmra.mxu3 %vm636_vm1, %v3059_v36  ;;  %4141 = vmatmul.msk.bf16.gmra.mxu0 %vm636_vm1, %v3311_v28  ;;  %v2639_v59 = vunpack.c.l.b16 %v2386_v17  ;;  %v2640_v13 = vunpack.c.l.b16 %v2400_v48  ;;  %v2404_v28 = vrot.slane %v2402_v57, 4  ;;  %v2418_v35 = vrot.slane %v2416_v52, 4  ;;  %v6409_v17 = vld [vmem:[#allocation48_spill] sm:$0xff]  ;;  %v6411_v48 = vld [vmem:[#allocation25_spill] sm:$0xff] }
 0x1c5   : > { %6405 = vst [vmem:[#allocation30_spill] sm:$0xff] %v5619_v44  ;;  %v2407_v8 = vrot.slane %v2405_v14, 5  ;;  %v2421_v3 = vrot.slane %v2419_v42, 5  ;;  %v3302_v5 = vunpack.c.l.b16 %v3272_v58  ;;  %v6410_v7 = vunpack.c.l.b16 %v6409_v17  ;;  %v396_v44 = vld [vmem:[%s4623_s28 + $0xd4] sm:$0x1] }
 0x1c6   : > { %v1627_v60 = vpop.f32.mrf.mxu2  ;;  %v6412_v52 = vunpack.c.l.b16 %v6411_v48  ;;  %v2425_v43 = vshll.u32 %v486_v55, 16 }
 0x1c7   : > { %v1883_v27 = vpop.f32.mrf.mxu3  ;;  %v1665_v41 = vadd.f32 %v1627_v60, %v989_v39  ;;  %v2864_v25 = vpack.c.b16 %v2854_v62, %v6410_v7 }
 0x1c8   : > { %v990_v11 = vpop.f32.mrf.mxu1  ;;  %v3060_v42 = vpack.c.b16 %v3050_v63, %v6412_v52  ;;  %v489_v63 = vld [vmem:[%s4789_s14 + $0xa8] sm:$0xf] }
 0x1c9   : > { %v1921_v37 = vadd.f32 %v1883_v27, %v1665_v41  ;;  %v2137_v36 = vpop.f32.mrf.mxu0  ;;  %v991_v22 = vadd.f32 %v990_v11, %v6408_v18  ;;  %v2664_v27 = vpack.c.b16 %v2640_v13, %v2639_v59  ;;  %v2408_v41 = vor.u32 %v2407_v8, %v2404_v28  ;;  %v487_v8 = vld [vmem:[%s4789_s14 + $0xa0] sm:$0xf] }
 0x1ca   : > { %v2413_v13 = vrot.slane %v2411_v53, 5  ;;  %v2427_v28 = vrot.slane %v2425_v43, 5  ;;  %v2444_v7 = vshrl.u32 %v489_v63, 16 }
 0x1cb   : > { %v5633_v24 = vadd.f32 %v2135_v9, %v1921_v37  ;;  %v2422_v9 = vor.u32 %v2421_v3, %v2418_v35  ;;  %v6413_v37 = vld [vmem:[#allocation57_spill] sm:$0xff]  ;;  %v2409_v59 = vrot.slane %v2408_v41, 4  ;;  %v6415_v35 = vld [vmem:[#allocation63_spill] sm:$0xff] }
 0x1cc   : > { %v3312_v58 = vpack.c.b16 %v3302_v5, %v6413_v37  ;;  %v488_v37 = vld [vmem:[%s4789_s14 + $0xa4] sm:$0x1] }
 0x1cd   : > { %6407 = vst [vmem:[#allocation34_spill] sm:$0xff] %v5633_v24  ;;  %v2423_v62 = vrot.slane %v2422_v9, 4  ;;  %v6445_v24 = vld [vmem:[#allocation26_spill] sm:$0xff] }
 0x1ce   : > { %v1629_v39 = vpop.f32.mrf.mxu2 }
 0x1cf   : > { %v1885_v60 = vpop.f32.mrf.mxu3  ;;  %v1666_v57 = vadd.f32 %v1629_v39, %v991_v22  ;;  %v2414_v22 = vsel %vm4739_vm4, %v2409_v59, %v2413_v13  ;;  %v2430_v39 = vshrl.u32 %v487_v8, 16 }
 0x1d0   : > { %v993_v14 = vpop.f32.mrf.mxu1 }
 0x1d1   : > { %v1922_v11 = vadd.f32 %v1885_v60, %v1666_v57  ;;  %v2140_v18 = vpop.f32.mrf.mxu0  ;;  %v994_v3 = vadd.f32 %v993_v14, %v6415_v35  ;;  %v2433_v60 = vshll.u32 %v487_v8, 16  ;;  %v2641_v57 = vunpack.c.l.b16 %v2414_v22 }
 0x1d2   : > { %v2432_v48 = vrot.slane %v2430_v39, 4  ;;  %v6424_v39 = vld [vmem:[#allocation13_spill] sm:$0xff] }
 0x1d3   : > { %4094 = vmatmul.msk.bf16.gmra.mxu1 %vm636_vm1, %v2664_v27  ;;  %4110 = vmatmul.msk.bf16.gmra.mxu2 %vm636_vm1, %v2864_v25  ;;  %v5646_v30 = vadd.f32 %v2137_v36, %v1922_v11  ;;  %v2428_v36 = vsel %vm4739_vm4, %v2423_v62, %v2427_v28  ;;  %v2447_v25 = vshll.u32 %v489_v63, 16  ;;  %v2435_v52 = vrot.slane %v2433_v60, 5  ;;  %v6417_v11 = vld [vmem:[#allocation66_spill] sm:$0xff]  ;;  %v6418_v62 = vld [vmem:[#allocation53_spill] sm:$0xff]  ;;  %v6420_v63 = vld [vmem:[#allocation60_spill] sm:$0xff] }
 0x1d4   : > { %4126 = vmatmul.msk.bf16.gmra.mxu3 %vm636_vm1, %v3060_v42  ;;  %4142 = vmatmul.msk.bf16.gmra.mxu0 %vm636_vm1, %v3312_v58  ;;  %v2642_v14 = vunpack.c.l.b16 %v2428_v36  ;;  %v2446_v42 = vrot.slane %v2444_v7, 4  ;;  %v490_v58 = vld [vmem:[%s4789_s14 + $0xac] sm:$0x1]  ;;  %v6419_v28 = vunpack.c.l.b16 %v6418_v62  ;;  %v6425_v60 = vunpack.c.l.b16 %v6424_v39 }
 0x1d5   : > { %6414 = vst [vmem:[#allocation36_spill] sm:$0xff] %v5646_v30  ;;  %v2449_v9 = vrot.slane %v2447_v25, 5  ;;  %v2436_v36 = vor.u32 %v2435_v52, %v2432_v48  ;;  %v2439_v25 = vshll.u32 %v488_v37, 16 }
 0x1d6   : > { %v1632_v5 = vpop.f32.mrf.mxu2  ;;  %v2665_v35 = vpack.c.b16 %v2642_v14, %v2641_v57 }
 0x1d7   : > { %v1888_v55 = vpop.f32.mrf.mxu3  ;;  %v1667_v27 = vadd.f32 %v1632_v5, %v994_v3  ;;  %v6421_v3 = vunpack.c.l.b16 %v6420_v63  ;;  %v2441_v48 = vrot.slane %v2439_v25, 5 }
 0x1d8   : > { %v995_v17 = vpop.f32.mrf.mxu1 }
 0x1d9   : > { %v1923_v41 = vadd.f32 %v1888_v55, %v1667_v27  ;;  %v2142_v53 = vpop.f32.mrf.mxu0  ;;  %v996_v59 = vadd.f32 %v995_v17, %v6417_v11  ;;  %v2865_v5 = vpack.c.b16 %v6421_v3, %v6419_v28  ;;  %v6422_v55 = vld [vmem:[#allocation9_spill] sm:$0xff]  ;;  %v2450_v17 = vor.u32 %v2449_v9, %v2446_v42  ;;  %v6426_v11 = vld [vmem:[#allocation64_spill] sm:$0xff]  ;;  %v493_v42 = vld [vmem:[%s4789_s14 + $0xb8] sm:$0xf] }
 0x1da   : > { %v6423_v22 = vunpack.c.l.b16 %v6422_v55  ;;  %v3313_v57 = vpack.c.b16 %v5156_v31, %v6426_v11  ;;  %v2437_v28 = vrot.slane %v2436_v36, 4  ;;  %v6428_v55 = vld [vmem:[#allocation70_spill] sm:$0xff] }
 0x1db   : > { %v5655_v43 = vadd.f32 %v2140_v18, %v1923_v41  ;;  %v2453_v41 = vshll.u32 %v490_v58, 16  ;;  %v2451_v52 = vrot.slane %v2450_v17, 4  ;;  %v492_v17 = vld [vmem:[%s4789_s14 + $0xb4] sm:$0x1] }
 0x1dc   : > { %v3061_v27 = vpack.c.b16 %v6425_v60, %v6423_v22  ;;  %v2442_v63 = vsel %vm4739_vm4, %v2437_v28, %v2441_v48  ;;  %v6429_v28 = vld [vmem:[#allocation61_spill] sm:$0xff] }
 0x1dd   : > { %6416 = vst [vmem:[#allocation54_spill] sm:$0xff] %v5655_v43  ;;  %v2643_v60 = vunpack.c.l.b16 %v2442_v63  ;;  %v6430_v48 = vunpack.c.l.b16 %v6429_v28 }
 0x1de   : > { %v1634_v13 = vpop.f32.mrf.mxu2 }
 0x1df   : > { %v1890_v8 = vpop.f32.mrf.mxu3  ;;  %v1668_v18 = vadd.f32 %v1634_v13, %v996_v59  ;;  %v2455_v59 = vrot.slane %v2453_v41, 5  ;;  %v491_v13 = vld [vmem:[%s4789_s14 + $0xb0] sm:$0xf] }
 0x1e0   : > { %v2737_v7 = vpop.f32.mrf.mxu1  ;;  %v2458_v58 = vshrl.u32 %v491_v13, 16 }
 0x1e1   : > { %v1924_v14 = vadd.f32 %v1890_v8, %v1668_v18  ;;  %v3381_v62 = vpop.f32.mrf.mxu0  ;;  %v2461_v8 = vshll.u32 %v491_v13, 16  ;;  %v2456_v3 = vsel %vm4739_vm4, %v2451_v52, %v2455_v59  ;;  %v2817_v22 = vadd.f32 %v2737_v7, %v6428_v55  ;;  %v6431_v52 = vld [vmem:[#allocation67_spill] sm:$0xff] }
 0x1e2   : > { %v2460_v36 = vrot.slane %v2458_v58, 4  ;;  %v6432_v59 = vunpack.c.l.b16 %v6431_v52  ;;  %v6433_v58 = vld [vmem:[#allocation14_spill] sm:$0xff]  ;;  %v2467_v55 = vshll.u32 %v492_v17, 16 }
 0x1e3   : > { %4095 = vmatmul.msk.bf16.gmra.mxu1 %vm636_vm1, %v2665_v35  ;;  %4111 = vmatmul.msk.bf16.gmra.mxu2 %vm636_vm1, %v2865_v5  ;;  %v5674_v37 = vadd.f32 %v2142_v53, %v1924_v14  ;;  %v2472_v5 = vshrl.u32 %v493_v42, 16  ;;  %v2475_v53 = vshll.u32 %v493_v42, 16  ;;  %v2463_v18 = vrot.slane %v2461_v8, 5 }
 0x1e4   : > { %4127 = vmatmul.msk.bf16.gmra.mxu3 %vm636_vm1, %v3061_v27  ;;  %4143 = vmatmul.msk.bf16.gmra.mxu0 %vm636_vm1, %v3313_v57  ;;  %v2644_v27 = vunpack.c.l.b16 %v2456_v3  ;;  %v494_v57 = vld [vmem:[%s4789_s14 + $0xbc] sm:$0x1]  ;;  %v2866_v13 = vpack.c.b16 %v6432_v59, %v6430_v48  ;;  %v6434_v8 = vunpack.c.l.b16 %v6433_v58  ;;  %v6437_v48 = vld [vmem:[#allocation69_spill] sm:$0xff] }
 0x1e5   : > { %6427 = vst [vmem:[#allocation58_spill] sm:$0xff] %v5674_v37  ;;  %v2474_v41 = vrot.slane %v2472_v5, 4  ;;  %v2477_v11 = vrot.slane %v2475_v53, 5  ;;  %v2464_v53 = vor.u32 %v2463_v18, %v2460_v36  ;;  %v2481_v52 = vshll.u32 %v494_v57, 16 }
 0x1e6   : > { %v2933_v9 = vpop.f32.mrf.mxu2  ;;  %v2666_v63 = vpack.c.b16 %v2644_v27, %v2643_v60  ;;  %v3314_v59 = vpack.c.b16 %v5198_v21, %v6437_v48  ;;  %v2469_v36 = vrot.slane %v2467_v55, 5  ;;  %v495_v21 = vld [vmem:[%s4789_s14 + $0xc0] sm:$0xf]  ;;  %v496_v48 = vld [vmem:[%s4789_s14 + $0xc4] sm:$0x1] }
 0x1e7   : > { %v3133_v31 = vpop.f32.mrf.mxu3  ;;  %v3013_v25 = vadd.f32 %v2933_v9, %v2817_v22  ;;  %v6435_v9 = vld [vmem:[#allocation19_spill] sm:$0xff]  ;;  %v2478_v28 = vor.u32 %v2477_v11, %v2474_v41  ;;  %v2465_v27 = vrot.slane %v2464_v53, 4  ;;  %v2483_v17 = vrot.slane %v2481_v52, 5  ;;  %v497_v41 = vld [vmem:[%s4789_s14 + $0xc8] sm:$0xf] }
 0x1e8   : > { %v2739_v35 = vpop.f32.mrf.mxu1  ;;  %v6436_v3 = vunpack.c.l.b16 %v6435_v9  ;;  %v2503_v58 = vshll.u32 %v497_v41, 16 }
 0x1e9   : > { %v3383_v39 = vpop.f32.mrf.mxu0  ;;  %v2818_v14 = vadd.f32 %v2739_v35, %v5178_v19  ;;  %v3213_v22 = vadd.f32 %v3133_v31, %v3013_v25  ;;  %v2479_v25 = vrot.slane %v2478_v28, 4 }
 0x1ea   : > { %v3062_v5 = vpack.c.b16 %v6436_v3, %v6434_v8  ;;  %v6438_v8 = vld [vmem:[#allocation73_spill] sm:$0xff] }
 0x1eb   : > { %v5703_v18 = vadd.f32 %v3381_v62, %v3213_v22  ;;  %v2489_v62 = vshll.u32 %v495_v21, 16 }
 0x1ed   : > { %v2491_v28 = vrot.slane %v2489_v62, 5 }
 0x1ee   : > { %v2935_v42 = vpop.f32.mrf.mxu2 }
 0x1ef   : > { %v3135_v7 = vpop.f32.mrf.mxu3  ;;  %v3014_v19 = vadd.f32 %v2935_v42, %v2818_v14  ;;  %v2486_v42 = vshrl.u32 %v495_v21, 16 }
 0x1f0   : > { %v2742_v35 = vpop.f32.mrf.mxu1 }
 0x1f1   : > { %v3214_v37 = vadd.f32 %v3135_v7, %v3014_v19  ;;  %v5700_v60 = vpop.f32.mrf.mxu0  ;;  %v5715_v7 = vld [vmem:[%s4623_s28 + $0xd0] sm:$0xf]  ;;  %v2819_v9 = vadd.f32 %v2742_v35, %v6438_v8  ;;  %v2488_v19 = vrot.slane %v2486_v42, 4  ;;  %v6441_v35 = vld [vmem:[#allocation71_spill] sm:$0xff]  ;;  %v6443_v42 = vld [vmem:[#allocation20_spill] sm:$0xff] }
 0x1f2   : > { %v3277_v53 = vshll.u32 %v5715_v7, 16  ;;  %v6444_v62 = vunpack.c.l.b16 %v6443_v42  ;;  %v6448_v42 = vld [vmem:[#allocation76_spill] sm:$0xff] }
 0x1f3   : > { %4096 = vmatmul.msk.bf16.gmra.mxu1 %vm636_vm1, %v2666_v63  ;;  %v5705_v31 = vadd.f32 %v3383_v39, %v3214_v37  ;;  %4112 = vmatmul.msk.bf16.gmra.mxu2 %vm636_vm1, %v2866_v13  ;;  %v2470_v39 = vsel %vm4739_vm4, %v2465_v27, %v2469_v36  ;;  %v2484_v13 = vsel %vm4739_vm4, %v2479_v25, %v2483_v17  ;;  %v2500_v63 = vshrl.u32 %v497_v41, 16  ;;  %v498_v36 = vld [vmem:[%s4789_s14 + $0xcc] sm:$0x1]  ;;  %v6439_v17 = vld [vmem:[#allocation68_spill] sm:$0xff] }
 0x1f4   : > { %4128 = vmatmul.msk.bf16.gmra.mxu3 %vm636_vm1, %v3062_v5  ;;  %4144 = vmatmul.msk.bf16.gmra.mxu0 %vm636_vm1, %v3314_v59  ;;  %v3274_v5 = vshrl.u32 %v5715_v7, 16  ;;  %v2645_v55 = vunpack.c.l.b16 %v2470_v39  ;;  %v2646_v22 = vunpack.c.l.b16 %v2484_v13  ;;  %v2505_v27 = vrot.slane %v2503_v58, 5 }
 0x1f5   : > { %v4194_v11 = vpack.c.bf16 %v5705_v31, %v5703_v18  ;;  %v2502_v59 = vrot.slane %v2500_v63, 4  ;;  %v6440_v21 = vunpack.c.l.b16 %v6439_v17  ;;  %v6442_v41 = vunpack.c.l.b16 %v6441_v35 }
 0x1f6   : > { %v2938_v57 = vpop.f32.mrf.mxu2  ;;  %v3276_v8 = vrot.slane %v3274_v5, 4  ;;  %v3279_v43 = vrot.slane %v3277_v53, 5  ;;  %v2667_v13 = vpack.c.b16 %v2646_v22, %v2645_v55  ;;  %v2492_v63 = vor.u32 %v2491_v28, %v2488_v19 }
 0x1f7   : > { %v3138_v14 = vpop.f32.mrf.mxu3  ;;  %4195 = vst [vmem:[%s5717_s26] sm:$0xff] %v4194_v11   ;;  %v3015_v52 = vadd.f32 %v2938_v57, %v2819_v9  ;;  %v2867_v11 = vpack.c.b16 %v6442_v41, %v6440_v21  ;;  %v6446_v57 = vunpack.c.l.b16 %v6445_v24  ;;  %v2495_v58 = vshll.u32 %v496_v48, 16  ;;  %v6447_v21 = vld [vmem:[#allocation72_spill] sm:$0xff] }
 0x1f8   : > { %v2744_v37 = vpop.f32.mrf.mxu1  ;;  %v2506_v17 = vor.u32 %v2505_v27, %v2502_v59  ;;  %v2509_v35 = vshll.u32 %v498_v36, 16  ;;  %v3315_v5 = vpack.c.b16 %v5240_v32, %v6447_v21  ;;  %v3280_v22 = vor.u32 %v3279_v43, %v3276_v8  ;;  %v441_v8 = vld [vmem:[%s4536_s19 + $0xd0] sm:$0xf] }
 0x1f9   : > { %v3388_v3 = vpop.f32.mrf.mxu0  ;;  %v2820_v25 = vadd.f32 %v2744_v37, %v5220_v15  ;;  %v3063_v9 = vpack.c.b16 %v6446_v57, %v6444_v62  ;;  %v3215_v34 = vadd.f32 %v3138_v14, %v3015_v52  ;;  %v3283_v41 = vshll.u32 %v396_v44, 16  ;;  %v499_v52 = vld [vmem:[%s4789_s14 + $0xd8] sm:$0xf]  ;;  %v501_v44 = vld [vmem:[%s4789_s14 + $0xe0] sm:$0xf] }
 0x1fa   : > { %v2493_v24 = vrot.slane %v2492_v63, 4  ;;  %v2497_v19 = vrot.slane %v2495_v58, 5  ;;  %v2507_v32 = vrot.slane %v2506_v17, 4  ;;  %v2511_v28 = vrot.slane %v2509_v35, 5 }
 0x1fb   : > { %v5745_v14 = vadd.f32 %v5700_v60, %v3215_v34  ;;  %v3281_v48 = vrot.slane %v3280_v22, 4  ;;  %v3285_v34 = vrot.slane %v3283_v41, 5  ;;  %v2514_v27 = vshrl.u32 %v499_v52, 16 }
 0x1fc   : > { %v2498_v59 = vsel %vm4739_vm4, %v2493_v24, %v2497_v19  ;;  %v2517_v36 = vshll.u32 %v499_v52, 16  ;;  %v2855_v63 = vunpack.c.l.b16 %v5715_v7  ;;  %v3051_v17 = vunpack.c.l.b16 %v441_v8  ;;  %v502_v19 = vld [vmem:[%s4789_s14 + $0xe4] sm:$0x1] }
 0x1fd   : > { %v3286_v58 = vsel %vm4739_vm4, %v3281_v48, %v3285_v34  ;;  %v2516_v35 = vrot.slane %v2514_v27, 4 }
 0x1fe   : > { %v2940_v30 = vpop.f32.mrf.mxu2  ;;  %v2519_v21 = vrot.slane %v2517_v36, 5  ;;  %v3303_v24 = vunpack.c.l.b16 %v3286_v58 }
 0x1ff   : > { %v3140_v39 = vpop.f32.mrf.mxu3  ;;  %v3016_v15 = vadd.f32 %v2940_v30, %v2820_v25 }
 0x200   : > { %v2747_v37 = vpop.f32.mrf.mxu1 }
 0x201   : > { %v3216_v53 = vadd.f32 %v3140_v39, %v3016_v15  ;;  %v5741_v55 = vpop.f32.mrf.mxu0  ;;  %v2528_v39 = vshrl.u32 %v501_v44, 16  ;;  %v2821_v62 = vadd.f32 %v2747_v37, %v6448_v42  ;;  %v6449_v37 = vunpack.c.l.b16 %v5185_v33 }
 0x203   : > { %4097 = vmatmul.msk.bf16.gmra.mxu1 %vm636_vm1, %v2667_v13  ;;  %v5747_v30 = vadd.f32 %v3388_v3, %v3216_v53  ;;  %4113 = vmatmul.msk.bf16.gmra.mxu2 %vm636_vm1, %v2867_v11  ;;  %v2512_v11 = vsel %vm4739_vm4, %v2507_v32, %v2511_v28  ;;  %v2531_v13 = vshll.u32 %v501_v44, 16  ;;  %v500_v53 = vld [vmem:[%s4789_s14 + $0xdc] sm:$0x1]  ;;  %v2530_v22 = vrot.slane %v2528_v39, 4 }
 0x204   : > { %4129 = vmatmul.msk.bf16.gmra.mxu3 %vm636_vm1, %v3063_v9  ;;  %4145 = vmatmul.msk.bf16.gmra.mxu0 %vm636_vm1, %v3315_v5  ;;  %v2647_v9 = vunpack.c.l.b16 %v2498_v59  ;;  %v2648_v15 = vunpack.c.l.b16 %v2512_v11  ;;  %v2868_v28 = vpack.c.b16 %v2855_v63, %v6449_v37  ;;  %v2520_v59 = vor.u32 %v2519_v21, %v2516_v35 }
 0x205   : > { %v4199_v43 = vpack.c.bf16 %v5747_v30, %v5745_v14  ;;  %v2533_v41 = vrot.slane %v2531_v13, 5  ;;  %v2523_v27 = vshll.u32 %v500_v53, 16  ;;  %v2537_v39 = vshll.u32 %v502_v19, 16  ;;  %v6452_v13 = vld [vmem:[#allocation75_spill] sm:$0xff] }
 0x206   : > { %v2943_v60 = vpop.f32.mrf.mxu2  ;;  %v2668_v44 = vpack.c.b16 %v2648_v15, %v2647_v9  ;;  %v2521_v42 = vrot.slane %v2520_v59, 4  ;;  %v503_v15 = vld [vmem:[%s4789_s14 + $0xe8] sm:$0xf] }
 0x207   : > { %v3143_v3 = vpop.f32.mrf.mxu3  ;;  %4271 = vst [vmem:[%s5717_s26 + $0x8] sm:$0xff] %v4199_v43   ;;  %v3017_v5 = vadd.f32 %v2943_v60, %v2821_v62  ;;  %v6450_v43 = vld [vmem:[#allocation27_spill] sm:$0xff]  ;;  %v2534_v8 = vor.u32 %v2533_v41, %v2530_v22  ;;  %v2525_v62 = vrot.slane %v2523_v27, 5  ;;  %v2539_v58 = vrot.slane %v2537_v39, 5 }
 0x208   : > { %v2749_v25 = vpop.f32.mrf.mxu1  ;;  %v6451_v48 = vunpack.c.l.b16 %v6450_v43  ;;  %v2545_v53 = vshll.u32 %v503_v15, 16 }
 0x209   : > { %v3393_v57 = vpop.f32.mrf.mxu0  ;;  %v2822_v32 = vadd.f32 %v2749_v25, %v5262_v0  ;;  %v3217_v36 = vadd.f32 %v3143_v3, %v3017_v5  ;;  %v3316_v0 = vpack.c.b16 %v3303_v24, %v6452_v13  ;;  %v2535_v3 = vrot.slane %v2534_v8, 4  ;;  %v6454_v8 = vld [vmem:[#allocation74_spill] sm:$0xff] }
 0x20a   : > { %v3064_v34 = vpack.c.b16 %v3051_v17, %v6451_v48  ;;  %v505_v17 = vld [vmem:[%s4789_s14 + $0xf0] sm:$0xf]  ;;  %v2526_v22 = vsel %vm4739_vm4, %v2521_v42, %v2525_v62  ;;  %v2547_v43 = vrot.slane %v2545_v53, 5  ;;  %v6455_v39 = vunpack.c.l.b16 %v6454_v8  ;;  %v6457_v62 = vld [vmem:[#allocation10_spill] sm:$0xff] }
 0x20b   : > { %v5776_v9 = vadd.f32 %v5741_v55, %v3217_v36  ;;  %v2542_v55 = vshrl.u32 %v503_v15, 16  ;;  %v2540_v41 = vsel %vm4739_vm4, %v2535_v3, %v2539_v58  ;;  %v2556_v24 = vshrl.u32 %v505_v17, 16  ;;  %v506_v36 = vld [vmem:[%s4789_s14 + $0xf4] sm:$0x1]  ;;  %v6459_v58 = vld [vmem:[#allocation15_spill] sm:$0xff] }
 0x20c   : > { %v2559_v19 = vshll.u32 %v505_v17, 16  ;;  %v6456_v13 = vunpack.c.l.b16 %v5266_v51  ;;  %v6458_v3 = vunpack.c.l.b16 %v6457_v62  ;;  %v6460_v15 = vunpack.c.l.b16 %v6459_v58 }
 0x20d   : > { %v2558_v59 = vrot.slane %v2556_v24, 4 }
 0x20e   : > { %v2945_v52 = vpop.f32.mrf.mxu2  ;;  %v2561_v27 = vrot.slane %v2559_v19, 5  ;;  %v3065_v17 = vpack.c.b16 %v6460_v15, %v6458_v3  ;;  %v508_v15 = vld [vmem:[%s4789_s14 + $0xfc] sm:$0x1] }
 0x20f   : > { %v3145_v7 = vpop.f32.mrf.mxu3  ;;  %v3018_v60 = vadd.f32 %v2945_v52, %v2822_v32  ;;  %v6453_v32 = vld [vmem:[#allocation79_spill] sm:$0xff]  ;;  %v2649_v52 = vunpack.c.l.b16 %v2526_v22 }
 0x210   : > { %v2752_v11 = vpop.f32.mrf.mxu1 }
 0x211   : > { %v3218_v25 = vadd.f32 %v3145_v7, %v3018_v60  ;;  %v3396_v33 = vpop.f32.mrf.mxu0  ;;  %v2823_v37 = vadd.f32 %v2752_v11, %v6453_v32  ;;  %v2650_v7 = vunpack.c.l.b16 %v2540_v41  ;;  %v6461_v41 = vld [vmem:[#allocation78_spill] sm:$0xff] }
 0x212   : > { %v3317_v51 = vpack.c.b16 %v5318_v45, %v6461_v41  ;;  %v509_v45 = vld [vmem:[%s4789_s14 + $0x100] sm:$0xf]  ;;  %v6466_v41 = vunpack.c.l.b16 %v5302_v29 }
 0x213   : > { %4098 = vmatmul.msk.bf16.gmra.mxu1 %vm636_vm1, %v2668_v44  ;;  %v5778_v63 = vadd.f32 %v3393_v57, %v3218_v25  ;;  %4114 = vmatmul.msk.bf16.gmra.mxu2 %vm636_vm1, %v2868_v28  ;;  %v2544_v44 = vrot.slane %v2542_v55, 4  ;;  %v2669_v11 = vpack.c.b16 %v2650_v7, %v2649_v52  ;;  %v2584_v8 = vshrl.u32 %v509_v45, 16 }
 0x214   : > { %4130 = vmatmul.msk.bf16.gmra.mxu3 %vm636_vm1, %v3064_v34  ;;  %4146 = vmatmul.msk.bf16.gmra.mxu0 %vm636_vm1, %v3316_v0  ;;  %v504_v34 = vld [vmem:[%s4789_s14 + $0xec] sm:$0x1]  ;;  %v2869_v0 = vpack.c.b16 %v6456_v13, %v6455_v39  ;;  %v2587_v39 = vshll.u32 %v509_v45, 16 }
 0x215   : > { %v4204_v35 = vpack.c.bf16 %v5778_v63, %v5776_v9  ;;  %v6462_v13 = vld [vmem:[#allocation81_spill] sm:$0xff] }
 0x216   : > { %v2948_v21 = vpop.f32.mrf.mxu2 }
 0x217   : > { %v3148_v5 = vpop.f32.mrf.mxu3  ;;  %4272 = vst [vmem:[%s5717_s26 + $0x10] sm:$0xff] %v4204_v35   ;;  %v3019_v48 = vadd.f32 %v2948_v21, %v2823_v37  ;;  %v2548_v35 = vor.u32 %v2547_v43, %v2544_v44  ;;  %v2551_v21 = vshll.u32 %v504_v34, 16  ;;  %v507_v43 = vld [vmem:[%s4789_s14 + $0xf8] sm:$0xf] }
 0x218   : > { %v2754_v57 = vpop.f32.mrf.mxu1 }
 0x219   : > { %v3398_v28 = vpop.f32.mrf.mxu0  ;;  %v2824_v60 = vadd.f32 %v2754_v57, %v5298_v49  ;;  %v3219_v55 = vadd.f32 %v3148_v5, %v3019_v48  ;;  %v2562_v49 = vor.u32 %v2561_v27, %v2558_v59  ;;  %v2565_v57 = vshll.u32 %v506_v36, 16 }
 0x21a   : > { %v2549_v32 = vrot.slane %v2548_v35, 4  ;;  %v2553_v37 = vrot.slane %v2551_v21, 5  ;;  %v2573_v27 = vshll.u32 %v507_v43, 16  ;;  %v2589_v35 = vrot.slane %v2587_v39, 5  ;;  %v510_v21 = vld [vmem:[%s4789_s14 + $0x104] sm:$0x1] }
 0x21b   : > { %v5807_v52 = vadd.f32 %v3396_v33, %v3219_v55  ;;  %v2563_v5 = vrot.slane %v2562_v49, 4  ;;  %v2567_v44 = vrot.slane %v2565_v57, 5  ;;  %v2570_v33 = vshrl.u32 %v507_v43, 16  ;;  %v6463_v55 = vld [vmem:[#allocation82_spill] sm:$0xff]  ;;  %v6464_v49 = vld [vmem:[#allocation77_spill] sm:$0xff] }
 0x21c   : > { %v2554_v36 = vsel %vm4739_vm4, %v2549_v32, %v2553_v37  ;;  %v2575_v3 = vrot.slane %v2573_v27, 5  ;;  %v6465_v57 = vunpack.c.l.b16 %v6464_v49  ;;  %v6467_v37 = vld [vmem:[#allocation16_spill] sm:$0xff] }
 0x21d   : > { %v2572_v62 = vrot.slane %v2570_v33, 4 }
 0x21e   : > { %v2950_v25 = vpop.f32.mrf.mxu2 }
 0x21f   : > { %v3150_v42 = vpop.f32.mrf.mxu3  ;;  %v3020_v53 = vadd.f32 %v2950_v25, %v2824_v60  ;;  %v2568_v60 = vsel %vm4739_vm4, %v2563_v5, %v2567_v44  ;;  %v6468_v5 = vunpack.c.l.b16 %v6467_v37  ;;  %v6469_v44 = vld [vmem:[#allocation21_spill] sm:$0xff] }
 0x220   : > { %v2757_v22 = vpop.f32.mrf.mxu1  ;;  %v6470_v43 = vunpack.c.l.b16 %v6469_v44 }
 0x221   : > { %v3220_v24 = vadd.f32 %v3150_v42, %v3020_v53  ;;  %v3401_v19 = vpop.f32.mrf.mxu0  ;;  %v2651_v42 = vunpack.c.l.b16 %v2554_v36 }
 0x222   : > { %v3066_v45 = vpack.c.b16 %v6470_v43, %v6468_v5 }
 0x223   : > { %4099 = vmatmul.msk.bf16.gmra.mxu1 %vm636_vm1, %v2669_v11  ;;  %v5809_v7 = vadd.f32 %v3398_v28, %v3220_v24  ;;  %4115 = vmatmul.msk.bf16.gmra.mxu2 %vm636_vm1, %v2869_v0  ;;  %v2825_v0 = vadd.f32 %v2757_v22, %v6462_v13  ;;  %v2652_v11 = vunpack.c.l.b16 %v2568_v60  ;;  %v2593_v60 = vshll.u32 %v510_v21, 16 }
 0x224   : > { %4131 = vmatmul.msk.bf16.gmra.mxu3 %vm636_vm1, %v3065_v17  ;;  %4147 = vmatmul.msk.bf16.gmra.mxu0 %vm636_vm1, %v3317_v51  ;;  %v2586_v17 = vrot.slane %v2584_v8, 4  ;;  %v2870_v51 = vpack.c.b16 %v6466_v41, %v6465_v57  ;;  %v6471_v8 = vld [vmem:[#allocation80_spill] sm:$0xff] }
 0x225   : > { %v4209_v48 = vpack.c.bf16 %v5809_v7, %v5807_v52  ;;  %v2670_v22 = vpack.c.b16 %v2652_v11, %v2651_v42  ;;  %v3318_v29 = vpack.c.b16 %v5360_v54, %v6471_v8  ;;  %v513_v54 = vld [vmem:[%s4789_s14 + $0x110] sm:$0xf]  ;;  %v6473_v8 = vunpack.c.l.b16 %v5306_v12 }
 0x226   : > { %v2953_v34 = vpop.f32.mrf.mxu2  ;;  %v2612_v57 = vshrl.u32 %v513_v54, 16  ;;  %v2615_v41 = vshll.u32 %v513_v54, 16  ;;  %v6476_v54 = vld [vmem:[#allocation22_spill] sm:$0xff] }
 0x227   : > { %v3153_v59 = vpop.f32.mrf.mxu3  ;;  %4273 = vst [vmem:[%s5717_s26 + $0x18] sm:$0xff] %v4209_v48   ;;  %v3021_v58 = vadd.f32 %v2953_v34, %v2825_v0  ;;  %v2576_v48 = vor.u32 %v2575_v3, %v2572_v62  ;;  %v2579_v34 = vshll.u32 %v508_v15, 16  ;;  %v2595_v3 = vrot.slane %v2593_v60, 5 }
 0x228   : > { %v2759_v28 = vpop.f32.mrf.mxu1 }
 0x229   : > { %v3403_v25 = vpop.f32.mrf.mxu0  ;;  %v2826_v53 = vadd.f32 %v2759_v28, %v6463_v55  ;;  %v3221_v33 = vadd.f32 %v3153_v59, %v3021_v58  ;;  %v2590_v28 = vor.u32 %v2589_v35, %v2586_v17  ;;  %v2577_v0 = vrot.slane %v2576_v48, 4  ;;  %v511_v58 = vld [vmem:[%s4789_s14 + $0x108] sm:$0xf]  ;;  %v5850_v55 = vld [vmem:[%s4623_s28 + $0x118] sm:$0xf] }
 0x22a   : > { %v2581_v42 = vrot.slane %v2579_v34, 5  ;;  %v2598_v21 = vshrl.u32 %v511_v58, 16  ;;  %v3291_v37 = vshll.u32 %v5850_v55, 16  ;;  %v512_v34 = vld [vmem:[%s4789_s14 + $0x10c] sm:$0x1] }
 0x22b   : > { %v5838_v11 = vadd.f32 %v3401_v19, %v3221_v33  ;;  %v2591_v62 = vrot.slane %v2590_v28, 4  ;;  %v2601_v19 = vshll.u32 %v511_v58, 16  ;;  %v2614_v33 = vrot.slane %v2612_v57, 4  ;;  %v514_v28 = vld [vmem:[%s4789_s14 + $0x114] sm:$0x1] }
 0x22c   : > { %v2600_v43 = vrot.slane %v2598_v21, 4  ;;  %v6478_v21 = vld [vmem:[#allocation28_spill] sm:$0xff]  ;;  %v414_v57 = vld [vmem:[%s4623_s28 + $0x11c] sm:$0x1] }
 0x22d   : > { %v2596_v49 = vsel %vm4739_vm4, %v2591_v62, %v2595_v3 }
 0x22e   : > { %v2955_v24 = vpop.f32.mrf.mxu2  ;;  %v2654_v44 = vunpack.c.l.b16 %v2596_v49  ;;  %v2607_v49 = vshll.u32 %v512_v34, 16 }
 0x22f   : > { %v3155_v32 = vpop.f32.mrf.mxu3  ;;  %v3022_v27 = vadd.f32 %v2955_v24, %v2826_v53  ;;  %v2582_v53 = vsel %vm4739_vm4, %v2577_v0, %v2581_v42  ;;  %v3293_v42 = vrot.slane %v3291_v37, 5 }
 0x230   : > { %v2762_v36 = vpop.f32.mrf.mxu1  ;;  %v2653_v5 = vunpack.c.l.b16 %v2582_v53 }
 0x231   : > { %v3222_v39 = vadd.f32 %v3155_v32, %v3022_v27  ;;  %v3406_v13 = vpop.f32.mrf.mxu0  ;;  %v2617_v27 = vrot.slane %v2615_v41, 5 }
 0x232   : > { %v2671_v58 = vpack.c.b16 %v2654_v44, %v2653_v5  ;;  %v3297_v5 = vshll.u32 %v414_v57, 16 }
 0x233   : > { %4100 = vmatmul.msk.bf16.gmra.mxu1 %vm636_vm1, %v2670_v22  ;;  %v5840_v59 = vadd.f32 %v3403_v25, %v3222_v39  ;;  %4116 = vmatmul.msk.bf16.gmra.mxu2 %vm636_vm1, %v2870_v51  ;;  %v6472_v51 = vld [vmem:[#allocation86_spill] sm:$0xff]  ;;  %v3288_v22 = vshrl.u32 %v5850_v55, 16  ;;  %v2618_v12 = vor.u32 %v2617_v27, %v2614_v33 }
 0x234   : > { %4132 = vmatmul.msk.bf16.gmra.mxu3 %vm636_vm1, %v3066_v45  ;;  %4148 = vmatmul.msk.bf16.gmra.mxu0 %vm636_vm1, %v3318_v29  ;;  %v2827_v24 = vadd.f32 %v2762_v36, %v6472_v51  ;;  %v2603_v45 = vrot.slane %v2601_v19, 5  ;;  %v6474_v36 = vld [vmem:[#allocation83_spill] sm:$0xff]  ;;  %v2621_v51 = vshll.u32 %v514_v28, 16  ;;  %v3299_v33 = vrot.slane %v3297_v5, 5 }
 0x235   : > { %v4214_v15 = vpack.c.bf16 %v5840_v59, %v5838_v11  ;;  %v6475_v29 = vunpack.c.l.b16 %v6474_v36  ;;  %v3290_v0 = vrot.slane %v3288_v22, 4 }
 0x236   : > { %v2958_v17 = vpop.f32.mrf.mxu2  ;;  %v2604_v53 = vor.u32 %v2603_v45, %v2600_v43  ;;  %v2619_v45 = vrot.slane %v2618_v12, 4 }
 0x237   : > { %v3158_v35 = vpop.f32.mrf.mxu3  ;;  %4274 = vst [vmem:[%s5717_s26 + $0x20] sm:$0xff] %v4214_v15   ;;  %v3023_v48 = vadd.f32 %v2958_v17, %v2827_v24  ;;  %v2871_v39 = vpack.c.b16 %v6475_v29, %v6473_v8  ;;  %v6477_v15 = vunpack.c.l.b16 %v6476_v54  ;;  %v6479_v17 = vunpack.c.l.b16 %v6478_v21  ;;  %v6480_v24 = vld [vmem:[#allocation85_spill] sm:$0xff] }
 0x238   : > { %v2764_v25 = vpop.f32.mrf.mxu1  ;;  %v3319_v22 = vpack.c.b16 %v5394_v50, %v6480_v24  ;;  %v3294_v36 = vor.u32 %v3293_v42, %v3290_v0  ;;  %v2605_v44 = vrot.slane %v2604_v53, 4  ;;  %v2609_v29 = vrot.slane %v2607_v49, 5  ;;  %v6481_v0 = vld [vmem:[#allocation87_spill] sm:$0xff] }
 0x239   : > { %v3408_v32 = vpop.f32.mrf.mxu0  ;;  %v2828_v60 = vadd.f32 %v2764_v25, %v5383_v38  ;;  %v3067_v19 = vpack.c.b16 %v6479_v17, %v6477_v15  ;;  %v3223_v41 = vadd.f32 %v3158_v35, %v3023_v48  ;;  %v2623_v50 = vrot.slane %v2621_v51, 5  ;;  %v6482_v51 = vld [vmem:[#allocation84_spill] sm:$0xff] }
 0x23a   : > { %v3295_v34 = vrot.slane %v3294_v36, 4  ;;  %v2856_v21 = vunpack.c.l.b16 %v5850_v55  ;;  %v6483_v24 = vunpack.c.l.b16 %v6482_v51 }
 0x23b   : > { %v5875_v43 = vadd.f32 %v3406_v13, %v3223_v41 }
 0x23c   : > { %v2872_v4 = vpack.c.b16 %v2856_v21, %v6483_v24 }
 0x23e   : > { %v2960_v62 = vpop.f32.mrf.mxu2 }
 0x23f   : > { %v3160_v3 = vpop.f32.mrf.mxu3  ;;  %v3024_v38 = vadd.f32 %v2960_v62, %v2828_v60  ;;  %v2624_v60 = vsel %vm4739_vm4, %v2619_v45, %v2623_v50 }
 0x240   : > { %v2767_v25 = vpop.f32.mrf.mxu1  ;;  %v2656_v54 = vunpack.c.l.b16 %v2624_v60 }
 0x241   : > { %v3224_v37 = vadd.f32 %v3160_v3, %v3024_v38  ;;  %v3411_v8 = vpop.f32.mrf.mxu0  ;;  %v2829_v42 = vadd.f32 %v2767_v25, %v6481_v0  ;;  %v3300_v3 = vsel %vm4739_vm4, %v3295_v34, %v3299_v33 }
 0x243   : > { %4101 = vmatmul.msk.bf16.gmra.mxu1 %vm636_vm1, %v2671_v58  ;;  %v5877_v35 = vadd.f32 %v3408_v32, %v3224_v37  ;;  %4117 = vmatmul.msk.bf16.gmra.mxu2 %vm636_vm1, %v2871_v39  ;;  %v2610_v32 = vsel %vm4739_vm4, %v2605_v44, %v2609_v29  ;;  %v450_v39 = vld [vmem:[%s4536_s19 + $0x118] sm:$0xf]  ;;  %s4190_s19 = sshll.u32 %s4490_s25, 7 }
 0x244   : > { %4133 = vmatmul.msk.bf16.gmra.mxu3 %vm636_vm1, %v3067_v19  ;;  %4149 = vmatmul.msk.bf16.gmra.mxu0 %vm636_vm1, %v3319_v22  ;;  %v2655_v58 = vunpack.c.l.b16 %v2610_v32  ;;  %v3052_v17 = vunpack.c.l.b16 %v450_v39  ;;  %v3304_v19 = vunpack.c.l.b16 %v3300_v3  ;;  %v6484_v22 = vld [vmem:[#allocation29_spill] sm:$0xff]  ;;  %s3716_s9 = scalar_lea.hbm %s6148_s5, %s4190_s19 }
 0x245   : > { %v4219_v48 = vpack.c.bf16 %v5877_v35, %v5875_v43  ;;  %v6485_v37 = vunpack.c.l.b16 %v6484_v22  ;;  %s3719_s11 = sshll.u32 %s3716_s9, 4  ;;  %s3720_s11 = int_to_ptr.hbm [resolvable:$true] %s3719_s11 }
 0x246   : > { %v2963_v27 = vpop.f32.mrf.mxu2  ;;  %v2672_v41 = vpack.c.b16 %v2656_v54, %v2655_v58  ;;  %v3320_v5 = vpack.c.b16 %v3304_v19, %v5397_v56  ;;  %s4350_s13 = sshra.s32 %s3720_s11, 4  ;;  %s4351_s13 = int_to_ptr.hbm [resolvable:$true] %s4350_s13 }
 0x247   : > { %v3163_v28 = vpop.f32.mrf.mxu3  ;;  %4275 = vst [vmem:[%s5717_s26 + $0x28] sm:$0xff] %v4219_v48   ;;  %v3025_v15 = vadd.f32 %v2963_v27, %v2829_v42  ;;  %v3068_v36 = vpack.c.b16 %v3052_v17, %v6485_v37  ;;  %s4352_s14 = scalar_lea.hbm %s4351_s13, 128  ;;  %p4357_p0 = scmp.lt.s32.totalorder %s4351_s13, %s6148_s5 }
 0x248   : > { %v2769_v13 = vpop.f32.mrf.mxu1  ;;  %p4353_p11 = scmp.ne.s32.totalorder %s4351_s13, %s4352_s14  ;;  %p4358_p1 = scmp.lt.s32.totalorder %s4356_s18, %s4352_s14 }
 0x249   : > { %v3413_v62 = vpop.f32.mrf.mxu0  ;;  %v2830_v53 = vadd.f32 %v2769_v13, %v5417_v16  ;;  %v3225_v38 = vadd.f32 %v3163_v28, %v3025_v15 }
 0x24a   : > { %p4354_p12 = pnand %p4353_p11, %p4507_p5  ;;  %p4359_p2 = por %p4358_p1, %p4357_p0 }
 0x24b   : > { %v5901_v16 = vadd.f32 %v3411_v8, %v3225_v38 }
 0x24c   : > { %p4355_p13 = pneg %p4354_p12 }
 0x24e   : > { %v2965_v49 = vpop.f32.mrf.mxu2  ;;  %p4360_p3 = pnand %p4359_p2, %p4355_p13 }
 0x24f   : > { %v3165_v57 = vpop.f32.mrf.mxu3  ;;  %v3026_v12 = vadd.f32 %v2965_v49, %v2830_v53 }
 0x250   : > { %v2772_v25 = vpop.f32.mrf.mxu1 }
 0x251   : > { %v3226_v55 = vadd.f32 %v3165_v57, %v3026_v12  ;;  %v3416_v44 = vpop.f32.mrf.mxu0  ;;  %v2831_v34 = vadd.f32 %v2772_v25, %v5427_v46 }
 0x253   : > { %4102 = vmatmul.msk.bf16.gmra.mxu1 %vm636_vm1, %v2672_v41  ;;  %v5903_v29 = vadd.f32 %v3413_v62, %v3226_v55  ;;  %4118 = vmatmul.msk.bf16.gmra.mxu2 %vm636_vm1, %v2872_v4 }
 0x254   : > { %4134 = vmatmul.msk.bf16.gmra.mxu3 %vm636_vm1, %v3068_v36  ;;  %4150 = vmatmul.msk.bf16.gmra.mxu0 %vm636_vm1, %v3320_v5 }
 0x255   : > { %v4224_v45 = vpack.c.bf16 %v5903_v29, %v5901_v16 }
 0x256   : > { %v2968_v50 = vpop.f32.mrf.mxu2 }
 0x257   : > { %v3168_v48 = vpop.f32.mrf.mxu3  ;;  %4276 = vst [vmem:[%s5717_s26 + $0x30] sm:$0xff] %v4224_v45   ;;  %v3027_v33 = vadd.f32 %v2968_v50, %v2831_v34 }
 0x258   : > { %v2774_v56 = vpop.f32.mrf.mxu1 }
 0x259   : > { %v3418_v8 = vpop.f32.mrf.mxu0  ;;  %v2832_v27 = vadd.f32 %v2774_v56, %v5437_v47  ;;  %v3227_v32 = vadd.f32 %v3168_v48, %v3027_v33 }
 0x25b   : > { %v5913_v62 = vadd.f32 %v3416_v44, %v3227_v32 }
 0x25e   : > { %v2970_v28 = vpop.f32.mrf.mxu2 }
 0x25f   : > { %v3170_v13 = vpop.f32.mrf.mxu3  ;;  %v3028_v60 = vadd.f32 %v2970_v28, %v2832_v27 }
 0x260   : > { %v2777_v39 = vpop.f32.mrf.mxu1 }
 0x261   : > { %v3228_v0 = vadd.f32 %v3170_v13, %v3028_v60  ;;  %v3421_v42 = vpop.f32.mrf.mxu0  ;;  %v2833_v47 = vadd.f32 %v2777_v39, %v5450_v10 }
 0x263   : > { %v5915_v3 = vadd.f32 %v3418_v8, %v3228_v0 }
 0x265   : > { %v4229_v58 = vpack.c.bf16 %v5915_v3, %v5913_v62 }
 0x266   : > { %v2973_v46 = vpop.f32.mrf.mxu2 }
 0x267   : > { %v3173_v54 = vpop.f32.mrf.mxu3  ;;  %4277 = vst [vmem:[%s5717_s26 + $0x38] sm:$0xff] %v4229_v58   ;;  %v3029_v17 = vadd.f32 %v2973_v46, %v2833_v47  ;;  %v3493_v47 = vadd.f32 %v5705_v31, %v5703_v18 }
 0x268   : > { %v2779_v15 = vpop.f32.mrf.mxu1 }
 0x269   : > { %v3423_v21 = vpop.f32.mrf.mxu0  ;;  %v2834_v19 = vadd.f32 %v2779_v15, %v5468_v23  ;;  %v3229_v57 = vadd.f32 %v3173_v54, %v3029_v17 }
 0x26b   : > { %v5922_v51 = vadd.f32 %v3421_v42, %v3229_v57 }
 0x26e   : > { %v2975_v53 = vpop.f32.mrf.mxu2 }
 0x26f   : > { %v3175_v49 = vpop.f32.mrf.mxu3  ;;  %v3030_v41 = vadd.f32 %v2975_v53, %v2834_v19  ;;  %v3494_v19 = vadd.f32 %v3493_v47, %v5745_v14  ;;  %v6486_v47 = vld [vmem:[#allocation32_spill] sm:$0xff] }
 0x270   : > { %v2782_v38 = vpop.f32.mrf.mxu1 }
 0x271   : > { %v3230_v12 = vadd.f32 %v3175_v49, %v3030_v41  ;;  %v3426_v25 = vpop.f32.mrf.mxu0  ;;  %v2835_v23 = vadd.f32 %v2782_v38, %v5483_v61  ;;  %v3495_v49 = vadd.f32 %v3494_v19, %v5747_v30 }
 0x273   : > { %v5924_v24 = vadd.f32 %v3423_v21, %v3230_v12  ;;  %v3496_v38 = vadd.f32 %v3495_v49, %v5776_v9 }
 0x275   : > { %v4234_v4 = vpack.c.bf16 %v5924_v24, %v5922_v51 }
 0x276   : > { %v2978_v10 = vpop.f32.mrf.mxu2 }
 0x277   : > { %v3178_v22 = vpop.f32.mrf.mxu3  ;;  %4278 = vst [vmem:[%s5717_s26 + $0x40] sm:$0xff] %v4234_v4   ;;  %v3031_v5 = vadd.f32 %v2978_v10, %v2835_v23 }
 0x278   : > { %v2784_v37 = vpop.f32.mrf.mxu1 }
 0x279   : > { %v3428_v36 = vpop.f32.mrf.mxu0  ;;  %v2836_v55 = vadd.f32 %v2784_v37, %v5502_v26  ;;  %v3231_v50 = vadd.f32 %v3178_v22, %v3031_v5 }
 0x27b   : > { %v5931_v33 = vadd.f32 %v3426_v25, %v3231_v50  ;;  %v3497_v25 = vadd.f32 %v3496_v38, %v5778_v63 }
 0x27d   : > { %v3498_v22 = vadd.f32 %v3497_v25, %v5807_v52 }
 0x27e   : > { %v2980_v44 = vpop.f32.mrf.mxu2 }
 0x27f   : > { %v3180_v45 = vpop.f32.mrf.mxu3  ;;  %v3032_v48 = vadd.f32 %v2980_v44, %v2836_v55  ;;  %v3499_v23 = vadd.f32 %v3498_v22, %v5809_v7 }
 0x280   : > { %v2787_v56 = vpop.f32.mrf.mxu1 }
 0x281   : > { %v3232_v34 = vadd.f32 %v3180_v45, %v3032_v48  ;;  %v3431_v8 = vpop.f32.mrf.mxu0  ;;  %v2837_v26 = vadd.f32 %v2787_v56, %v5516_v1  ;;  %v3500_v44 = vadd.f32 %v3499_v23, %v5838_v11  ;;  %v6487_v23 = vld [vmem:[#allocation23_spill] sm:$0xff] }
 0x283   : > { %v5933_v27 = vadd.f32 %v3428_v36, %v3232_v34  ;;  %v3501_v56 = vadd.f32 %v3500_v44, %v5840_v59 }
 0x285   : > { %v4239_v28 = vpack.c.bf16 %v5933_v27, %v5931_v33 }
 0x286   : > { %v2983_v61 = vpop.f32.mrf.mxu2 }
 0x287   : > { %v3183_v13 = vpop.f32.mrf.mxu3  ;;  %4279 = vst [vmem:[%s5717_s26 + $0x48] sm:$0xff] %v4239_v28   ;;  %v3033_v39 = vadd.f32 %v2983_v61, %v2837_v26 }
 0x288   : > { %v2789_v32 = vpop.f32.mrf.mxu1 }
 0x289   : > { %v3433_v60 = vpop.f32.mrf.mxu0  ;;  %v2838_v0 = vadd.f32 %v2789_v32, %v5529_v20  ;;  %v3233_v46 = vadd.f32 %v3183_v13, %v3033_v39 }
 0x28b   : > { %v5943_v53 = vadd.f32 %v3431_v8, %v3233_v46  ;;  %v3502_v8 = vadd.f32 %v3501_v56, %v5875_v43 }
 0x28e   : > { %v2985_v42 = vpop.f32.mrf.mxu2 }
 0x28f   : > { %v3185_v58 = vpop.f32.mrf.mxu3  ;;  %v3034_v54 = vadd.f32 %v2985_v42, %v2838_v0 }
 0x290   : > { %v2792_v15 = vpop.f32.mrf.mxu1 }
 0x291   : > { %v3234_v21 = vadd.f32 %v3185_v58, %v3034_v54  ;;  %v3436_v17 = vpop.f32.mrf.mxu0  ;;  %v2839_v4 = vadd.f32 %v2792_v15, %v5539_v2 }
 0x293   : > { %v5945_v1 = vadd.f32 %v3433_v60, %v3234_v21 }
 0x295   : > { %v4244_v20 = vpack.c.bf16 %v5945_v1, %v5943_v53 }
 0x296   : > { %v2988_v57 = vpop.f32.mrf.mxu2 }
 0x297   : > { %v3188_v41 = vpop.f32.mrf.mxu3  ;;  %4280 = vst [vmem:[%s5717_s26 + $0x50] sm:$0xff] %v4244_v20   ;;  %v3035_v37 = vadd.f32 %v2988_v57, %v2839_v4 }
 0x298   : > { %v2794_v12 = vpop.f32.mrf.mxu1 }
 0x299   : > { %v3438_v10 = vpop.f32.mrf.mxu0  ;;  %v2840_v36 = vadd.f32 %v2794_v12, %v5557_v6  ;;  %v3235_v45 = vadd.f32 %v3188_v41, %v3035_v37  ;;  %v3503_v6 = vadd.f32 %v3502_v8, %v5877_v35 }
 0x29b   : > { %v5960_v28 = vadd.f32 %v3436_v17, %v3235_v45  ;;  %v3504_v60 = vadd.f32 %v3503_v6, %v5901_v16  ;;  %v6488_v6 = vld [vmem:[#allocation30_spill] sm:$0xff] }
 0x29d   : > { %v3505_v0 = vadd.f32 %v3504_v60, %v5903_v29 }
 0x29e   : > { %v2990_v5 = vpop.f32.mrf.mxu2 }
 0x29f   : > { %v3190_v55 = vpop.f32.mrf.mxu3  ;;  %v3036_v50 = vadd.f32 %v2990_v5, %v2840_v36  ;;  %v3506_v46 = vadd.f32 %v3505_v0, %v5913_v62 }
 0x2a0   : > { %v2797_v48 = vpop.f32.mrf.mxu1 }
 0x2a1   : > { %v3236_v34 = vadd.f32 %v3190_v55, %v3036_v50  ;;  %v3441_v2 = vpop.f32.mrf.mxu0  ;;  %v2841_v42 = vadd.f32 %v2797_v48, %v5567_v40  ;;  %v3507_v15 = vadd.f32 %v3506_v46, %v5915_v3 }
 0x2a3   : > { %v5962_v61 = vadd.f32 %v3438_v10, %v3236_v34  ;;  %v3508_v49 = vadd.f32 %v3507_v15, %v5922_v51 }
 0x2a5   : > { %v4249_v13 = vpack.c.bf16 %v5962_v61, %v5960_v28  ;;  %v3509_v38 = vadd.f32 %v3508_v49, %v5924_v24 }
 0x2a6   : > { %v2993_v32 = vpop.f32.mrf.mxu2 }
 0x2a7   : > { %v3193_v26 = vpop.f32.mrf.mxu3  ;;  %4281 = vst [vmem:[%s5717_s26 + $0x58] sm:$0xff] %v4249_v13   ;;  %v3037_v54 = vadd.f32 %v2993_v32, %v2841_v42  ;;  %v3510_v25 = vadd.f32 %v3509_v38, %v5931_v33 }
 0x2a8   : > { %v2799_v39 = vpop.f32.mrf.mxu1 }
 0x2a9   : > { %v3443_v58 = vpop.f32.mrf.mxu0  ;;  %v2842_v21 = vadd.f32 %v2799_v39, %v6486_v47  ;;  %v3237_v20 = vadd.f32 %v3193_v26, %v3037_v54  ;;  %v3511_v22 = vadd.f32 %v3510_v25, %v5933_v27 }
 0x2ab   : > { %v5977_v4 = vadd.f32 %v3441_v2, %v3237_v20  ;;  %v3512_v44 = vadd.f32 %v3511_v22, %v5943_v53  ;;  %v6490_v22 = vld [vmem:[#allocation36_spill] sm:$0xff] }
 0x2ad   : > { %v3513_v48 = vadd.f32 %v3512_v44, %v5945_v1 }
 0x2ae   : > { %v2995_v17 = vpop.f32.mrf.mxu2 }
 0x2af   : > { %v3195_v19 = vpop.f32.mrf.mxu3  ;;  %v3038_v57 = vadd.f32 %v2995_v17, %v2842_v21  ;;  %v3514_v34 = vadd.f32 %v3513_v48, %v5960_v28 }
 0x2b0   : > { %v2802_v41 = vpop.f32.mrf.mxu1 }
 0x2b1   : > { %v3238_v12 = vadd.f32 %v3195_v19, %v3038_v57  ;;  %v3446_v40 = vpop.f32.mrf.mxu0  ;;  %v2843_v36 = vadd.f32 %v2802_v41, %v6487_v23  ;;  %v3515_v8 = vadd.f32 %v3514_v34, %v5962_v61  ;;  %v6489_v19 = vld [vmem:[#allocation34_spill] sm:$0xff] }
 0x2b2   : > { %v6491_v34 = vld [vmem:[#allocation54_spill] sm:$0xff] }
 0x2b3   : > { %v5979_v10 = vadd.f32 %v3443_v58, %v3238_v12  ;;  %v3516_v60 = vadd.f32 %v3515_v8, %v5977_v4 }
 0x2b5   : > { %v4254_v37 = vpack.c.bf16 %v5979_v10, %v5977_v4  ;;  %v3517_v58 = vadd.f32 %v3516_v60, %v5979_v10 }
 0x2b6   : > { %v2998_v5 = vpop.f32.mrf.mxu2 }
 0x2b7   : > { %v3198_v55 = vpop.f32.mrf.mxu3  ;;  %4282 = vst [vmem:[%s5717_s26 + $0x60] sm:$0xff] %v4254_v37   ;;  %v3039_v45 = vadd.f32 %v2998_v5, %v2843_v36 }
 0x2b8   : > { %v2804_v50 = vpop.f32.mrf.mxu1 }
 0x2b9   : > { %v3448_v56 = vpop.f32.mrf.mxu0  ;;  %v3239_v2 = vadd.f32 %v3198_v55, %v3039_v45  ;;  %v2844_v13 = vadd.f32 %v2804_v50, %v6488_v6 }
 0x2bb   : > { %v5992_v39 = vadd.f32 %v3446_v40, %v3239_v2 }
 0x2bd   : > { %v3518_v54 = vadd.f32 %v3517_v58, %v5992_v39  ;;  %v6492_v58 = vld [vmem:[#allocation58_spill] sm:$0xff] }
 0x2be   : > { %v3000_v32 = vpop.f32.mrf.mxu2 }
 0x2bf   : > { %v3200_v26 = vpop.f32.mrf.mxu3  ;;  %v3040_v0 = vadd.f32 %v3000_v32, %v2844_v13 }
 0x2c0   : > { %v2807_v42 = vpop.f32.mrf.mxu1 }
 0x2c1   : > { %v3240_v46 = vadd.f32 %v3200_v26, %v3040_v0  ;;  %v3451_v47 = vpop.f32.mrf.mxu0  ;;  %v2845_v49 = vadd.f32 %v2807_v42, %v6489_v19 }
 0x2c3   : > { %v5996_v15 = vadd.f32 %v3448_v56, %v3240_v46 }
 0x2c5   : > { %v3519_v21 = vadd.f32 %v3518_v54, %v5996_v15  ;;  %v4259_v17 = vpack.c.bf16 %v5996_v15, %v5992_v39 }
 0x2c6   : > { %v3003_v20 = vpop.f32.mrf.mxu2 }
 0x2c7   : > { %v3203_v57 = vpop.f32.mrf.mxu3  ;;  %4283 = vst [vmem:[%s5717_s26 + $0x68] sm:$0xff] %v4259_v17   ;;  %v3041_v41 = vadd.f32 %v3003_v20, %v2845_v49 }
 0x2c8   : > { %v2809_v38 = vpop.f32.mrf.mxu1 }
 0x2c9   : > { %v3241_v12 = vadd.f32 %v3203_v57, %v3041_v41  ;;  %v2846_v37 = vadd.f32 %v2809_v38, %v6490_v22  ;;  %v3453_v23 = vpop.f32.mrf.mxu0 }
 0x2cb   : > { %v6003_v40 = vadd.f32 %v3451_v47, %v3241_v12 }
 0x2cd   : > { %v3520_v25 = vadd.f32 %v3519_v21, %v6003_v40 }
 0x2ce   : > { %v3005_v36 = vpop.f32.mrf.mxu2 }
 0x2cf   : > { %v3205_v5 = vpop.f32.mrf.mxu3  ;;  %v3042_v55 = vadd.f32 %v3005_v36, %v2846_v37 }
 0x2d0   : > { %v2812_v44 = vpop.f32.mrf.mxu1 }
 0x2d1   : > { %v3242_v45 = vadd.f32 %v3205_v5, %v3042_v55  ;;  %v2847_v2 = vadd.f32 %v2812_v44, %v6491_v34  ;;  %v3456_v32 = vpop.f32.mrf.mxu0 }
 0x2d3   : > { %v6007_v50 = vadd.f32 %v3453_v23, %v3242_v45 }
 0x2d5   : > { %v3521_v48 = vadd.f32 %v3520_v25, %v6007_v50  ;;  %v4264_v56 = vpack.c.bf16 %v6007_v50, %v6003_v40 }
 0x2d6   : > { %v3008_v8 = vpop.f32.mrf.mxu2 }
 0x2d7   : > { %v3208_v6 = vpop.f32.mrf.mxu3  ;;  %4284 = vst [vmem:[%s5717_s26 + $0x70] sm:$0xff] %v4264_v56   ;;  %v3043_v13 = vadd.f32 %v3008_v8, %v2847_v2 }
 0x2d8   : > { %v2814_v60 = vpop.f32.mrf.mxu1 }
 0x2d9   : > { %v3243_v26 = vadd.f32 %v3208_v6, %v3043_v13  ;;  %v2848_v46 = vadd.f32 %v2814_v60, %v6492_v58  ;;  %v3458_v19 = vpop.f32.mrf.mxu0 }
 0x2db   : > { %v6014_v0 = vadd.f32 %v3456_v32, %v3243_v26 }
 0x2dd   : > { %v3522_v42 = vadd.f32 %v3521_v48, %v6014_v0 }
 0x2de   : > { %v3010_v54 = vpop.f32.mrf.mxu2 }
 0x2df   : > { %v3044_v47 = vadd.f32 %v3010_v54, %v2848_v46  ;;  %v3210_v21 = vpop.f32.mrf.mxu3 }
 0x2e1   : > { %v3244_v17 = vadd.f32 %v3210_v21, %v3044_v47 }
 0x2e3   : > { %v6023_v49 = vadd.f32 %v3458_v19, %v3244_v17 }
 0x2e5   : > { %v3523_v20 = vadd.f32 %v3522_v42, %v6023_v49  ;;  %v4269_v57 = vpack.c.bf16 %v6023_v49, %v6014_v0 }
 0x2e7   : > { %v3524_v41 = vrot.slane %v3523_v20, 4  ;;  %4285 = vst [vmem:[%s5717_s26 + $0x78] sm:$0xff] %v4269_v57  }
 0x2e8   : > { %4363 = shalt.err (!%p4360_p3)
}
 0x2e9   : > { %s4432_s26 = smov 64   ;;  %s4433_s28 = smov 4   ;;  %v3525_v38 = vadd.f32 %v3524_v41, %v3523_v20  ;;  %vm3632_vm5 = vcmask 1040384  }
 0x2ea   : > { %4290 = dma.vmem_to_hbm [thread:$0]  (%p4507_p5), %s3718_s10, 2048, %s3720_s11, %s3700_s12, %s4432_s26, %s4432_s26, %s4433_s28  }
 0x2eb   : > { %v3526_v12 = vrot.slane %v3525_v38, 2  ;;  %s3870_s29 = sshll.u32 %s5691_s16, 1  ;;  %s4155_s9 = sshll.u32 %s4490_s25, 1 }
 0x2ec   : > { %s3732_s12 = scalar_lea.hbm %s6149_s6, %s4155_s9  ;;  %s312_s13 = scalar_lea.vmem [#allocation4], %s3870_s29 }
 0x2ed   : > { %v3527_v25 = vadd.f32 %v3526_v12, %v3525_v38  ;;  %s3734_s14 = sshll.u32 %s312_s13, 4  ;;  %s3736_s15 = sshll.u32 %s3732_s12, 4  ;;  %s3735_s14 = int_to_ptr.vmem [resolvable:$true] %s3734_s14  ;;  %s3737_s15 = int_to_ptr.hbm [resolvable:$true] %s3736_s15 }
 0x2ee   : > { %s3705_s17 = scalar_lea.sflag [#allocation5], %s5691_s16  ;;  %s4378_s25 = sshra.s32 %s3737_s15, 4  ;;  %s4379_s25 = int_to_ptr.hbm [resolvable:$true] %s4378_s25 }
 0x2ef   : > { %v3528_v22 = vrot.slane %v3527_v25, 1  ;;  %s4380_s18 = scalar_lea.hbm %s4379_s25, 2  ;;  %s4384_s26 = scalar_lea.hbm %s6149_s6, 4 }
 0x2f0   : > { %p4381_p4 = scmp.ne.s32.totalorder %s4379_s25, %s4380_s18  ;;  %p4385_p9 = scmp.lt.s32.totalorder %s4379_s25, %s6149_s6 }
 0x2f1   : > { %v6040_v37 = vadd.f32 %v3528_v22, %v3527_v25  ;;  %p4386_p10 = scmp.lt.s32.totalorder %s4384_s26, %s4380_s18 }
 0x2f2   : > { %p4382_p7 = pnand %p4381_p4, %p4507_p5 }
 0x2f3   : > { %v6043_v23 = vmul.f32 0.00390625, %v6040_v37  ;;  %p4387_p11 = por %p4386_p10, %p4385_p9 }
 0x2f4   : > { %p4383_p8 = pneg %p4382_p7 }
 0x2f5   : > { %v3531_v36 = vsub.f32 %v5703_v18, %v6043_v23  ;;  %v3532_v5 = vsub.f32 %v5705_v31, %v6043_v23  ;;  %v3533_v55 = vsub.f32 %v5745_v14, %v6043_v23  ;;  %v3534_v48 = vsub.f32 %v5747_v30, %v6043_v23 }
 0x2f6   : > { %v3535_v56 = vsub.f32 %v5776_v9, %v6043_v23  ;;  %v3536_v8 = vsub.f32 %v5778_v63, %v6043_v23  ;;  %v3537_v31 = vsub.f32 %v5807_v52, %v6043_v23  ;;  %v3538_v32 = vsub.f32 %v5809_v7, %v6043_v23  ;;  %p4388_p12 = pnand %p4387_p11, %p4383_p8 }
 0x2f7   : > { %v3563_v44 = vmul.f32 %v3531_v36, %v3531_v36  ;;  %v3564_v45 = vmul.f32 %v3532_v5, %v3532_v5  ;;  %v3565_v34 = vmul.f32 %v3533_v55, %v3533_v55  ;;  %v3566_v18 = vmul.f32 %v3534_v48, %v3534_v48 }
 0x2f8   : > { %v3567_v13 = vmul.f32 %v3535_v56, %v3535_v56  ;;  %v3568_v26 = vmul.f32 %v3536_v8, %v3536_v8  ;;  %v3539_v9 = vsub.f32 %v5838_v11, %v6043_v23  ;;  %v3569_v60 = vmul.f32 %v3537_v31, %v3537_v31 }
 0x2f9   : > { %v3595_v2 = vadd.f32 %v3564_v45, %v3563_v44  ;;  %v3540_v63 = vsub.f32 %v5840_v59, %v6043_v23  ;;  %v3570_v58 = vmul.f32 %v3538_v32, %v3538_v32  ;;  %v3541_v52 = vsub.f32 %v5875_v43, %v6043_v23 }
 0x2fa   : > { %v3571_v54 = vmul.f32 %v3539_v9, %v3539_v9  ;;  %v3542_v7 = vsub.f32 %v5877_v35, %v6043_v23  ;;  %v3543_v11 = vsub.f32 %v5901_v16, %v6043_v23  ;;  %v3544_v59 = vsub.f32 %v5903_v29, %v6043_v23 }
 0x2fb   : > { %v3596_v6 = vadd.f32 %v3595_v2, %v3565_v34  ;;  %v3572_v21 = vmul.f32 %v3540_v63, %v3540_v63  ;;  %v3573_v19 = vmul.f32 %v3541_v52, %v3541_v52  ;;  %v3545_v43 = vsub.f32 %v5913_v62, %v6043_v23 }
 0x2fc   : > { %v3574_v57 = vmul.f32 %v3542_v7, %v3542_v7  ;;  %v3575_v38 = vmul.f32 %v3543_v11, %v3543_v11  ;;  %v3546_v35 = vsub.f32 %v5915_v3, %v6043_v23  ;;  %v3576_v25 = vmul.f32 %v3544_v59, %v3544_v59 }
 0x2fd   : > { %v3597_v14 = vadd.f32 %v3596_v6, %v3566_v18  ;;  %v3547_v16 = vsub.f32 %v5922_v51, %v6043_v23  ;;  %v3577_v36 = vmul.f32 %v3545_v43, %v3545_v43  ;;  %v3548_v29 = vsub.f32 %v5924_v24, %v6043_v23 }
 0x2fe   : > { %v3578_v55 = vmul.f32 %v3546_v35, %v3546_v35  ;;  %v3549_v62 = vsub.f32 %v5931_v33, %v6043_v23  ;;  %v3550_v3 = vsub.f32 %v5933_v27, %v6043_v23  ;;  %v3551_v51 = vsub.f32 %v5943_v53, %v6043_v23 }
 0x2ff   : > { %v3598_v30 = vadd.f32 %v3597_v14, %v3567_v13  ;;  %v3579_v45 = vmul.f32 %v3547_v16, %v3547_v16  ;;  %v3580_v56 = vmul.f32 %v3548_v29, %v3548_v29  ;;  %v3552_v24 = vsub.f32 %v5945_v1, %v6043_v23 }
 0x300   : > { %v3581_v2 = vmul.f32 %v3549_v62, %v3549_v62  ;;  %v3582_v18 = vmul.f32 %v3550_v3, %v3550_v3  ;;  %v3553_v33 = vsub.f32 %v5960_v28, %v6043_v23  ;;  %v3583_v31 = vmul.f32 %v3551_v51, %v3551_v51 }
 0x301   : > { %v3599_v42 = vadd.f32 %v3598_v30, %v3568_v26  ;;  %v3554_v27 = vsub.f32 %v5962_v61, %v6043_v23  ;;  %v3584_v14 = vmul.f32 %v3552_v24, %v3552_v24  ;;  %v3555_v53 = vsub.f32 %v5977_v4, %v6043_v23 }
 0x302   : > { %v3585_v26 = vmul.f32 %v3553_v33, %v3553_v33  ;;  %v3556_v1 = vsub.f32 %v5979_v10, %v6043_v23  ;;  %v3557_v28 = vsub.f32 %v5992_v39, %v6043_v23  ;;  %v3558_v61 = vsub.f32 %v5996_v15, %v6043_v23 }
 0x303   : > { %v3600_v46 = vadd.f32 %v3599_v42, %v3569_v60  ;;  %v3586_v9 = vmul.f32 %v3554_v27, %v3554_v27  ;;  %v3587_v42 = vmul.f32 %v3555_v53, %v3555_v53  ;;  %v3559_v4 = vsub.f32 %v6003_v40, %v6043_v23 }
 0x304   : > { %v3589_v52 = vmul.f32 %v3557_v28, %v3557_v28  ;;  %v3560_v10 = vsub.f32 %v6007_v50, %v6043_v23  ;;  %v3561_v39 = vsub.f32 %v6014_v0, %v6043_v23  ;;  %v3562_v15 = vsub.f32 %v6023_v49, %v6043_v23 }
 0x305   : > { %v3601_v47 = vadd.f32 %v3600_v46, %v3570_v58  ;;  %v3588_v58 = vmul.f32 %v3556_v1, %v3556_v1 }
 0x306   : > { %v3592_v11 = vmul.f32 %v3560_v10, %v3560_v10  ;;  %v3593_v40 = vmul.f32 %v3561_v39, %v3561_v39  ;;  %v3594_v59 = vmul.f32 %v3562_v15, %v3562_v15 }
 0x307   : > { %v3602_v17 = vadd.f32 %v3601_v47, %v3571_v54  ;;  %v3590_v47 = vmul.f32 %v3558_v61, %v3558_v61 }
 0x309   : > { %v3603_v20 = vadd.f32 %v3602_v17, %v3572_v21  ;;  %v3591_v21 = vmul.f32 %v3559_v4, %v3559_v4 }
 0x30b   : > { %v3604_v41 = vadd.f32 %v3603_v20, %v3573_v19 }
 0x30d   : > { %v3605_v12 = vadd.f32 %v3604_v41, %v3574_v57 }
 0x30f   : > { %v3606_v22 = vadd.f32 %v3605_v12, %v3575_v38 }
 0x311   : > { %v3607_v5 = vadd.f32 %v3606_v22, %v3576_v25 }
 0x313   : > { %v3608_v44 = vadd.f32 %v3607_v5, %v3577_v36 }
 0x315   : > { %v3609_v48 = vadd.f32 %v3608_v44, %v3578_v55 }
 0x317   : > { %v3610_v34 = vadd.f32 %v3609_v48, %v3579_v45 }
 0x319   : > { %v3611_v8 = vadd.f32 %v3610_v34, %v3580_v56 }
 0x31b   : > { %v3612_v6 = vadd.f32 %v3611_v8, %v3581_v2 }
 0x31d   : > { %v3613_v13 = vadd.f32 %v3612_v6, %v3582_v18 }
 0x31f   : > { %v3614_v32 = vadd.f32 %v3613_v13, %v3583_v31 }
 0x321   : > { %v3615_v30 = vadd.f32 %v3614_v32, %v3584_v14 }
 0x323   : > { %v3616_v60 = vadd.f32 %v3615_v30, %v3585_v26 }
 0x325   : > { %v3617_v63 = vadd.f32 %v3616_v60, %v3586_v9 }
 0x327   : > { %v3618_v46 = vadd.f32 %v3617_v63, %v3587_v42 }
 0x329   : > { %v3619_v54 = vadd.f32 %v3618_v46, %v3588_v58 }
 0x32b   : > { %v3620_v7 = vadd.f32 %v3619_v54, %v3589_v52 }
 0x32d   : > { %v3621_v17 = vadd.f32 %v3620_v7, %v3590_v47 }
 0x32f   : > { %v3622_v19 = vadd.f32 %v3621_v17, %v3591_v21 }
 0x331   : > { %v3623_v20 = vadd.f32 %v3622_v19, %v3592_v11 }
 0x333   : > { %v3624_v57 = vadd.f32 %v3623_v20, %v3593_v40 }
 0x335   : > { %v3625_v41 = vadd.f32 %v3624_v57, %v3594_v59 }
 0x337   : > { %v3626_v50 = vrot.slane %v3625_v41, 4 }
 0x339   : > { %v3627_v43 = vadd.f32 %v3626_v50, %v3625_v41 }
 0x33b   : > { %v3628_v38 = vrot.slane %v3627_v43, 2 }
 0x33d   : > { %v3629_v0 = vadd.f32 %v3628_v38, %v3627_v43 }
 0x33f   : > { %v3630_v49 = vrot.slane %v3629_v0, 1 }
 0x341   : > { %v3631_v23 = vadd.f32 %v3630_v49, %v3629_v0 }
 0x343   : > { %v3633_v12 = vsel %vm3632_vm5, %v6040_v37, %v3631_v23 }
 0x344   : > { %3634 = vst [vmem:[%s312_s13] sm:$0x3] %v3633_v12 }
 0x345   : > { %4391 = shalt.err (!%p4388_p12)
}
 0x346   : > { %4291 = dma.vmem_to_hbm [thread:$0]  (%p4507_p5), %s3735_s14, 32, %s3737_s15, %s3705_s17  }
 0x347 PF: > { %p4301_p13 = scmp.ge.s32.totalorder %s4430_s24, 2  ;;  %s3748_s16 = sand.u32 1, %s4418_s21  }
 0x348   : > { %s3749_s9 = scalar_lea.sflag [#allocation3], %s3748_s16 }
 0x349   : > { %p4295_p0 = pnand %p4301_p13, %p4511_p6 }
 0x34b   : > { %p4296_p1 = pneg %p4295_p0 }
 0x34d   : > { %4409 = dma.done.wait (%p4296_p1), %s3749_s9, 2048  }
 0x34e   : > { %4411 = vsyncadd (%p4296_p1), %s3749_s9, 4294965248  ;;  %s3759_s10 = scalar_lea.sflag [#allocation5], %s3748_s16 }
 0x34f   : > { %4413 = dma.done.wait (%p4296_p1), %s3759_s10, 32  }
 0x350   : > { %4415 = vsyncadd (%p4296_p1), %s3759_s10, 4294967264  ;;  %p20_p5 = scmp.ge.s32.totalorder %s4494_s27, 4   ;;  %s6493_s21 = smov %s4422_s22 }
 0x351   : > { %s6494_s22 = smov %s4426_s23  ;;  %s6495_s23 = smov %s4505_s30 }
 0x352   : > { %s6496_s24 = smov %s4494_s27  ;;  %22 = sbr.rel (!%p20_p5) target bundleno = 5 (0x5), region = 101 }
 0x357   :  { %3765 = vsyncpa [#allocation3], 1 }
 0x358   :  { %3767 = vsyncpa [#allocation3 + $0x1], 1 }
 0x359   :  { %3768 = vsyncpa [#allocation5], 1 }
 0x35a   :  { %3770 = vsyncpa [#allocation5 + $0x1], 1 }

</bundles_post_ra>
